<compile_context>
chip_gen: v6e
topology: v6e:2x2x1
jax: 0.10.0
libtpu: 0.0.40
codegen_flags: <defaults>
</compile_context>

<pallas_src>
import functools

import jax
import jax.numpy as jnp
from jax.experimental import pallas as pl
from jax.experimental.pallas import tpu as pltpu


def _conv_out(size, k, s, p):
    return (size + 2 * p - k) // s + 1


def _tap_conv(src_ref, *, K, s, Ho, Wo, w_ref=None, w_scale=None, slab_ref=None):
    """Single-channel 2-D cross-correlation of an already-padded VMEM ref.

    src_ref : (Hp, Wp) VMEM ref holding the padded layer input.
    w_ref   : optional (K, K) SMEM weights (read as scalars per tap).
    w_scale : optional python float applied once (uniform-weight AvgPool layers).
    slab_ref: scratch used to hoist the per-kw lane offset for strided layers.
    Returns the (Ho, Wo) float32 layer output as a value.
    """
    Hp, Wp = src_ref.shape

    def add_tap(acc, tap, kh, kw):
        if w_ref is not None:
            tap = w_ref[kh, kw] * tap          # scalar (SMEM) * vector FMA on the VPU
        return acc + tap

    if s == 1:
        acc = jnp.zeros((Ho, Wo), jnp.float32)
        for kh in range(K):
            for kw in range(K):
                acc = add_tap(acc, src_ref[kh:kh + Ho, kw:kw + Wo], kh, kw)
    else:
        Wf = Wp - K + 1                        # full-width (un-subsampled) columns
        acc = jnp.zeros((Ho, Wf), jnp.float32)
        for kw in range(K):
            # Hoist the lane (W) offset: one lane-shifted copy per kw ...
            slab_ref[0:Hp, 0:Wf] = src_ref[:, kw:kw + Wf]
            for kh in range(K):
                # ... so every tap is a cheap sublane-strided load (no lane work).
                tap = slab_ref[pl.ds(kh, Ho, stride=s), pl.ds(0, Wf)]
                acc = add_tap(acc, tap, kh, kw)
        # Apply the column (lane-axis) stride ONCE per layer: out[:, v] = acc[:, s*v].
        acc = jnp.concatenate([acc[:, s * v:s * v + 1] for v in range(Wo)], axis=1)

    if w_scale is not None:
        acc = acc * w_scale
    return acc


def _fused_kernel(x_ref, w1_ref, w2_ref, w3_ref, o_ref,
                  xpad1, y1, xpad2, y2, xpad3, slab, *, geom):
    (H, W, H1, W1, Ha1, Wa1, H2, W2, Ha2, Wa2, H3, W3) = geom

    # conv1: in-kernel zero pad by 2, k=11, s=4
    xpad1[...] = jnp.zeros_like(xpad1)
    xpad1[2:2 + H, 2:2 + W] = x_ref[...]
    y1[...] = _tap_conv(xpad1, K=11, s=4, Ho=H1, Wo=W1, w_ref=w1_ref, slab_ref=slab)

    # avg1: AvgPool2d(3, stride=2) == conv with uniform 1/9 weights, no padding
    a1 = _tap_conv(y1, K=3, s=2, Ho=Ha1, Wo=Wa1, w_scale=1.0 / 9.0, slab_ref=slab)

    # conv2: pad by 2, k=5, s=1
    xpad2[...] = jnp.zeros_like(xpad2)
    xpad2[2:2 + Ha1, 2:2 + Wa1] = a1
    y2[...] = _tap_conv(xpad2, K=5, s=1, Ho=H2, Wo=W2, w_ref=w2_ref)

    # avg2
    a2 = _tap_conv(y2, K=3, s=2, Ho=Ha2, Wo=Wa2, w_scale=1.0 / 9.0, slab_ref=slab)

    # conv3: pad by 1, k=3, s=1 -> final output
    xpad3[...] = jnp.zeros_like(xpad3)
    xpad3[1:1 + Ha2, 1:1 + Wa2] = a2
    o_ref[...] = _tap_conv(xpad3, K=3, s=1, Ho=H3, Wo=W3,
                           w_ref=w3_ref).astype(o_ref.dtype)


def init_params():
    # Deterministic weights, exactly as in MyAlexNetMap.__init__.
    return {
        "conv1": jnp.full((11, 11), 1.0 / 121.0, jnp.float32),
        "conv2": jnp.full((5, 5), 1.0 / 25.0, jnp.float32),
        "conv3": jnp.full((3, 3), 1.0 / 9.0, jnp.float32),
    }


@jax.jit
def my_alexnet_map_forward(params, x):
    """x: (N, 1, H, W) float32 (NCHW, C == 1) -> (N, 1, Ho, Wo) float32."""
    N, C, H, W = x.shape
    assert C == 1, "MyAlexNetMap is single-channel"
    x = x.astype(jnp.float32)

    # Static layer geometry, mirroring the PyTorch module.
    H1, W1 = _conv_out(H, 11, 4, 2), _conv_out(W, 11, 4, 2)      # conv1
    Ha1, Wa1 = _conv_out(H1, 3, 2, 0), _conv_out(W1, 3, 2, 0)    # avg1
    H2, W2 = _conv_out(Ha1, 5, 1, 2), _conv_out(Wa1, 5, 1, 2)    # conv2
    Ha2, Wa2 = _conv_out(H2, 3, 2, 0), _conv_out(W2, 3, 2, 0)    # avg2
    H3, W3 = _conv_out(Ha2, 3, 1, 1), _conv_out(Wa2, 3, 1, 1)    # conv3
    assert min(H1, W1, Ha1, Wa1, H2, W2, Ha2, Wa2, H3, W3) >= 1, "input too small"
    geom = (H, W, H1, W1, Ha1, Wa1, H2, W2, Ha2, Wa2, H3, W3)

    # Padded-input scratch sizes plus the shared lane-hoist slab (sized for the
    # largest strided layer: conv1 / avg1 / avg2).
    hp1, wp1 = H + 4, W + 4
    hp2, wp2 = Ha1 + 4, Wa1 + 4
    hp3, wp3 = Ha2 + 2, Wa2 + 2
    slab_h = max(hp1, H1, H2)
    slab_w = max(wp1 - 11 + 1, W1 - 3 + 1, W2 - 3 + 1)

    kernel = functools.partial(_fused_kernel, geom=geom)
    return pl.pallas_call(
        kernel,
        out_shape=jax.ShapeDtypeStruct((N, 1, H3, W3), jnp.float32),
        grid=(N,),
        in_specs=[
            # One image per grid step (N, C squeezed away) -> (H, W) VMEM block.
            pl.BlockSpec((None, None, H, W), lambda n: (n, 0, 0, 0)),
            # Conv weights live in SMEM and are read as scalars per tap.
            pl.BlockSpec(memory_space=pltpu.MemorySpace.SMEM),
            pl.BlockSpec(memory_space=pltpu.MemorySpace.SMEM),
            pl.BlockSpec(memory_space=pltpu.MemorySpace.SMEM),
        ],
        out_specs=pl.BlockSpec((None, None, H3, W3), lambda n: (n, 0, 0, 0)),
        scratch_shapes=[
            pltpu.VMEM((hp1, wp1), jnp.float32),        # conv1 padded input
            pltpu.VMEM((H1, W1), jnp.float32),          # conv1 out / avg1 in
            pltpu.VMEM((hp2, wp2), jnp.float32),        # conv2 padded input
            pltpu.VMEM((H2, W2), jnp.float32),          # conv2 out / avg2 in
            pltpu.VMEM((hp3, wp3), jnp.float32),        # conv3 padded input
            pltpu.VMEM((slab_h, slab_w), jnp.float32),  # shared lane-hoist slab
        ],
        compiler_params=pltpu.CompilerParams(
            dimension_semantics=("parallel",),           # shard batch across cores (v7x)
            vmem_limit_bytes=16 * 1024 * 1024,
        ),
    )(x,
      params["conv1"].astype(jnp.float32),
      params["conv2"].astype(jnp.float32),
      params["conv3"].astype(jnp.float32))


# ----------------------------- pure-JAX reference -----------------------------
def _ref_layer(x4, w, stride, padding):
    return jax.lax.conv_general_dilated(
        x4, w[None, None], (stride, stride),
        [(padding, padding), (padding, padding)],
        dimension_numbers=("NCHW", "OIHW", "NCHW"),
        precision=jax.lax.Precision.HIGHEST)


@jax.jit
def reference_forward(params, x):
    avg_w = jnp.full((3, 3), 1.0 / 9.0, jnp.float32)
    y = _ref_layer(x, params["conv1"], 4, 2)
    y = _ref_layer(y, avg_w, 2, 0)
    y = _ref_layer(y, params["conv2"], 1, 2)
    y = _ref_layer(y, avg_w, 2, 0)
    y = _ref_layer(y, params["conv3"], 1, 1)
    return y


if __name__ == "__main__":
    key = jax.random.PRNGKey(0)
    # Small AlexNet-style single-channel input: N=2, C=1, 63x63 spatial -> (2,1,3,3).
    x = jax.random.normal(key, (2, 1, 63, 63), dtype=jnp.float32)
    params = init_params()

    out = jax.block_until_ready(my_alexnet_map_forward(params, x))
    ref = jax.block_until_ready(reference_forward(params, x))

    assert out.shape == (2, 1, 3, 3), out.shape
    assert jnp.allclose(out, ref, atol=1e-4, rtol=1e-4), float(jnp.max(jnp.abs(out - ref)))
    print("KERNEL_OK")
</pallas_src>

<mosaic_0001>
module attributes {stable_mosaic.version = 11 : i64} {
  func.func @_fused_kernel(%arg0: i32, %arg1: memref<1x1x63x63xf32, #tpu.memory_space<vmem>>, %arg2: memref<11x11xf32, #tpu.memory_space<smem>>, %arg3: memref<5x5xf32, #tpu.memory_space<smem>>, %arg4: memref<3x3xf32, #tpu.memory_space<smem>>, %arg5: memref<1x1x3x3xf32, #tpu.memory_space<vmem>>, %arg6: memref<67x67xf32, #tpu.memory_space<vmem>>, %arg7: memref<15x15xf32, #tpu.memory_space<vmem>>, %arg8: memref<11x11xf32, #tpu.memory_space<vmem>>, %arg9: memref<7x7xf32, #tpu.memory_space<vmem>>, %arg10: memref<5x5xf32, #tpu.memory_space<vmem>>, %arg11: memref<67x57xf32, #tpu.memory_space<vmem>>) attributes {dimension_semantics = [#tpu.dimension_semantics<parallel>], iteration_bounds = array<i64: 2>, scalar_prefetch = 0 : i64, scratch_operands = 6 : i64, tpu.core_type = #tpu.core_type<tc>, window_params = [{transform_indices = @transform_0, window_bounds = array<i64: 1, 1, 63, 63>}, {transform_indices = @transform_1, window_bounds = array<i64: 11, 11>}, {transform_indices = @transform_2, window_bounds = array<i64: 5, 5>}, {transform_indices = @transform_3, window_bounds = array<i64: 3, 3>}, {transform_indices = @transform_4, window_bounds = array<i64: 1, 1, 3, 3>}]} {
    %cst = arith.constant 0.000000e+00 : f32
    %0 = vector.broadcast %cst : f32 to vector<67x67xf32>
    %c0 = arith.constant 0 : index
    %c0_0 = arith.constant 0 : index
    %1 = vector.load %arg6[%c0, %c0_0] : memref<67x67xf32, #tpu.memory_space<vmem>>, vector<67x67xf32>
    tpu.vector_store %arg6[%c0, %c0_0], %0 {strides = array<i32>} : memref<67x67xf32, #tpu.memory_space<vmem>>, vector<67x67xf32>,
    %c0_1 = arith.constant 0 : index
    %c0_2 = arith.constant 0 : index
    %c0_3 = arith.constant 0 : index
    %c0_4 = arith.constant 0 : index
    %2 = vector.load %arg1[%c0_1, %c0_2, %c0_3, %c0_4] : memref<1x1x63x63xf32, #tpu.memory_space<vmem>>, vector<1x1x63x63xf32>
    %3 = vector.shape_cast %2 : vector<1x1x63x63xf32> to vector<63x63xf32>
    %c2 = arith.constant 2 : index
    %c2_5 = arith.constant 2 : index
    %4 = vector.load %arg6[%c2, %c2_5] : memref<67x67xf32, #tpu.memory_space<vmem>>, vector<63x63xf32>
    tpu.vector_store %arg6[%c2, %c2_5], %3 {strides = array<i32>} : memref<67x67xf32, #tpu.memory_space<vmem>>, vector<63x63xf32>,
    %cst_6 = arith.constant 0.000000e+00 : f32
    %5 = vector.broadcast %cst_6 : f32 to vector<15x57xf32>
    %c0_7 = arith.constant 0 : index
    %c0_8 = arith.constant 0 : index
    %6 = vector.load %arg6[%c0_7, %c0_8] : memref<67x67xf32, #tpu.memory_space<vmem>>, vector<67x57xf32>
    %c0_9 = arith.constant 0 : index
    %c0_10 = arith.constant 0 : index
    %7 = vector.load %arg11[%c0_9, %c0_10] : memref<67x57xf32, #tpu.memory_space<vmem>>, vector<67x57xf32>
    tpu.vector_store %arg11[%c0_9, %c0_10], %6 {strides = array<i32>} : memref<67x57xf32, #tpu.memory_space<vmem>>, vector<67x57xf32>,
    %c0_11 = arith.constant 0 : index
    %c0_12 = arith.constant 0 : index
    %8 = tpu.strided_load %arg11[%c0_11, %c0_12] {strides = array<i32: 4, 1>} : memref<67x57xf32, #tpu.memory_space<vmem>>, vector<15x57xf32>
    %c0_13 = arith.constant 0 : index
    %c0_14 = arith.constant 0 : index
    %9 = memref.load %arg2[%c0_13, %c0_14] : memref<11x11xf32, #tpu.memory_space<smem>>
    %10 = vector.broadcast %9 : f32 to vector<15x57xf32>
    %11 = arith.mulf %10, %8 : vector<15x57xf32>
    %12 = arith.addf %5, %11 : vector<15x57xf32>
    %c1 = arith.constant 1 : index
    %c0_15 = arith.constant 0 : index
    %13 = tpu.strided_load %arg11[%c1, %c0_15] {strides = array<i32: 4, 1>} : memref<67x57xf32, #tpu.memory_space<vmem>>, vector<15x57xf32>
    %c1_16 = arith.constant 1 : index
    %c0_17 = arith.constant 0 : index
    %14 = memref.load %arg2[%c1_16, %c0_17] : memref<11x11xf32, #tpu.memory_space<smem>>
    %15 = vector.broadcast %14 : f32 to vector<15x57xf32>
    %16 = arith.mulf %15, %13 : vector<15x57xf32>
    %17 = arith.addf %12, %16 : vector<15x57xf32>
    %c2_18 = arith.constant 2 : index
    %c0_19 = arith.constant 0 : index
    %18 = tpu.strided_load %arg11[%c2_18, %c0_19] {strides = array<i32: 4, 1>} : memref<67x57xf32, #tpu.memory_space<vmem>>, vector<15x57xf32>
    %c2_20 = arith.constant 2 : index
    %c0_21 = arith.constant 0 : index
    %19 = memref.load %arg2[%c2_20, %c0_21] : memref<11x11xf32, #tpu.memory_space<smem>>
    %20 = vector.broadcast %19 : f32 to vector<15x57xf32>
    %21 = arith.mulf %20, %18 : vector<15x57xf32>
    %22 = arith.addf %17, %21 : vector<15x57xf32>
    %c3 = arith.constant 3 : index
    %c0_22 = arith.constant 0 : index
    %23 = tpu.strided_load %arg11[%c3, %c0_22] {strides = array<i32: 4, 1>} : memref<67x57xf32, #tpu.memory_space<vmem>>, vector<15x57xf32>
    %c3_23 = arith.constant 3 : index
    %c0_24 = arith.constant 0 : index
    %24 = memref.load %arg2[%c3_23, %c0_24] : memref<11x11xf32, #tpu.memory_space<smem>>
    %25 = vector.broadcast %24 : f32 to vector<15x57xf32>
    %26 = arith.mulf %25, %23 : vector<15x57xf32>
    %27 = arith.addf %22, %26 : vector<15x57xf32>
    %c4 = arith.constant 4 : index
    %c0_25 = arith.constant 0 : index
    %28 = tpu.strided_load %arg11[%c4, %c0_25] {strides = array<i32: 4, 1>} : memref<67x57xf32, #tpu.memory_space<vmem>>, vector<15x57xf32>
    %c4_26 = arith.constant 4 : index
    %c0_27 = arith.constant 0 : index
    %29 = memref.load %arg2[%c4_26, %c0_27] : memref<11x11xf32, #tpu.memory_space<smem>>
    %30 = vector.broadcast %29 : f32 to vector<15x57xf32>
    %31 = arith.mulf %30, %28 : vector<15x57xf32>
    %32 = arith.addf %27, %31 : vector<15x57xf32>
    %c5 = arith.constant 5 : index
    %c0_28 = arith.constant 0 : index
    %33 = tpu.strided_load %arg11[%c5, %c0_28] {strides = array<i32: 4, 1>} : memref<67x57xf32, #tpu.memory_space<vmem>>, vector<15x57xf32>
    %c5_29 = arith.constant 5 : index
    %c0_30 = arith.constant 0 : index
    %34 = memref.load %arg2[%c5_29, %c0_30] : memref<11x11xf32, #tpu.memory_space<smem>>
    %35 = vector.broadcast %34 : f32 to vector<15x57xf32>
    %36 = arith.mulf %35, %33 : vector<15x57xf32>
    %37 = arith.addf %32, %36 : vector<15x57xf32>
    %c6 = arith.constant 6 : index
    %c0_31 = arith.constant 0 : index
    %38 = tpu.strided_load %arg11[%c6, %c0_31] {strides = array<i32: 4, 1>} : memref<67x57xf32, #tpu.memory_space<vmem>>, vector<15x57xf32>
    %c6_32 = arith.constant 6 : index
    %c0_33 = arith.constant 0 : index
    %39 = memref.load %arg2[%c6_32, %c0_33] : memref<11x11xf32, #tpu.memory_space<smem>>
    %40 = vector.broadcast %39 : f32 to vector<15x57xf32>
    %41 = arith.mulf %40, %38 : vector<15x57xf32>
    %42 = arith.addf %37, %41 : vector<15x57xf32>
    %c7 = arith.constant 7 : index
    %c0_34 = arith.constant 0 : index
    %43 = tpu.strided_load %arg11[%c7, %c0_34] {strides = array<i32: 4, 1>} : memref<67x57xf32, #tpu.memory_space<vmem>>, vector<15x57xf32>
    %c7_35 = arith.constant 7 : index
    %c0_36 = arith.constant 0 : index
    %44 = memref.load %arg2[%c7_35, %c0_36] : memref<11x11xf32, #tpu.memory_space<smem>>
    %45 = vector.broadcast %44 : f32 to vector<15x57xf32>
    %46 = arith.mulf %45, %43 : vector<15x57xf32>
    %47 = arith.addf %42, %46 : vector<15x57xf32>
    %c8 = arith.constant 8 : index
    %c0_37 = arith.constant 0 : index
    %48 = tpu.strided_load %arg11[%c8, %c0_37] {strides = array<i32: 4, 1>} : memref<67x57xf32, #tpu.memory_space<vmem>>, vector<15x57xf32>
    %c8_38 = arith.constant 8 : index
    %c0_39 = arith.constant 0 : index
    %49 = memref.load %arg2[%c8_38, %c0_39] : memref<11x11xf32, #tpu.memory_space<smem>>
    %50 = vector.broadcast %49 : f32 to vector<15x57xf32>
    %51 = arith.mulf %50, %48 : vector<15x57xf32>
    %52 = arith.addf %47, %51 : vector<15x57xf32>
    %c9 = arith.constant 9 : index
    %c0_40 = arith.constant 0 : index
    %53 = tpu.strided_load %arg11[%c9, %c0_40] {strides = array<i32: 4, 1>} : memref<67x57xf32, #tpu.memory_space<vmem>>, vector<15x57xf32>
    %c9_41 = arith.constant 9 : index
    %c0_42 = arith.constant 0 : index
    %54 = memref.load %arg2[%c9_41, %c0_42] : memref<11x11xf32, #tpu.memory_space<smem>>
    %55 = vector.broadcast %54 : f32 to vector<15x57xf32>
    %56 = arith.mulf %55, %53 : vector<15x57xf32>
    %57 = arith.addf %52, %56 : vector<15x57xf32>
    %c10 = arith.constant 10 : index
    %c0_43 = arith.constant 0 : index
    %58 = tpu.strided_load %arg11[%c10, %c0_43] {strides = array<i32: 4, 1>} : memref<67x57xf32, #tpu.memory_space<vmem>>, vector<15x57xf32>
    %c10_44 = arith.constant 10 : index
    %c0_45 = arith.constant 0 : index
    %59 = memref.load %arg2[%c10_44, %c0_45] : memref<11x11xf32, #tpu.memory_space<smem>>
    %60 = vector.broadcast %59 : f32 to vector<15x57xf32>
    %61 = arith.mulf %60, %58 : vector<15x57xf32>
    %62 = arith.addf %57, %61 : vector<15x57xf32>
    %c0_46 = arith.constant 0 : index
    %c1_47 = arith.constant 1 : index
    %63 = vector.load %arg6[%c0_46, %c1_47] : memref<67x67xf32, #tpu.memory_space<vmem>>, vector<67x57xf32>
    %c0_48 = arith.constant 0 : index
    %c0_49 = arith.constant 0 : index
    %64 = vector.load %arg11[%c0_48, %c0_49] : memref<67x57xf32, #tpu.memory_space<vmem>>, vector<67x57xf32>
    tpu.vector_store %arg11[%c0_48, %c0_49], %63 {strides = array<i32>} : memref<67x57xf32, #tpu.memory_space<vmem>>, vector<67x57xf32>,
    %c0_50 = arith.constant 0 : index
    %c0_51 = arith.constant 0 : index
    %65 = tpu.strided_load %arg11[%c0_50, %c0_51] {strides = array<i32: 4, 1>} : memref<67x57xf32, #tpu.memory_space<vmem>>, vector<15x57xf32>
    %c0_52 = arith.constant 0 : index
    %c1_53 = arith.constant 1 : index
    %66 = memref.load %arg2[%c0_52, %c1_53] : memref<11x11xf32, #tpu.memory_space<smem>>
    %67 = vector.broadcast %66 : f32 to vector<15x57xf32>
    %68 = arith.mulf %67, %65 : vector<15x57xf32>
    %69 = arith.addf %62, %68 : vector<15x57xf32>
    %c1_54 = arith.constant 1 : index
    %c0_55 = arith.constant 0 : index
    %70 = tpu.strided_load %arg11[%c1_54, %c0_55] {strides = array<i32: 4, 1>} : memref<67x57xf32, #tpu.memory_space<vmem>>, vector<15x57xf32>
    %c1_56 = arith.constant 1 : index
    %c1_57 = arith.constant 1 : index
    %71 = memref.load %arg2[%c1_56, %c1_57] : memref<11x11xf32, #tpu.memory_space<smem>>
    %72 = vector.broadcast %71 : f32 to vector<15x57xf32>
    %73 = arith.mulf %72, %70 : vector<15x57xf32>
    %74 = arith.addf %69, %73 : vector<15x57xf32>
    %c2_58 = arith.constant 2 : index
    %c0_59 = arith.constant 0 : index
    %75 = tpu.strided_load %arg11[%c2_58, %c0_59] {strides = array<i32: 4, 1>} : memref<67x57xf32, #tpu.memory_space<vmem>>, vector<15x57xf32>
    %c2_60 = arith.constant 2 : index
    %c1_61 = arith.constant 1 : index
    %76 = memref.load %arg2[%c2_60, %c1_61] : memref<11x11xf32, #tpu.memory_space<smem>>
    %77 = vector.broadcast %76 : f32 to vector<15x57xf32>
    %78 = arith.mulf %77, %75 : vector<15x57xf32>
    %79 = arith.addf %74, %78 : vector<15x57xf32>
    %c3_62 = arith.constant 3 : index
    %c0_63 = arith.constant 0 : index
    %80 = tpu.strided_load %arg11[%c3_62, %c0_63] {strides = array<i32: 4, 1>} : memref<67x57xf32, #tpu.memory_space<vmem>>, vector<15x57xf32>
    %c3_64 = arith.constant 3 : index
    %c1_65 = arith.constant 1 : index
    %81 = memref.load %arg2[%c3_64, %c1_65] : memref<11x11xf32, #tpu.memory_space<smem>>
    %82 = vector.broadcast %81 : f32 to vector<15x57xf32>
    %83 = arith.mulf %82, %80 : vector<15x57xf32>
    %84 = arith.addf %79, %83 : vector<15x57xf32>
    %c4_66 = arith.constant 4 : index
    %c0_67 = arith.constant 0 : index
    %85 = tpu.strided_load %arg11[%c4_66, %c0_67] {strides = array<i32: 4, 1>} : memref<67x57xf32, #tpu.memory_space<vmem>>, vector<15x57xf32>
    %c4_68 = arith.constant 4 : index
    %c1_69 = arith.constant 1 : index
    %86 = memref.load %arg2[%c4_68, %c1_69] : memref<11x11xf32, #tpu.memory_space<smem>>
    %87 = vector.broadcast %86 : f32 to vector<15x57xf32>
    %88 = arith.mulf %87, %85 : vector<15x57xf32>
    %89 = arith.addf %84, %88 : vector<15x57xf32>
    %c5_70 = arith.constant 5 : index
    %c0_71 = arith.constant 0 : index
    %90 = tpu.strided_load %arg11[%c5_70, %c0_71] {strides = array<i32: 4, 1>} : memref<67x57xf32, #tpu.memory_space<vmem>>, vector<15x57xf32>
    %c5_72 = arith.constant 5 : index
    %c1_73 = arith.constant 1 : index
    %91 = memref.load %arg2[%c5_72, %c1_73] : memref<11x11xf32, #tpu.memory_space<smem>>
    %92 = vector.broadcast %91 : f32 to vector<15x57xf32>
    %93 = arith.mulf %92, %90 : vector<15x57xf32>
    %94 = arith.addf %89, %93 : vector<15x57xf32>
    %c6_74 = arith.constant 6 : index
    %c0_75 = arith.constant 0 : index
    %95 = tpu.strided_load %arg11[%c6_74, %c0_75] {strides = array<i32: 4, 1>} : memref<67x57xf32, #tpu.memory_space<vmem>>, vector<15x57xf32>
    %c6_76 = arith.constant 6 : index
    %c1_77 = arith.constant 1 : index
    %96 = memref.load %arg2[%c6_76, %c1_77] : memref<11x11xf32, #tpu.memory_space<smem>>
    %97 = vector.broadcast %96 : f32 to vector<15x57xf32>
    %98 = arith.mulf %97, %95 : vector<15x57xf32>
    %99 = arith.addf %94, %98 : vector<15x57xf32>
    %c7_78 = arith.constant 7 : index
    %c0_79 = arith.constant 0 : index
    %100 = tpu.strided_load %arg11[%c7_78, %c0_79] {strides = array<i32: 4, 1>} : memref<67x57xf32, #tpu.memory_space<vmem>>, vector<15x57xf32>
    %c7_80 = arith.constant 7 : index
    %c1_81 = arith.constant 1 : index
    %101 = memref.load %arg2[%c7_80, %c1_81] : memref<11x11xf32, #tpu.memory_space<smem>>
    %102 = vector.broadcast %101 : f32 to vector<15x57xf32>
    %103 = arith.mulf %102, %100 : vector<15x57xf32>
    %104 = arith.addf %99, %103 : vector<15x57xf32>
    %c8_82 = arith.constant 8 : index
    %c0_83 = arith.constant 0 : index
    %105 = tpu.strided_load %arg11[%c8_82, %c0_83] {strides = array<i32: 4, 1>} : memref<67x57xf32, #tpu.memory_space<vmem>>, vector<15x57xf32>
    %c8_84 = arith.constant 8 : index
    %c1_85 = arith.constant 1 : index
    %106 = memref.load %arg2[%c8_84, %c1_85] : memref<11x11xf32, #tpu.memory_space<smem>>
    %107 = vector.broadcast %106 : f32 to vector<15x57xf32>
    %108 = arith.mulf %107, %105 : vector<15x57xf32>
    %109 = arith.addf %104, %108 : vector<15x57xf32>
    %c9_86 = arith.constant 9 : index
    %c0_87 = arith.constant 0 : index
    %110 = tpu.strided_load %arg11[%c9_86, %c0_87] {strides = array<i32: 4, 1>} : memref<67x57xf32, #tpu.memory_space<vmem>>, vector<15x57xf32>
    %c9_88 = arith.constant 9 : index
    %c1_89 = arith.constant 1 : index
    %111 = memref.load %arg2[%c9_88, %c1_89] : memref<11x11xf32, #tpu.memory_space<smem>>
    %112 = vector.broadcast %111 : f32 to vector<15x57xf32>
    %113 = arith.mulf %112, %110 : vector<15x57xf32>
    %114 = arith.addf %109, %113 : vector<15x57xf32>
    %c10_90 = arith.constant 10 : index
    %c0_91 = arith.constant 0 : index
    %115 = tpu.strided_load %arg11[%c10_90, %c0_91] {strides = array<i32: 4, 1>} : memref<67x57xf32, #tpu.memory_space<vmem>>, vector<15x57xf32>
    %c10_92 = arith.constant 10 : index
    %c1_93 = arith.constant 1 : index
    %116 = memref.load %arg2[%c10_92, %c1_93] : memref<11x11xf32, #tpu.memory_space<smem>>
    %117 = vector.broadcast %116 : f32 to vector<15x57xf32>
    %118 = arith.mulf %117, %115 : vector<15x57xf32>
    %119 = arith.addf %114, %118 : vector<15x57xf32>
    %c0_94 = arith.constant 0 : index
    %c2_95 = arith.constant 2 : index
    %120 = vector.load %arg6[%c0_94, %c2_95] : memref<67x67xf32, #tpu.memory_space<vmem>>, vector<67x57xf32>
    %c0_96 = arith.constant 0 : index
    %c0_97 = arith.constant 0 : index
    %121 = vector.load %arg11[%c0_96, %c0_97] : memref<67x57xf32, #tpu.memory_space<vmem>>, vector<67x57xf32>
    tpu.vector_store %arg11[%c0_96, %c0_97], %120 {strides = array<i32>} : memref<67x57xf32, #tpu.memory_space<vmem>>, vector<67x57xf32>,
    %c0_98 = arith.constant 0 : index
    %c0_99 = arith.constant 0 : index
    %122 = tpu.strided_load %arg11[%c0_98, %c0_99] {strides = array<i32: 4, 1>} : memref<67x57xf32, #tpu.memory_space<vmem>>, vector<15x57xf32>
    %c0_100 = arith.constant 0 : index
    %c2_101 = arith.constant 2 : index
    %123 = memref.load %arg2[%c0_100, %c2_101] : memref<11x11xf32, #tpu.memory_space<smem>>
    %124 = vector.broadcast %123 : f32 to vector<15x57xf32>
    %125 = arith.mulf %124, %122 : vector<15x57xf32>
    %126 = arith.addf %119, %125 : vector<15x57xf32>
    %c1_102 = arith.constant 1 : index
    %c0_103 = arith.constant 0 : index
    %127 = tpu.strided_load %arg11[%c1_102, %c0_103] {strides = array<i32: 4, 1>} : memref<67x57xf32, #tpu.memory_space<vmem>>, vector<15x57xf32>
    %c1_104 = arith.constant 1 : index
    %c2_105 = arith.constant 2 : index
    %128 = memref.load %arg2[%c1_104, %c2_105] : memref<11x11xf32, #tpu.memory_space<smem>>
    %129 = vector.broadcast %128 : f32 to vector<15x57xf32>
    %130 = arith.mulf %129, %127 : vector<15x57xf32>
    %131 = arith.addf %126, %130 : vector<15x57xf32>
    %c2_106 = arith.constant 2 : index
    %c0_107 = arith.constant 0 : index
    %132 = tpu.strided_load %arg11[%c2_106, %c0_107] {strides = array<i32: 4, 1>} : memref<67x57xf32, #tpu.memory_space<vmem>>, vector<15x57xf32>
    %c2_108 = arith.constant 2 : index
    %c2_109 = arith.constant 2 : index
    %133 = memref.load %arg2[%c2_108, %c2_109] : memref<11x11xf32, #tpu.memory_space<smem>>
    %134 = vector.broadcast %133 : f32 to vector<15x57xf32>
    %135 = arith.mulf %134, %132 : vector<15x57xf32>
    %136 = arith.addf %131, %135 : vector<15x57xf32>
    %c3_110 = arith.constant 3 : index
    %c0_111 = arith.constant 0 : index
    %137 = tpu.strided_load %arg11[%c3_110, %c0_111] {strides = array<i32: 4, 1>} : memref<67x57xf32, #tpu.memory_space<vmem>>, vector<15x57xf32>
    %c3_112 = arith.constant 3 : index
    %c2_113 = arith.constant 2 : index
    %138 = memref.load %arg2[%c3_112, %c2_113] : memref<11x11xf32, #tpu.memory_space<smem>>
    %139 = vector.broadcast %138 : f32 to vector<15x57xf32>
    %140 = arith.mulf %139, %137 : vector<15x57xf32>
    %141 = arith.addf %136, %140 : vector<15x57xf32>
    %c4_114 = arith.constant 4 : index
    %c0_115 = arith.constant 0 : index
    %142 = tpu.strided_load %arg11[%c4_114, %c0_115] {strides = array<i32: 4, 1>} : memref<67x57xf32, #tpu.memory_space<vmem>>, vector<15x57xf32>
    %c4_116 = arith.constant 4 : index
    %c2_117 = arith.constant 2 : index
    %143 = memref.load %arg2[%c4_116, %c2_117] : memref<11x11xf32, #tpu.memory_space<smem>>
    %144 = vector.broadcast %143 : f32 to vector<15x57xf32>
    %145 = arith.mulf %144, %142 : vector<15x57xf32>
    %146 = arith.addf %141, %145 : vector<15x57xf32>
    %c5_118 = arith.constant 5 : index
    %c0_119 = arith.constant 0 : index
    %147 = tpu.strided_load %arg11[%c5_118, %c0_119] {strides = array<i32: 4, 1>} : memref<67x57xf32, #tpu.memory_space<vmem>>, vector<15x57xf32>
    %c5_120 = arith.constant 5 : index
    %c2_121 = arith.constant 2 : index
    %148 = memref.load %arg2[%c5_120, %c2_121] : memref<11x11xf32, #tpu.memory_space<smem>>
    %149 = vector.broadcast %148 : f32 to vector<15x57xf32>
    %150 = arith.mulf %149, %147 : vector<15x57xf32>
    %151 = arith.addf %146, %150 : vector<15x57xf32>
    %c6_122 = arith.constant 6 : index
    %c0_123 = arith.constant 0 : index
    %152 = tpu.strided_load %arg11[%c6_122, %c0_123] {strides = array<i32: 4, 1>} : memref<67x57xf32, #tpu.memory_space<vmem>>, vector<15x57xf32>
    %c6_124 = arith.constant 6 : index
    %c2_125 = arith.constant 2 : index
    %153 = memref.load %arg2[%c6_124, %c2_125] : memref<11x11xf32, #tpu.memory_space<smem>>
    %154 = vector.broadcast %153 : f32 to vector<15x57xf32>
    %155 = arith.mulf %154, %152 : vector<15x57xf32>
    %156 = arith.addf %151, %155 : vector<15x57xf32>
    %c7_126 = arith.constant 7 : index
    %c0_127 = arith.constant 0 : index
    %157 = tpu.strided_load %arg11[%c7_126, %c0_127] {strides = array<i32: 4, 1>} : memref<67x57xf32, #tpu.memory_space<vmem>>, vector<15x57xf32>
    %c7_128 = arith.constant 7 : index
    %c2_129 = arith.constant 2 : index
    %158 = memref.load %arg2[%c7_128, %c2_129] : memref<11x11xf32, #tpu.memory_space<smem>>
    %159 = vector.broadcast %158 : f32 to vector<15x57xf32>
    %160 = arith.mulf %159, %157 : vector<15x57xf32>
    %161 = arith.addf %156, %160 : vector<15x57xf32>
    %c8_130 = arith.constant 8 : index
    %c0_131 = arith.constant 0 : index
    %162 = tpu.strided_load %arg11[%c8_130, %c0_131] {strides = array<i32: 4, 1>} : memref<67x57xf32, #tpu.memory_space<vmem>>, vector<15x57xf32>
    %c8_132 = arith.constant 8 : index
    %c2_133 = arith.constant 2 : index
    %163 = memref.load %arg2[%c8_132, %c2_133] : memref<11x11xf32, #tpu.memory_space<smem>>
    %164 = vector.broadcast %163 : f32 to vector<15x57xf32>
    %165 = arith.mulf %164, %162 : vector<15x57xf32>
    %166 = arith.addf %161, %165 : vector<15x57xf32>
    %c9_134 = arith.constant 9 : index
    %c0_135 = arith.constant 0 : index
    %167 = tpu.strided_load %arg11[%c9_134, %c0_135] {strides = array<i32: 4, 1>} : memref<67x57xf32, #tpu.memory_space<vmem>>, vector<15x57xf32>
    %c9_136 = arith.constant 9 : index
    %c2_137 = arith.constant 2 : index
    %168 = memref.load %arg2[%c9_136, %c2_137] : memref<11x11xf32, #tpu.memory_space<smem>>
    %169 = vector.broadcast %168 : f32 to vector<15x57xf32>
    %170 = arith.mulf %169, %167 : vector<15x57xf32>
    %171 = arith.addf %166, %170 : vector<15x57xf32>
    %c10_138 = arith.constant 10 : index
    %c0_139 = arith.constant 0 : index
    %172 = tpu.strided_load %arg11[%c10_138, %c0_139] {strides = array<i32: 4, 1>} : memref<67x57xf32, #tpu.memory_space<vmem>>, vector<15x57xf32>
    %c10_140 = arith.constant 10 : index
    %c2_141 = arith.constant 2 : index
    %173 = memref.load %arg2[%c10_140, %c2_141] : memref<11x11xf32, #tpu.memory_space<smem>>
    %174 = vector.broadcast %173 : f32 to vector<15x57xf32>
    %175 = arith.mulf %174, %172 : vector<15x57xf32>
    %176 = arith.addf %171, %175 : vector<15x57xf32>
    %c0_142 = arith.constant 0 : index
    %c3_143 = arith.constant 3 : index
    %177 = vector.load %arg6[%c0_142, %c3_143] : memref<67x67xf32, #tpu.memory_space<vmem>>, vector<67x57xf32>
    %c0_144 = arith.constant 0 : index
    %c0_145 = arith.constant 0 : index
    %178 = vector.load %arg11[%c0_144, %c0_145] : memref<67x57xf32, #tpu.memory_space<vmem>>, vector<67x57xf32>
    tpu.vector_store %arg11[%c0_144, %c0_145], %177 {strides = array<i32>} : memref<67x57xf32, #tpu.memory_space<vmem>>, vector<67x57xf32>,
    %c0_146 = arith.constant 0 : index
    %c0_147 = arith.constant 0 : index
    %179 = tpu.strided_load %arg11[%c0_146, %c0_147] {strides = array<i32: 4, 1>} : memref<67x57xf32, #tpu.memory_space<vmem>>, vector<15x57xf32>
    %c0_148 = arith.constant 0 : index
    %c3_149 = arith.constant 3 : index
    %180 = memref.load %arg2[%c0_148, %c3_149] : memref<11x11xf32, #tpu.memory_space<smem>>
    %181 = vector.broadcast %180 : f32 to vector<15x57xf32>
    %182 = arith.mulf %181, %179 : vector<15x57xf32>
    %183 = arith.addf %176, %182 : vector<15x57xf32>
    %c1_150 = arith.constant 1 : index
    %c0_151 = arith.constant 0 : index
    %184 = tpu.strided_load %arg11[%c1_150, %c0_151] {strides = array<i32: 4, 1>} : memref<67x57xf32, #tpu.memory_space<vmem>>, vector<15x57xf32>
    %c1_152 = arith.constant 1 : index
    %c3_153 = arith.constant 3 : index
    %185 = memref.load %arg2[%c1_152, %c3_153] : memref<11x11xf32, #tpu.memory_space<smem>>
    %186 = vector.broadcast %185 : f32 to vector<15x57xf32>
    %187 = arith.mulf %186, %184 : vector<15x57xf32>
    %188 = arith.addf %183, %187 : vector<15x57xf32>
    %c2_154 = arith.constant 2 : index
    %c0_155 = arith.constant 0 : index
    %189 = tpu.strided_load %arg11[%c2_154, %c0_155] {strides = array<i32: 4, 1>} : memref<67x57xf32, #tpu.memory_space<vmem>>, vector<15x57xf32>
    %c2_156 = arith.constant 2 : index
    %c3_157 = arith.constant 3 : index
    %190 = memref.load %arg2[%c2_156, %c3_157] : memref<11x11xf32, #tpu.memory_space<smem>>
    %191 = vector.broadcast %190 : f32 to vector<15x57xf32>
    %192 = arith.mulf %191, %189 : vector<15x57xf32>
    %193 = arith.addf %188, %192 : vector<15x57xf32>
    %c3_158 = arith.constant 3 : index
    %c0_159 = arith.constant 0 : index
    %194 = tpu.strided_load %arg11[%c3_158, %c0_159] {strides = array<i32: 4, 1>} : memref<67x57xf32, #tpu.memory_space<vmem>>, vector<15x57xf32>
    %c3_160 = arith.constant 3 : index
    %c3_161 = arith.constant 3 : index
    %195 = memref.load %arg2[%c3_160, %c3_161] : memref<11x11xf32, #tpu.memory_space<smem>>
    %196 = vector.broadcast %195 : f32 to vector<15x57xf32>
    %197 = arith.mulf %196, %194 : vector<15x57xf32>
    %198 = arith.addf %193, %197 : vector<15x57xf32>
    %c4_162 = arith.constant 4 : index
    %c0_163 = arith.constant 0 : index
    %199 = tpu.strided_load %arg11[%c4_162, %c0_163] {strides = array<i32: 4, 1>} : memref<67x57xf32, #tpu.memory_space<vmem>>, vector<15x57xf32>
    %c4_164 = arith.constant 4 : index
    %c3_165 = arith.constant 3 : index
    %200 = memref.load %arg2[%c4_164, %c3_165] : memref<11x11xf32, #tpu.memory_space<smem>>
    %201 = vector.broadcast %200 : f32 to vector<15x57xf32>
    %202 = arith.mulf %201, %199 : vector<15x57xf32>
    %203 = arith.addf %198, %202 : vector<15x57xf32>
    %c5_166 = arith.constant 5 : index
    %c0_167 = arith.constant 0 : index
    %204 = tpu.strided_load %arg11[%c5_166, %c0_167] {strides = array<i32: 4, 1>} : memref<67x57xf32, #tpu.memory_space<vmem>>, vector<15x57xf32>
    %c5_168 = arith.constant 5 : index
    %c3_169 = arith.constant 3 : index
    %205 = memref.load %arg2[%c5_168, %c3_169] : memref<11x11xf32, #tpu.memory_space<smem>>
    %206 = vector.broadcast %205 : f32 to vector<15x57xf32>
    %207 = arith.mulf %206, %204 : vector<15x57xf32>
    %208 = arith.addf %203, %207 : vector<15x57xf32>
    %c6_170 = arith.constant 6 : index
    %c0_171 = arith.constant 0 : index
    %209 = tpu.strided_load %arg11[%c6_170, %c0_171] {strides = array<i32: 4, 1>} : memref<67x57xf32, #tpu.memory_space<vmem>>, vector<15x57xf32>
    %c6_172 = arith.constant 6 : index
    %c3_173 = arith.constant 3 : index
    %210 = memref.load %arg2[%c6_172, %c3_173] : memref<11x11xf32, #tpu.memory_space<smem>>
    %211 = vector.broadcast %210 : f32 to vector<15x57xf32>
    %212 = arith.mulf %211, %209 : vector<15x57xf32>
    %213 = arith.addf %208, %212 : vector<15x57xf32>
    %c7_174 = arith.constant 7 : index
    %c0_175 = arith.constant 0 : index
    %214 = tpu.strided_load %arg11[%c7_174, %c0_175] {strides = array<i32: 4, 1>} : memref<67x57xf32, #tpu.memory_space<vmem>>, vector<15x57xf32>
    %c7_176 = arith.constant 7 : index
    %c3_177 = arith.constant 3 : index
    %215 = memref.load %arg2[%c7_176, %c3_177] : memref<11x11xf32, #tpu.memory_space<smem>>
    %216 = vector.broadcast %215 : f32 to vector<15x57xf32>
    %217 = arith.mulf %216, %214 : vector<15x57xf32>
    %218 = arith.addf %213, %217 : vector<15x57xf32>
    %c8_178 = arith.constant 8 : index
    %c0_179 = arith.constant 0 : index
    %219 = tpu.strided_load %arg11[%c8_178, %c0_179] {strides = array<i32: 4, 1>} : memref<67x57xf32, #tpu.memory_space<vmem>>, vector<15x57xf32>
    %c8_180 = arith.constant 8 : index
    %c3_181 = arith.constant 3 : index
    %220 = memref.load %arg2[%c8_180, %c3_181] : memref<11x11xf32, #tpu.memory_space<smem>>
    %221 = vector.broadcast %220 : f32 to vector<15x57xf32>
    %222 = arith.mulf %221, %219 : vector<15x57xf32>
    %223 = arith.addf %218, %222 : vector<15x57xf32>
    %c9_182 = arith.constant 9 : index
    %c0_183 = arith.constant 0 : index
    %224 = tpu.strided_load %arg11[%c9_182, %c0_183] {strides = array<i32: 4, 1>} : memref<67x57xf32, #tpu.memory_space<vmem>>, vector<15x57xf32>
    %c9_184 = arith.constant 9 : index
    %c3_185 = arith.constant 3 : index
    %225 = memref.load %arg2[%c9_184, %c3_185] : memref<11x11xf32, #tpu.memory_space<smem>>
    %226 = vector.broadcast %225 : f32 to vector<15x57xf32>
    %227 = arith.mulf %226, %224 : vector<15x57xf32>
    %228 = arith.addf %223, %227 : vector<15x57xf32>
    %c10_186 = arith.constant 10 : index
    %c0_187 = arith.constant 0 : index
    %229 = tpu.strided_load %arg11[%c10_186, %c0_187] {strides = array<i32: 4, 1>} : memref<67x57xf32, #tpu.memory_space<vmem>>, vector<15x57xf32>
    %c10_188 = arith.constant 10 : index
    %c3_189 = arith.constant 3 : index
    %230 = memref.load %arg2[%c10_188, %c3_189] : memref<11x11xf32, #tpu.memory_space<smem>>
    %231 = vector.broadcast %230 : f32 to vector<15x57xf32>
    %232 = arith.mulf %231, %229 : vector<15x57xf32>
    %233 = arith.addf %228, %232 : vector<15x57xf32>
    %c0_190 = arith.constant 0 : index
    %c4_191 = arith.constant 4 : index
    %234 = vector.load %arg6[%c0_190, %c4_191] : memref<67x67xf32, #tpu.memory_space<vmem>>, vector<67x57xf32>
    %c0_192 = arith.constant 0 : index
    %c0_193 = arith.constant 0 : index
    %235 = vector.load %arg11[%c0_192, %c0_193] : memref<67x57xf32, #tpu.memory_space<vmem>>, vector<67x57xf32>
    tpu.vector_store %arg11[%c0_192, %c0_193], %234 {strides = array<i32>} : memref<67x57xf32, #tpu.memory_space<vmem>>, vector<67x57xf32>,
    %c0_194 = arith.constant 0 : index
    %c0_195 = arith.constant 0 : index
    %236 = tpu.strided_load %arg11[%c0_194, %c0_195] {strides = array<i32: 4, 1>} : memref<67x57xf32, #tpu.memory_space<vmem>>, vector<15x57xf32>
    %c0_196 = arith.constant 0 : index
    %c4_197 = arith.constant 4 : index
    %237 = memref.load %arg2[%c0_196, %c4_197] : memref<11x11xf32, #tpu.memory_space<smem>>
    %238 = vector.broadcast %237 : f32 to vector<15x57xf32>
    %239 = arith.mulf %238, %236 : vector<15x57xf32>
    %240 = arith.addf %233, %239 : vector<15x57xf32>
    %c1_198 = arith.constant 1 : index
    %c0_199 = arith.constant 0 : index
    %241 = tpu.strided_load %arg11[%c1_198, %c0_199] {strides = array<i32: 4, 1>} : memref<67x57xf32, #tpu.memory_space<vmem>>, vector<15x57xf32>
    %c1_200 = arith.constant 1 : index
    %c4_201 = arith.constant 4 : index
    %242 = memref.load %arg2[%c1_200, %c4_201] : memref<11x11xf32, #tpu.memory_space<smem>>
    %243 = vector.broadcast %242 : f32 to vector<15x57xf32>
    %244 = arith.mulf %243, %241 : vector<15x57xf32>
    %245 = arith.addf %240, %244 : vector<15x57xf32>
    %c2_202 = arith.constant 2 : index
    %c0_203 = arith.constant 0 : index
    %246 = tpu.strided_load %arg11[%c2_202, %c0_203] {strides = array<i32: 4, 1>} : memref<67x57xf32, #tpu.memory_space<vmem>>, vector<15x57xf32>
    %c2_204 = arith.constant 2 : index
    %c4_205 = arith.constant 4 : index
    %247 = memref.load %arg2[%c2_204, %c4_205] : memref<11x11xf32, #tpu.memory_space<smem>>
    %248 = vector.broadcast %247 : f32 to vector<15x57xf32>
    %249 = arith.mulf %248, %246 : vector<15x57xf32>
    %250 = arith.addf %245, %249 : vector<15x57xf32>
    %c3_206 = arith.constant 3 : index
    %c0_207 = arith.constant 0 : index
    %251 = tpu.strided_load %arg11[%c3_206, %c0_207] {strides = array<i32: 4, 1>} : memref<67x57xf32, #tpu.memory_space<vmem>>, vector<15x57xf32>
    %c3_208 = arith.constant 3 : index
    %c4_209 = arith.constant 4 : index
    %252 = memref.load %arg2[%c3_208, %c4_209] : memref<11x11xf32, #tpu.memory_space<smem>>
    %253 = vector.broadcast %252 : f32 to vector<15x57xf32>
    %254 = arith.mulf %253, %251 : vector<15x57xf32>
    %255 = arith.addf %250, %254 : vector<15x57xf32>
    %c4_210 = arith.constant 4 : index
    %c0_211 = arith.constant 0 : index
    %256 = tpu.strided_load %arg11[%c4_210, %c0_211] {strides = array<i32: 4, 1>} : memref<67x57xf32, #tpu.memory_space<vmem>>, vector<15x57xf32>
    %c4_212 = arith.constant 4 : index
    %c4_213 = arith.constant 4 : index
    %257 = memref.load %arg2[%c4_212, %c4_213] : memref<11x11xf32, #tpu.memory_space<smem>>
    %258 = vector.broadcast %257 : f32 to vector<15x57xf32>
    %259 = arith.mulf %258, %256 : vector<15x57xf32>
    %260 = arith.addf %255, %259 : vector<15x57xf32>
    %c5_214 = arith.constant 5 : index
    %c0_215 = arith.constant 0 : index
    %261 = tpu.strided_load %arg11[%c5_214, %c0_215] {strides = array<i32: 4, 1>} : memref<67x57xf32, #tpu.memory_space<vmem>>, vector<15x57xf32>
    %c5_216 = arith.constant 5 : index
    %c4_217 = arith.constant 4 : index
    %262 = memref.load %arg2[%c5_216, %c4_217] : memref<11x11xf32, #tpu.memory_space<smem>>
    %263 = vector.broadcast %262 : f32 to vector<15x57xf32>
    %264 = arith.mulf %263, %261 : vector<15x57xf32>
    %265 = arith.addf %260, %264 : vector<15x57xf32>
    %c6_218 = arith.constant 6 : index
    %c0_219 = arith.constant 0 : index
    %266 = tpu.strided_load %arg11[%c6_218, %c0_219] {strides = array<i32: 4, 1>} : memref<67x57xf32, #tpu.memory_space<vmem>>, vector<15x57xf32>
    %c6_220 = arith.constant 6 : index
    %c4_221 = arith.constant 4 : index
    %267 = memref.load %arg2[%c6_220, %c4_221] : memref<11x11xf32, #tpu.memory_space<smem>>
    %268 = vector.broadcast %267 : f32 to vector<15x57xf32>
    %269 = arith.mulf %268, %266 : vector<15x57xf32>
    %270 = arith.addf %265, %269 : vector<15x57xf32>
    %c7_222 = arith.constant 7 : index
    %c0_223 = arith.constant 0 : index
    %271 = tpu.strided_load %arg11[%c7_222, %c0_223] {strides = array<i32: 4, 1>} : memref<67x57xf32, #tpu.memory_space<vmem>>, vector<15x57xf32>
    %c7_224 = arith.constant 7 : index
    %c4_225 = arith.constant 4 : index
    %272 = memref.load %arg2[%c7_224, %c4_225] : memref<11x11xf32, #tpu.memory_space<smem>>
    %273 = vector.broadcast %272 : f32 to vector<15x57xf32>
    %274 = arith.mulf %273, %271 : vector<15x57xf32>
    %275 = arith.addf %270, %274 : vector<15x57xf32>
    %c8_226 = arith.constant 8 : index
    %c0_227 = arith.constant 0 : index
    %276 = tpu.strided_load %arg11[%c8_226, %c0_227] {strides = array<i32: 4, 1>} : memref<67x57xf32, #tpu.memory_space<vmem>>, vector<15x57xf32>
    %c8_228 = arith.constant 8 : index
    %c4_229 = arith.constant 4 : index
    %277 = memref.load %arg2[%c8_228, %c4_229] : memref<11x11xf32, #tpu.memory_space<smem>>
    %278 = vector.broadcast %277 : f32 to vector<15x57xf32>
    %279 = arith.mulf %278, %276 : vector<15x57xf32>
    %280 = arith.addf %275, %279 : vector<15x57xf32>
    %c9_230 = arith.constant 9 : index
    %c0_231 = arith.constant 0 : index
    %281 = tpu.strided_load %arg11[%c9_230, %c0_231] {strides = array<i32: 4, 1>} : memref<67x57xf32, #tpu.memory_space<vmem>>, vector<15x57xf32>
    %c9_232 = arith.constant 9 : index
    %c4_233 = arith.constant 4 : index
    %282 = memref.load %arg2[%c9_232, %c4_233] : memref<11x11xf32, #tpu.memory_space<smem>>
    %283 = vector.broadcast %282 : f32 to vector<15x57xf32>
    %284 = arith.mulf %283, %281 : vector<15x57xf32>
    %285 = arith.addf %280, %284 : vector<15x57xf32>
    %c10_234 = arith.constant 10 : index
    %c0_235 = arith.constant 0 : index
    %286 = tpu.strided_load %arg11[%c10_234, %c0_235] {strides = array<i32: 4, 1>} : memref<67x57xf32, #tpu.memory_space<vmem>>, vector<15x57xf32>
    %c10_236 = arith.constant 10 : index
    %c4_237 = arith.constant 4 : index
    %287 = memref.load %arg2[%c10_236, %c4_237] : memref<11x11xf32, #tpu.memory_space<smem>>
    %288 = vector.broadcast %287 : f32 to vector<15x57xf32>
    %289 = arith.mulf %288, %286 : vector<15x57xf32>
    %290 = arith.addf %285, %289 : vector<15x57xf32>
    %c0_238 = arith.constant 0 : index
    %c5_239 = arith.constant 5 : index
    %291 = vector.load %arg6[%c0_238, %c5_239] : memref<67x67xf32, #tpu.memory_space<vmem>>, vector<67x57xf32>
    %c0_240 = arith.constant 0 : index
    %c0_241 = arith.constant 0 : index
    %292 = vector.load %arg11[%c0_240, %c0_241] : memref<67x57xf32, #tpu.memory_space<vmem>>, vector<67x57xf32>
    tpu.vector_store %arg11[%c0_240, %c0_241], %291 {strides = array<i32>} : memref<67x57xf32, #tpu.memory_space<vmem>>, vector<67x57xf32>,
    %c0_242 = arith.constant 0 : index
    %c0_243 = arith.constant 0 : index
    %293 = tpu.strided_load %arg11[%c0_242, %c0_243] {strides = array<i32: 4, 1>} : memref<67x57xf32, #tpu.memory_space<vmem>>, vector<15x57xf32>
    %c0_244 = arith.constant 0 : index
    %c5_245 = arith.constant 5 : index
    %294 = memref.load %arg2[%c0_244, %c5_245] : memref<11x11xf32, #tpu.memory_space<smem>>
    %295 = vector.broadcast %294 : f32 to vector<15x57xf32>
    %296 = arith.mulf %295, %293 : vector<15x57xf32>
    %297 = arith.addf %290, %296 : vector<15x57xf32>
    %c1_246 = arith.constant 1 : index
    %c0_247 = arith.constant 0 : index
    %298 = tpu.strided_load %arg11[%c1_246, %c0_247] {strides = array<i32: 4, 1>} : memref<67x57xf32, #tpu.memory_space<vmem>>, vector<15x57xf32>
    %c1_248 = arith.constant 1 : index
    %c5_249 = arith.constant 5 : index
    %299 = memref.load %arg2[%c1_248, %c5_249] : memref<11x11xf32, #tpu.memory_space<smem>>
    %300 = vector.broadcast %299 : f32 to vector<15x57xf32>
    %301 = arith.mulf %300, %298 : vector<15x57xf32>
    %302 = arith.addf %297, %301 : vector<15x57xf32>
    %c2_250 = arith.constant 2 : index
    %c0_251 = arith.constant 0 : index
    %303 = tpu.strided_load %arg11[%c2_250, %c0_251] {strides = array<i32: 4, 1>} : memref<67x57xf32, #tpu.memory_space<vmem>>, vector<15x57xf32>
    %c2_252 = arith.constant 2 : index
    %c5_253 = arith.constant 5 : index
    %304 = memref.load %arg2[%c2_252, %c5_253] : memref<11x11xf32, #tpu.memory_space<smem>>
    %305 = vector.broadcast %304 : f32 to vector<15x57xf32>
    %306 = arith.mulf %305, %303 : vector<15x57xf32>
    %307 = arith.addf %302, %306 : vector<15x57xf32>
    %c3_254 = arith.constant 3 : index
    %c0_255 = arith.constant 0 : index
    %308 = tpu.strided_load %arg11[%c3_254, %c0_255] {strides = array<i32: 4, 1>} : memref<67x57xf32, #tpu.memory_space<vmem>>, vector<15x57xf32>
    %c3_256 = arith.constant 3 : index
    %c5_257 = arith.constant 5 : index
    %309 = memref.load %arg2[%c3_256, %c5_257] : memref<11x11xf32, #tpu.memory_space<smem>>
    %310 = vector.broadcast %309 : f32 to vector<15x57xf32>
    %311 = arith.mulf %310, %308 : vector<15x57xf32>
    %312 = arith.addf %307, %311 : vector<15x57xf32>
    %c4_258 = arith.constant 4 : index
    %c0_259 = arith.constant 0 : index
    %313 = tpu.strided_load %arg11[%c4_258, %c0_259] {strides = array<i32: 4, 1>} : memref<67x57xf32, #tpu.memory_space<vmem>>, vector<15x57xf32>
    %c4_260 = arith.constant 4 : index
    %c5_261 = arith.constant 5 : index
    %314 = memref.load %arg2[%c4_260, %c5_261] : memref<11x11xf32, #tpu.memory_space<smem>>
    %315 = vector.broadcast %314 : f32 to vector<15x57xf32>
    %316 = arith.mulf %315, %313 : vector<15x57xf32>
    %317 = arith.addf %312, %316 : vector<15x57xf32>
    %c5_262 = arith.constant 5 : index
    %c0_263 = arith.constant 0 : index
    %318 = tpu.strided_load %arg11[%c5_262, %c0_263] {strides = array<i32: 4, 1>} : memref<67x57xf32, #tpu.memory_space<vmem>>, vector<15x57xf32>
    %c5_264 = arith.constant 5 : index
    %c5_265 = arith.constant 5 : index
    %319 = memref.load %arg2[%c5_264, %c5_265] : memref<11x11xf32, #tpu.memory_space<smem>>
    %320 = vector.broadcast %319 : f32 to vector<15x57xf32>
    %321 = arith.mulf %320, %318 : vector<15x57xf32>
    %322 = arith.addf %317, %321 : vector<15x57xf32>
    %c6_266 = arith.constant 6 : index
    %c0_267 = arith.constant 0 : index
    %323 = tpu.strided_load %arg11[%c6_266, %c0_267] {strides = array<i32: 4, 1>} : memref<67x57xf32, #tpu.memory_space<vmem>>, vector<15x57xf32>
    %c6_268 = arith.constant 6 : index
    %c5_269 = arith.constant 5 : index
    %324 = memref.load %arg2[%c6_268, %c5_269] : memref<11x11xf32, #tpu.memory_space<smem>>
    %325 = vector.broadcast %324 : f32 to vector<15x57xf32>
    %326 = arith.mulf %325, %323 : vector<15x57xf32>
    %327 = arith.addf %322, %326 : vector<15x57xf32>
    %c7_270 = arith.constant 7 : index
    %c0_271 = arith.constant 0 : index
    %328 = tpu.strided_load %arg11[%c7_270, %c0_271] {strides = array<i32: 4, 1>} : memref<67x57xf32, #tpu.memory_space<vmem>>, vector<15x57xf32>
    %c7_272 = arith.constant 7 : index
    %c5_273 = arith.constant 5 : index
    %329 = memref.load %arg2[%c7_272, %c5_273] : memref<11x11xf32, #tpu.memory_space<smem>>
    %330 = vector.broadcast %329 : f32 to vector<15x57xf32>
    %331 = arith.mulf %330, %328 : vector<15x57xf32>
    %332 = arith.addf %327, %331 : vector<15x57xf32>
    %c8_274 = arith.constant 8 : index
    %c0_275 = arith.constant 0 : index
    %333 = tpu.strided_load %arg11[%c8_274, %c0_275] {strides = array<i32: 4, 1>} : memref<67x57xf32, #tpu.memory_space<vmem>>, vector<15x57xf32>
    %c8_276 = arith.constant 8 : index
    %c5_277 = arith.constant 5 : index
    %334 = memref.load %arg2[%c8_276, %c5_277] : memref<11x11xf32, #tpu.memory_space<smem>>
    %335 = vector.broadcast %334 : f32 to vector<15x57xf32>
    %336 = arith.mulf %335, %333 : vector<15x57xf32>
    %337 = arith.addf %332, %336 : vector<15x57xf32>
    %c9_278 = arith.constant 9 : index
    %c0_279 = arith.constant 0 : index
    %338 = tpu.strided_load %arg11[%c9_278, %c0_279] {strides = array<i32: 4, 1>} : memref<67x57xf32, #tpu.memory_space<vmem>>, vector<15x57xf32>
    %c9_280 = arith.constant 9 : index
    %c5_281 = arith.constant 5 : index
    %339 = memref.load %arg2[%c9_280, %c5_281] : memref<11x11xf32, #tpu.memory_space<smem>>
    %340 = vector.broadcast %339 : f32 to vector<15x57xf32>
    %341 = arith.mulf %340, %338 : vector<15x57xf32>
    %342 = arith.addf %337, %341 : vector<15x57xf32>
    %c10_282 = arith.constant 10 : index
    %c0_283 = arith.constant 0 : index
    %343 = tpu.strided_load %arg11[%c10_282, %c0_283] {strides = array<i32: 4, 1>} : memref<67x57xf32, #tpu.memory_space<vmem>>, vector<15x57xf32>
    %c10_284 = arith.constant 10 : index
    %c5_285 = arith.constant 5 : index
    %344 = memref.load %arg2[%c10_284, %c5_285] : memref<11x11xf32, #tpu.memory_space<smem>>
    %345 = vector.broadcast %344 : f32 to vector<15x57xf32>
    %346 = arith.mulf %345, %343 : vector<15x57xf32>
    %347 = arith.addf %342, %346 : vector<15x57xf32>
    %c0_286 = arith.constant 0 : index
    %c6_287 = arith.constant 6 : index
    %348 = vector.load %arg6[%c0_286, %c6_287] : memref<67x67xf32, #tpu.memory_space<vmem>>, vector<67x57xf32>
    %c0_288 = arith.constant 0 : index
    %c0_289 = arith.constant 0 : index
    %349 = vector.load %arg11[%c0_288, %c0_289] : memref<67x57xf32, #tpu.memory_space<vmem>>, vector<67x57xf32>
    tpu.vector_store %arg11[%c0_288, %c0_289], %348 {strides = array<i32>} : memref<67x57xf32, #tpu.memory_space<vmem>>, vector<67x57xf32>,
    %c0_290 = arith.constant 0 : index
    %c0_291 = arith.constant 0 : index
    %350 = tpu.strided_load %arg11[%c0_290, %c0_291] {strides = array<i32: 4, 1>} : memref<67x57xf32, #tpu.memory_space<vmem>>, vector<15x57xf32>
    %c0_292 = arith.constant 0 : index
    %c6_293 = arith.constant 6 : index
    %351 = memref.load %arg2[%c0_292, %c6_293] : memref<11x11xf32, #tpu.memory_space<smem>>
    %352 = vector.broadcast %351 : f32 to vector<15x57xf32>
    %353 = arith.mulf %352, %350 : vector<15x57xf32>
    %354 = arith.addf %347, %353 : vector<15x57xf32>
    %c1_294 = arith.constant 1 : index
    %c0_295 = arith.constant 0 : index
    %355 = tpu.strided_load %arg11[%c1_294, %c0_295] {strides = array<i32: 4, 1>} : memref<67x57xf32, #tpu.memory_space<vmem>>, vector<15x57xf32>
    %c1_296 = arith.constant 1 : index
    %c6_297 = arith.constant 6 : index
    %356 = memref.load %arg2[%c1_296, %c6_297] : memref<11x11xf32, #tpu.memory_space<smem>>
    %357 = vector.broadcast %356 : f32 to vector<15x57xf32>
    %358 = arith.mulf %357, %355 : vector<15x57xf32>
    %359 = arith.addf %354, %358 : vector<15x57xf32>
    %c2_298 = arith.constant 2 : index
    %c0_299 = arith.constant 0 : index
    %360 = tpu.strided_load %arg11[%c2_298, %c0_299] {strides = array<i32: 4, 1>} : memref<67x57xf32, #tpu.memory_space<vmem>>, vector<15x57xf32>
    %c2_300 = arith.constant 2 : index
    %c6_301 = arith.constant 6 : index
    %361 = memref.load %arg2[%c2_300, %c6_301] : memref<11x11xf32, #tpu.memory_space<smem>>
    %362 = vector.broadcast %361 : f32 to vector<15x57xf32>
    %363 = arith.mulf %362, %360 : vector<15x57xf32>
    %364 = arith.addf %359, %363 : vector<15x57xf32>
    %c3_302 = arith.constant 3 : index
    %c0_303 = arith.constant 0 : index
    %365 = tpu.strided_load %arg11[%c3_302, %c0_303] {strides = array<i32: 4, 1>} : memref<67x57xf32, #tpu.memory_space<vmem>>, vector<15x57xf32>
    %c3_304 = arith.constant 3 : index
    %c6_305 = arith.constant 6 : index
    %366 = memref.load %arg2[%c3_304, %c6_305] : memref<11x11xf32, #tpu.memory_space<smem>>
    %367 = vector.broadcast %366 : f32 to vector<15x57xf32>
    %368 = arith.mulf %367, %365 : vector<15x57xf32>
    %369 = arith.addf %364, %368 : vector<15x57xf32>
    %c4_306 = arith.constant 4 : index
    %c0_307 = arith.constant 0 : index
    %370 = tpu.strided_load %arg11[%c4_306, %c0_307] {strides = array<i32: 4, 1>} : memref<67x57xf32, #tpu.memory_space<vmem>>, vector<15x57xf32>
    %c4_308 = arith.constant 4 : index
    %c6_309 = arith.constant 6 : index
    %371 = memref.load %arg2[%c4_308, %c6_309] : memref<11x11xf32, #tpu.memory_space<smem>>
    %372 = vector.broadcast %371 : f32 to vector<15x57xf32>
    %373 = arith.mulf %372, %370 : vector<15x57xf32>
    %374 = arith.addf %369, %373 : vector<15x57xf32>
    %c5_310 = arith.constant 5 : index
    %c0_311 = arith.constant 0 : index
    %375 = tpu.strided_load %arg11[%c5_310, %c0_311] {strides = array<i32: 4, 1>} : memref<67x57xf32, #tpu.memory_space<vmem>>, vector<15x57xf32>
    %c5_312 = arith.constant 5 : index
    %c6_313 = arith.constant 6 : index
    %376 = memref.load %arg2[%c5_312, %c6_313] : memref<11x11xf32, #tpu.memory_space<smem>>
    %377 = vector.broadcast %376 : f32 to vector<15x57xf32>
    %378 = arith.mulf %377, %375 : vector<15x57xf32>
    %379 = arith.addf %374, %378 : vector<15x57xf32>
    %c6_314 = arith.constant 6 : index
    %c0_315 = arith.constant 0 : index
    %380 = tpu.strided_load %arg11[%c6_314, %c0_315] {strides = array<i32: 4, 1>} : memref<67x57xf32, #tpu.memory_space<vmem>>, vector<15x57xf32>
    %c6_316 = arith.constant 6 : index
    %c6_317 = arith.constant 6 : index
    %381 = memref.load %arg2[%c6_316, %c6_317] : memref<11x11xf32, #tpu.memory_space<smem>>
    %382 = vector.broadcast %381 : f32 to vector<15x57xf32>
    %383 = arith.mulf %382, %380 : vector<15x57xf32>
    %384 = arith.addf %379, %383 : vector<15x57xf32>
    %c7_318 = arith.constant 7 : index
    %c0_319 = arith.constant 0 : index
    %385 = tpu.strided_load %arg11[%c7_318, %c0_319] {strides = array<i32: 4, 1>} : memref<67x57xf32, #tpu.memory_space<vmem>>, vector<15x57xf32>
    %c7_320 = arith.constant 7 : index
    %c6_321 = arith.constant 6 : index
    %386 = memref.load %arg2[%c7_320, %c6_321] : memref<11x11xf32, #tpu.memory_space<smem>>
    %387 = vector.broadcast %386 : f32 to vector<15x57xf32>
    %388 = arith.mulf %387, %385 : vector<15x57xf32>
    %389 = arith.addf %384, %388 : vector<15x57xf32>
    %c8_322 = arith.constant 8 : index
    %c0_323 = arith.constant 0 : index
    %390 = tpu.strided_load %arg11[%c8_322, %c0_323] {strides = array<i32: 4, 1>} : memref<67x57xf32, #tpu.memory_space<vmem>>, vector<15x57xf32>
    %c8_324 = arith.constant 8 : index
    %c6_325 = arith.constant 6 : index
    %391 = memref.load %arg2[%c8_324, %c6_325] : memref<11x11xf32, #tpu.memory_space<smem>>
    %392 = vector.broadcast %391 : f32 to vector<15x57xf32>
    %393 = arith.mulf %392, %390 : vector<15x57xf32>
    %394 = arith.addf %389, %393 : vector<15x57xf32>
    %c9_326 = arith.constant 9 : index
    %c0_327 = arith.constant 0 : index
    %395 = tpu.strided_load %arg11[%c9_326, %c0_327] {strides = array<i32: 4, 1>} : memref<67x57xf32, #tpu.memory_space<vmem>>, vector<15x57xf32>
    %c9_328 = arith.constant 9 : index
    %c6_329 = arith.constant 6 : index
    %396 = memref.load %arg2[%c9_328, %c6_329] : memref<11x11xf32, #tpu.memory_space<smem>>
    %397 = vector.broadcast %396 : f32 to vector<15x57xf32>
    %398 = arith.mulf %397, %395 : vector<15x57xf32>
    %399 = arith.addf %394, %398 : vector<15x57xf32>
    %c10_330 = arith.constant 10 : index
    %c0_331 = arith.constant 0 : index
    %400 = tpu.strided_load %arg11[%c10_330, %c0_331] {strides = array<i32: 4, 1>} : memref<67x57xf32, #tpu.memory_space<vmem>>, vector<15x57xf32>
    %c10_332 = arith.constant 10 : index
    %c6_333 = arith.constant 6 : index
    %401 = memref.load %arg2[%c10_332, %c6_333] : memref<11x11xf32, #tpu.memory_space<smem>>
    %402 = vector.broadcast %401 : f32 to vector<15x57xf32>
    %403 = arith.mulf %402, %400 : vector<15x57xf32>
    %404 = arith.addf %399, %403 : vector<15x57xf32>
    %c0_334 = arith.constant 0 : index
    %c7_335 = arith.constant 7 : index
    %405 = vector.load %arg6[%c0_334, %c7_335] : memref<67x67xf32, #tpu.memory_space<vmem>>, vector<67x57xf32>
    %c0_336 = arith.constant 0 : index
    %c0_337 = arith.constant 0 : index
    %406 = vector.load %arg11[%c0_336, %c0_337] : memref<67x57xf32, #tpu.memory_space<vmem>>, vector<67x57xf32>
    tpu.vector_store %arg11[%c0_336, %c0_337], %405 {strides = array<i32>} : memref<67x57xf32, #tpu.memory_space<vmem>>, vector<67x57xf32>,
    %c0_338 = arith.constant 0 : index
    %c0_339 = arith.constant 0 : index
    %407 = tpu.strided_load %arg11[%c0_338, %c0_339] {strides = array<i32: 4, 1>} : memref<67x57xf32, #tpu.memory_space<vmem>>, vector<15x57xf32>
    %c0_340 = arith.constant 0 : index
    %c7_341 = arith.constant 7 : index
    %408 = memref.load %arg2[%c0_340, %c7_341] : memref<11x11xf32, #tpu.memory_space<smem>>
    %409 = vector.broadcast %408 : f32 to vector<15x57xf32>
    %410 = arith.mulf %409, %407 : vector<15x57xf32>
    %411 = arith.addf %404, %410 : vector<15x57xf32>
    %c1_342 = arith.constant 1 : index
    %c0_343 = arith.constant 0 : index
    %412 = tpu.strided_load %arg11[%c1_342, %c0_343] {strides = array<i32: 4, 1>} : memref<67x57xf32, #tpu.memory_space<vmem>>, vector<15x57xf32>
    %c1_344 = arith.constant 1 : index
    %c7_345 = arith.constant 7 : index
    %413 = memref.load %arg2[%c1_344, %c7_345] : memref<11x11xf32, #tpu.memory_space<smem>>
    %414 = vector.broadcast %413 : f32 to vector<15x57xf32>
    %415 = arith.mulf %414, %412 : vector<15x57xf32>
    %416 = arith.addf %411, %415 : vector<15x57xf32>
    %c2_346 = arith.constant 2 : index
    %c0_347 = arith.constant 0 : index
    %417 = tpu.strided_load %arg11[%c2_346, %c0_347] {strides = array<i32: 4, 1>} : memref<67x57xf32, #tpu.memory_space<vmem>>, vector<15x57xf32>
    %c2_348 = arith.constant 2 : index
    %c7_349 = arith.constant 7 : index
    %418 = memref.load %arg2[%c2_348, %c7_349] : memref<11x11xf32, #tpu.memory_space<smem>>
    %419 = vector.broadcast %418 : f32 to vector<15x57xf32>
    %420 = arith.mulf %419, %417 : vector<15x57xf32>
    %421 = arith.addf %416, %420 : vector<15x57xf32>
    %c3_350 = arith.constant 3 : index
    %c0_351 = arith.constant 0 : index
    %422 = tpu.strided_load %arg11[%c3_350, %c0_351] {strides = array<i32: 4, 1>} : memref<67x57xf32, #tpu.memory_space<vmem>>, vector<15x57xf32>
    %c3_352 = arith.constant 3 : index
    %c7_353 = arith.constant 7 : index
    %423 = memref.load %arg2[%c3_352, %c7_353] : memref<11x11xf32, #tpu.memory_space<smem>>
    %424 = vector.broadcast %423 : f32 to vector<15x57xf32>
    %425 = arith.mulf %424, %422 : vector<15x57xf32>
    %426 = arith.addf %421, %425 : vector<15x57xf32>
    %c4_354 = arith.constant 4 : index
    %c0_355 = arith.constant 0 : index
    %427 = tpu.strided_load %arg11[%c4_354, %c0_355] {strides = array<i32: 4, 1>} : memref<67x57xf32, #tpu.memory_space<vmem>>, vector<15x57xf32>
    %c4_356 = arith.constant 4 : index
    %c7_357 = arith.constant 7 : index
    %428 = memref.load %arg2[%c4_356, %c7_357] : memref<11x11xf32, #tpu.memory_space<smem>>
    %429 = vector.broadcast %428 : f32 to vector<15x57xf32>
    %430 = arith.mulf %429, %427 : vector<15x57xf32>
    %431 = arith.addf %426, %430 : vector<15x57xf32>
    %c5_358 = arith.constant 5 : index
    %c0_359 = arith.constant 0 : index
    %432 = tpu.strided_load %arg11[%c5_358, %c0_359] {strides = array<i32: 4, 1>} : memref<67x57xf32, #tpu.memory_space<vmem>>, vector<15x57xf32>
    %c5_360 = arith.constant 5 : index
    %c7_361 = arith.constant 7 : index
    %433 = memref.load %arg2[%c5_360, %c7_361] : memref<11x11xf32, #tpu.memory_space<smem>>
    %434 = vector.broadcast %433 : f32 to vector<15x57xf32>
    %435 = arith.mulf %434, %432 : vector<15x57xf32>
    %436 = arith.addf %431, %435 : vector<15x57xf32>
    %c6_362 = arith.constant 6 : index
    %c0_363 = arith.constant 0 : index
    %437 = tpu.strided_load %arg11[%c6_362, %c0_363] {strides = array<i32: 4, 1>} : memref<67x57xf32, #tpu.memory_space<vmem>>, vector<15x57xf32>
    %c6_364 = arith.constant 6 : index
    %c7_365 = arith.constant 7 : index
    %438 = memref.load %arg2[%c6_364, %c7_365] : memref<11x11xf32, #tpu.memory_space<smem>>
    %439 = vector.broadcast %438 : f32 to vector<15x57xf32>
    %440 = arith.mulf %439, %437 : vector<15x57xf32>
    %441 = arith.addf %436, %440 : vector<15x57xf32>
    %c7_366 = arith.constant 7 : index
    %c0_367 = arith.constant 0 : index
    %442 = tpu.strided_load %arg11[%c7_366, %c0_367] {strides = array<i32: 4, 1>} : memref<67x57xf32, #tpu.memory_space<vmem>>, vector<15x57xf32>
    %c7_368 = arith.constant 7 : index
    %c7_369 = arith.constant 7 : index
    %443 = memref.load %arg2[%c7_368, %c7_369] : memref<11x11xf32, #tpu.memory_space<smem>>
    %444 = vector.broadcast %443 : f32 to vector<15x57xf32>
    %445 = arith.mulf %444, %442 : vector<15x57xf32>
    %446 = arith.addf %441, %445 : vector<15x57xf32>
    %c8_370 = arith.constant 8 : index
    %c0_371 = arith.constant 0 : index
    %447 = tpu.strided_load %arg11[%c8_370, %c0_371] {strides = array<i32: 4, 1>} : memref<67x57xf32, #tpu.memory_space<vmem>>, vector<15x57xf32>
    %c8_372 = arith.constant 8 : index
    %c7_373 = arith.constant 7 : index
    %448 = memref.load %arg2[%c8_372, %c7_373] : memref<11x11xf32, #tpu.memory_space<smem>>
    %449 = vector.broadcast %448 : f32 to vector<15x57xf32>
    %450 = arith.mulf %449, %447 : vector<15x57xf32>
    %451 = arith.addf %446, %450 : vector<15x57xf32>
    %c9_374 = arith.constant 9 : index
    %c0_375 = arith.constant 0 : index
    %452 = tpu.strided_load %arg11[%c9_374, %c0_375] {strides = array<i32: 4, 1>} : memref<67x57xf32, #tpu.memory_space<vmem>>, vector<15x57xf32>
    %c9_376 = arith.constant 9 : index
    %c7_377 = arith.constant 7 : index
    %453 = memref.load %arg2[%c9_376, %c7_377] : memref<11x11xf32, #tpu.memory_space<smem>>
    %454 = vector.broadcast %453 : f32 to vector<15x57xf32>
    %455 = arith.mulf %454, %452 : vector<15x57xf32>
    %456 = arith.addf %451, %455 : vector<15x57xf32>
    %c10_378 = arith.constant 10 : index
    %c0_379 = arith.constant 0 : index
    %457 = tpu.strided_load %arg11[%c10_378, %c0_379] {strides = array<i32: 4, 1>} : memref<67x57xf32, #tpu.memory_space<vmem>>, vector<15x57xf32>
    %c10_380 = arith.constant 10 : index
    %c7_381 = arith.constant 7 : index
    %458 = memref.load %arg2[%c10_380, %c7_381] : memref<11x11xf32, #tpu.memory_space<smem>>
    %459 = vector.broadcast %458 : f32 to vector<15x57xf32>
    %460 = arith.mulf %459, %457 : vector<15x57xf32>
    %461 = arith.addf %456, %460 : vector<15x57xf32>
    %c0_382 = arith.constant 0 : index
    %c8_383 = arith.constant 8 : index
    %462 = vector.load %arg6[%c0_382, %c8_383] : memref<67x67xf32, #tpu.memory_space<vmem>>, vector<67x57xf32>
    %c0_384 = arith.constant 0 : index
    %c0_385 = arith.constant 0 : index
    %463 = vector.load %arg11[%c0_384, %c0_385] : memref<67x57xf32, #tpu.memory_space<vmem>>, vector<67x57xf32>
    tpu.vector_store %arg11[%c0_384, %c0_385], %462 {strides = array<i32>} : memref<67x57xf32, #tpu.memory_space<vmem>>, vector<67x57xf32>,
    %c0_386 = arith.constant 0 : index
    %c0_387 = arith.constant 0 : index
    %464 = tpu.strided_load %arg11[%c0_386, %c0_387] {strides = array<i32: 4, 1>} : memref<67x57xf32, #tpu.memory_space<vmem>>, vector<15x57xf32>
    %c0_388 = arith.constant 0 : index
    %c8_389 = arith.constant 8 : index
    %465 = memref.load %arg2[%c0_388, %c8_389] : memref<11x11xf32, #tpu.memory_space<smem>>
    %466 = vector.broadcast %465 : f32 to vector<15x57xf32>
    %467 = arith.mulf %466, %464 : vector<15x57xf32>
    %468 = arith.addf %461, %467 : vector<15x57xf32>
    %c1_390 = arith.constant 1 : index
    %c0_391 = arith.constant 0 : index
    %469 = tpu.strided_load %arg11[%c1_390, %c0_391] {strides = array<i32: 4, 1>} : memref<67x57xf32, #tpu.memory_space<vmem>>, vector<15x57xf32>
    %c1_392 = arith.constant 1 : index
    %c8_393 = arith.constant 8 : index
    %470 = memref.load %arg2[%c1_392, %c8_393] : memref<11x11xf32, #tpu.memory_space<smem>>
    %471 = vector.broadcast %470 : f32 to vector<15x57xf32>
    %472 = arith.mulf %471, %469 : vector<15x57xf32>
    %473 = arith.addf %468, %472 : vector<15x57xf32>
    %c2_394 = arith.constant 2 : index
    %c0_395 = arith.constant 0 : index
    %474 = tpu.strided_load %arg11[%c2_394, %c0_395] {strides = array<i32: 4, 1>} : memref<67x57xf32, #tpu.memory_space<vmem>>, vector<15x57xf32>
    %c2_396 = arith.constant 2 : index
    %c8_397 = arith.constant 8 : index
    %475 = memref.load %arg2[%c2_396, %c8_397] : memref<11x11xf32, #tpu.memory_space<smem>>
    %476 = vector.broadcast %475 : f32 to vector<15x57xf32>
    %477 = arith.mulf %476, %474 : vector<15x57xf32>
    %478 = arith.addf %473, %477 : vector<15x57xf32>
    %c3_398 = arith.constant 3 : index
    %c0_399 = arith.constant 0 : index
    %479 = tpu.strided_load %arg11[%c3_398, %c0_399] {strides = array<i32: 4, 1>} : memref<67x57xf32, #tpu.memory_space<vmem>>, vector<15x57xf32>
    %c3_400 = arith.constant 3 : index
    %c8_401 = arith.constant 8 : index
    %480 = memref.load %arg2[%c3_400, %c8_401] : memref<11x11xf32, #tpu.memory_space<smem>>
    %481 = vector.broadcast %480 : f32 to vector<15x57xf32>
    %482 = arith.mulf %481, %479 : vector<15x57xf32>
    %483 = arith.addf %478, %482 : vector<15x57xf32>
    %c4_402 = arith.constant 4 : index
    %c0_403 = arith.constant 0 : index
    %484 = tpu.strided_load %arg11[%c4_402, %c0_403] {strides = array<i32: 4, 1>} : memref<67x57xf32, #tpu.memory_space<vmem>>, vector<15x57xf32>
    %c4_404 = arith.constant 4 : index
    %c8_405 = arith.constant 8 : index
    %485 = memref.load %arg2[%c4_404, %c8_405] : memref<11x11xf32, #tpu.memory_space<smem>>
    %486 = vector.broadcast %485 : f32 to vector<15x57xf32>
    %487 = arith.mulf %486, %484 : vector<15x57xf32>
    %488 = arith.addf %483, %487 : vector<15x57xf32>
    %c5_406 = arith.constant 5 : index
    %c0_407 = arith.constant 0 : index
    %489 = tpu.strided_load %arg11[%c5_406, %c0_407] {strides = array<i32: 4, 1>} : memref<67x57xf32, #tpu.memory_space<vmem>>, vector<15x57xf32>
    %c5_408 = arith.constant 5 : index
    %c8_409 = arith.constant 8 : index
    %490 = memref.load %arg2[%c5_408, %c8_409] : memref<11x11xf32, #tpu.memory_space<smem>>
    %491 = vector.broadcast %490 : f32 to vector<15x57xf32>
    %492 = arith.mulf %491, %489 : vector<15x57xf32>
    %493 = arith.addf %488, %492 : vector<15x57xf32>
    %c6_410 = arith.constant 6 : index
    %c0_411 = arith.constant 0 : index
    %494 = tpu.strided_load %arg11[%c6_410, %c0_411] {strides = array<i32: 4, 1>} : memref<67x57xf32, #tpu.memory_space<vmem>>, vector<15x57xf32>
    %c6_412 = arith.constant 6 : index
    %c8_413 = arith.constant 8 : index
    %495 = memref.load %arg2[%c6_412, %c8_413] : memref<11x11xf32, #tpu.memory_space<smem>>
    %496 = vector.broadcast %495 : f32 to vector<15x57xf32>
    %497 = arith.mulf %496, %494 : vector<15x57xf32>
    %498 = arith.addf %493, %497 : vector<15x57xf32>
    %c7_414 = arith.constant 7 : index
    %c0_415 = arith.constant 0 : index
    %499 = tpu.strided_load %arg11[%c7_414, %c0_415] {strides = array<i32: 4, 1>} : memref<67x57xf32, #tpu.memory_space<vmem>>, vector<15x57xf32>
    %c7_416 = arith.constant 7 : index
    %c8_417 = arith.constant 8 : index
    %500 = memref.load %arg2[%c7_416, %c8_417] : memref<11x11xf32, #tpu.memory_space<smem>>
    %501 = vector.broadcast %500 : f32 to vector<15x57xf32>
    %502 = arith.mulf %501, %499 : vector<15x57xf32>
    %503 = arith.addf %498, %502 : vector<15x57xf32>
    %c8_418 = arith.constant 8 : index
    %c0_419 = arith.constant 0 : index
    %504 = tpu.strided_load %arg11[%c8_418, %c0_419] {strides = array<i32: 4, 1>} : memref<67x57xf32, #tpu.memory_space<vmem>>, vector<15x57xf32>
    %c8_420 = arith.constant 8 : index
    %c8_421 = arith.constant 8 : index
    %505 = memref.load %arg2[%c8_420, %c8_421] : memref<11x11xf32, #tpu.memory_space<smem>>
    %506 = vector.broadcast %505 : f32 to vector<15x57xf32>
    %507 = arith.mulf %506, %504 : vector<15x57xf32>
    %508 = arith.addf %503, %507 : vector<15x57xf32>
    %c9_422 = arith.constant 9 : index
    %c0_423 = arith.constant 0 : index
    %509 = tpu.strided_load %arg11[%c9_422, %c0_423] {strides = array<i32: 4, 1>} : memref<67x57xf32, #tpu.memory_space<vmem>>, vector<15x57xf32>
    %c9_424 = arith.constant 9 : index
    %c8_425 = arith.constant 8 : index
    %510 = memref.load %arg2[%c9_424, %c8_425] : memref<11x11xf32, #tpu.memory_space<smem>>
    %511 = vector.broadcast %510 : f32 to vector<15x57xf32>
    %512 = arith.mulf %511, %509 : vector<15x57xf32>
    %513 = arith.addf %508, %512 : vector<15x57xf32>
    %c10_426 = arith.constant 10 : index
    %c0_427 = arith.constant 0 : index
    %514 = tpu.strided_load %arg11[%c10_426, %c0_427] {strides = array<i32: 4, 1>} : memref<67x57xf32, #tpu.memory_space<vmem>>, vector<15x57xf32>
    %c10_428 = arith.constant 10 : index
    %c8_429 = arith.constant 8 : index
    %515 = memref.load %arg2[%c10_428, %c8_429] : memref<11x11xf32, #tpu.memory_space<smem>>
    %516 = vector.broadcast %515 : f32 to vector<15x57xf32>
    %517 = arith.mulf %516, %514 : vector<15x57xf32>
    %518 = arith.addf %513, %517 : vector<15x57xf32>
    %c0_430 = arith.constant 0 : index
    %c9_431 = arith.constant 9 : index
    %519 = vector.load %arg6[%c0_430, %c9_431] : memref<67x67xf32, #tpu.memory_space<vmem>>, vector<67x57xf32>
    %c0_432 = arith.constant 0 : index
    %c0_433 = arith.constant 0 : index
    %520 = vector.load %arg11[%c0_432, %c0_433] : memref<67x57xf32, #tpu.memory_space<vmem>>, vector<67x57xf32>
    tpu.vector_store %arg11[%c0_432, %c0_433], %519 {strides = array<i32>} : memref<67x57xf32, #tpu.memory_space<vmem>>, vector<67x57xf32>,
    %c0_434 = arith.constant 0 : index
    %c0_435 = arith.constant 0 : index
    %521 = tpu.strided_load %arg11[%c0_434, %c0_435] {strides = array<i32: 4, 1>} : memref<67x57xf32, #tpu.memory_space<vmem>>, vector<15x57xf32>
    %c0_436 = arith.constant 0 : index
    %c9_437 = arith.constant 9 : index
    %522 = memref.load %arg2[%c0_436, %c9_437] : memref<11x11xf32, #tpu.memory_space<smem>>
    %523 = vector.broadcast %522 : f32 to vector<15x57xf32>
    %524 = arith.mulf %523, %521 : vector<15x57xf32>
    %525 = arith.addf %518, %524 : vector<15x57xf32>
    %c1_438 = arith.constant 1 : index
    %c0_439 = arith.constant 0 : index
    %526 = tpu.strided_load %arg11[%c1_438, %c0_439] {strides = array<i32: 4, 1>} : memref<67x57xf32, #tpu.memory_space<vmem>>, vector<15x57xf32>
    %c1_440 = arith.constant 1 : index
    %c9_441 = arith.constant 9 : index
    %527 = memref.load %arg2[%c1_440, %c9_441] : memref<11x11xf32, #tpu.memory_space<smem>>
    %528 = vector.broadcast %527 : f32 to vector<15x57xf32>
    %529 = arith.mulf %528, %526 : vector<15x57xf32>
    %530 = arith.addf %525, %529 : vector<15x57xf32>
    %c2_442 = arith.constant 2 : index
    %c0_443 = arith.constant 0 : index
    %531 = tpu.strided_load %arg11[%c2_442, %c0_443] {strides = array<i32: 4, 1>} : memref<67x57xf32, #tpu.memory_space<vmem>>, vector<15x57xf32>
    %c2_444 = arith.constant 2 : index
    %c9_445 = arith.constant 9 : index
    %532 = memref.load %arg2[%c2_444, %c9_445] : memref<11x11xf32, #tpu.memory_space<smem>>
    %533 = vector.broadcast %532 : f32 to vector<15x57xf32>
    %534 = arith.mulf %533, %531 : vector<15x57xf32>
    %535 = arith.addf %530, %534 : vector<15x57xf32>
    %c3_446 = arith.constant 3 : index
    %c0_447 = arith.constant 0 : index
    %536 = tpu.strided_load %arg11[%c3_446, %c0_447] {strides = array<i32: 4, 1>} : memref<67x57xf32, #tpu.memory_space<vmem>>, vector<15x57xf32>
    %c3_448 = arith.constant 3 : index
    %c9_449 = arith.constant 9 : index
    %537 = memref.load %arg2[%c3_448, %c9_449] : memref<11x11xf32, #tpu.memory_space<smem>>
    %538 = vector.broadcast %537 : f32 to vector<15x57xf32>
    %539 = arith.mulf %538, %536 : vector<15x57xf32>
    %540 = arith.addf %535, %539 : vector<15x57xf32>
    %c4_450 = arith.constant 4 : index
    %c0_451 = arith.constant 0 : index
    %541 = tpu.strided_load %arg11[%c4_450, %c0_451] {strides = array<i32: 4, 1>} : memref<67x57xf32, #tpu.memory_space<vmem>>, vector<15x57xf32>
    %c4_452 = arith.constant 4 : index
    %c9_453 = arith.constant 9 : index
    %542 = memref.load %arg2[%c4_452, %c9_453] : memref<11x11xf32, #tpu.memory_space<smem>>
    %543 = vector.broadcast %542 : f32 to vector<15x57xf32>
    %544 = arith.mulf %543, %541 : vector<15x57xf32>
    %545 = arith.addf %540, %544 : vector<15x57xf32>
    %c5_454 = arith.constant 5 : index
    %c0_455 = arith.constant 0 : index
    %546 = tpu.strided_load %arg11[%c5_454, %c0_455] {strides = array<i32: 4, 1>} : memref<67x57xf32, #tpu.memory_space<vmem>>, vector<15x57xf32>
    %c5_456 = arith.constant 5 : index
    %c9_457 = arith.constant 9 : index
    %547 = memref.load %arg2[%c5_456, %c9_457] : memref<11x11xf32, #tpu.memory_space<smem>>
    %548 = vector.broadcast %547 : f32 to vector<15x57xf32>
    %549 = arith.mulf %548, %546 : vector<15x57xf32>
    %550 = arith.addf %545, %549 : vector<15x57xf32>
    %c6_458 = arith.constant 6 : index
    %c0_459 = arith.constant 0 : index
    %551 = tpu.strided_load %arg11[%c6_458, %c0_459] {strides = array<i32: 4, 1>} : memref<67x57xf32, #tpu.memory_space<vmem>>, vector<15x57xf32>
    %c6_460 = arith.constant 6 : index
    %c9_461 = arith.constant 9 : index
    %552 = memref.load %arg2[%c6_460, %c9_461] : memref<11x11xf32, #tpu.memory_space<smem>>
    %553 = vector.broadcast %552 : f32 to vector<15x57xf32>
    %554 = arith.mulf %553, %551 : vector<15x57xf32>
    %555 = arith.addf %550, %554 : vector<15x57xf32>
    %c7_462 = arith.constant 7 : index
    %c0_463 = arith.constant 0 : index
    %556 = tpu.strided_load %arg11[%c7_462, %c0_463] {strides = array<i32: 4, 1>} : memref<67x57xf32, #tpu.memory_space<vmem>>, vector<15x57xf32>
    %c7_464 = arith.constant 7 : index
    %c9_465 = arith.constant 9 : index
    %557 = memref.load %arg2[%c7_464, %c9_465] : memref<11x11xf32, #tpu.memory_space<smem>>
    %558 = vector.broadcast %557 : f32 to vector<15x57xf32>
    %559 = arith.mulf %558, %556 : vector<15x57xf32>
    %560 = arith.addf %555, %559 : vector<15x57xf32>
    %c8_466 = arith.constant 8 : index
    %c0_467 = arith.constant 0 : index
    %561 = tpu.strided_load %arg11[%c8_466, %c0_467] {strides = array<i32: 4, 1>} : memref<67x57xf32, #tpu.memory_space<vmem>>, vector<15x57xf32>
    %c8_468 = arith.constant 8 : index
    %c9_469 = arith.constant 9 : index
    %562 = memref.load %arg2[%c8_468, %c9_469] : memref<11x11xf32, #tpu.memory_space<smem>>
    %563 = vector.broadcast %562 : f32 to vector<15x57xf32>
    %564 = arith.mulf %563, %561 : vector<15x57xf32>
    %565 = arith.addf %560, %564 : vector<15x57xf32>
    %c9_470 = arith.constant 9 : index
    %c0_471 = arith.constant 0 : index
    %566 = tpu.strided_load %arg11[%c9_470, %c0_471] {strides = array<i32: 4, 1>} : memref<67x57xf32, #tpu.memory_space<vmem>>, vector<15x57xf32>
    %c9_472 = arith.constant 9 : index
    %c9_473 = arith.constant 9 : index
    %567 = memref.load %arg2[%c9_472, %c9_473] : memref<11x11xf32, #tpu.memory_space<smem>>
    %568 = vector.broadcast %567 : f32 to vector<15x57xf32>
    %569 = arith.mulf %568, %566 : vector<15x57xf32>
    %570 = arith.addf %565, %569 : vector<15x57xf32>
    %c10_474 = arith.constant 10 : index
    %c0_475 = arith.constant 0 : index
    %571 = tpu.strided_load %arg11[%c10_474, %c0_475] {strides = array<i32: 4, 1>} : memref<67x57xf32, #tpu.memory_space<vmem>>, vector<15x57xf32>
    %c10_476 = arith.constant 10 : index
    %c9_477 = arith.constant 9 : index
    %572 = memref.load %arg2[%c10_476, %c9_477] : memref<11x11xf32, #tpu.memory_space<smem>>
    %573 = vector.broadcast %572 : f32 to vector<15x57xf32>
    %574 = arith.mulf %573, %571 : vector<15x57xf32>
    %575 = arith.addf %570, %574 : vector<15x57xf32>
    %c0_478 = arith.constant 0 : index
    %c10_479 = arith.constant 10 : index
    %576 = vector.load %arg6[%c0_478, %c10_479] : memref<67x67xf32, #tpu.memory_space<vmem>>, vector<67x57xf32>
    %c0_480 = arith.constant 0 : index
    %c0_481 = arith.constant 0 : index
    %577 = vector.load %arg11[%c0_480, %c0_481] : memref<67x57xf32, #tpu.memory_space<vmem>>, vector<67x57xf32>
    tpu.vector_store %arg11[%c0_480, %c0_481], %576 {strides = array<i32>} : memref<67x57xf32, #tpu.memory_space<vmem>>, vector<67x57xf32>,
    %c0_482 = arith.constant 0 : index
    %c0_483 = arith.constant 0 : index
    %578 = tpu.strided_load %arg11[%c0_482, %c0_483] {strides = array<i32: 4, 1>} : memref<67x57xf32, #tpu.memory_space<vmem>>, vector<15x57xf32>
    %c0_484 = arith.constant 0 : index
    %c10_485 = arith.constant 10 : index
    %579 = memref.load %arg2[%c0_484, %c10_485] : memref<11x11xf32, #tpu.memory_space<smem>>
    %580 = vector.broadcast %579 : f32 to vector<15x57xf32>
    %581 = arith.mulf %580, %578 : vector<15x57xf32>
    %582 = arith.addf %575, %581 : vector<15x57xf32>
    %c1_486 = arith.constant 1 : index
    %c0_487 = arith.constant 0 : index
    %583 = tpu.strided_load %arg11[%c1_486, %c0_487] {strides = array<i32: 4, 1>} : memref<67x57xf32, #tpu.memory_space<vmem>>, vector<15x57xf32>
    %c1_488 = arith.constant 1 : index
    %c10_489 = arith.constant 10 : index
    %584 = memref.load %arg2[%c1_488, %c10_489] : memref<11x11xf32, #tpu.memory_space<smem>>
    %585 = vector.broadcast %584 : f32 to vector<15x57xf32>
    %586 = arith.mulf %585, %583 : vector<15x57xf32>
    %587 = arith.addf %582, %586 : vector<15x57xf32>
    %c2_490 = arith.constant 2 : index
    %c0_491 = arith.constant 0 : index
    %588 = tpu.strided_load %arg11[%c2_490, %c0_491] {strides = array<i32: 4, 1>} : memref<67x57xf32, #tpu.memory_space<vmem>>, vector<15x57xf32>
    %c2_492 = arith.constant 2 : index
    %c10_493 = arith.constant 10 : index
    %589 = memref.load %arg2[%c2_492, %c10_493] : memref<11x11xf32, #tpu.memory_space<smem>>
    %590 = vector.broadcast %589 : f32 to vector<15x57xf32>
    %591 = arith.mulf %590, %588 : vector<15x57xf32>
    %592 = arith.addf %587, %591 : vector<15x57xf32>
    %c3_494 = arith.constant 3 : index
    %c0_495 = arith.constant 0 : index
    %593 = tpu.strided_load %arg11[%c3_494, %c0_495] {strides = array<i32: 4, 1>} : memref<67x57xf32, #tpu.memory_space<vmem>>, vector<15x57xf32>
    %c3_496 = arith.constant 3 : index
    %c10_497 = arith.constant 10 : index
    %594 = memref.load %arg2[%c3_496, %c10_497] : memref<11x11xf32, #tpu.memory_space<smem>>
    %595 = vector.broadcast %594 : f32 to vector<15x57xf32>
    %596 = arith.mulf %595, %593 : vector<15x57xf32>
    %597 = arith.addf %592, %596 : vector<15x57xf32>
    %c4_498 = arith.constant 4 : index
    %c0_499 = arith.constant 0 : index
    %598 = tpu.strided_load %arg11[%c4_498, %c0_499] {strides = array<i32: 4, 1>} : memref<67x57xf32, #tpu.memory_space<vmem>>, vector<15x57xf32>
    %c4_500 = arith.constant 4 : index
    %c10_501 = arith.constant 10 : index
    %599 = memref.load %arg2[%c4_500, %c10_501] : memref<11x11xf32, #tpu.memory_space<smem>>
    %600 = vector.broadcast %599 : f32 to vector<15x57xf32>
    %601 = arith.mulf %600, %598 : vector<15x57xf32>
    %602 = arith.addf %597, %601 : vector<15x57xf32>
    %c5_502 = arith.constant 5 : index
    %c0_503 = arith.constant 0 : index
    %603 = tpu.strided_load %arg11[%c5_502, %c0_503] {strides = array<i32: 4, 1>} : memref<67x57xf32, #tpu.memory_space<vmem>>, vector<15x57xf32>
    %c5_504 = arith.constant 5 : index
    %c10_505 = arith.constant 10 : index
    %604 = memref.load %arg2[%c5_504, %c10_505] : memref<11x11xf32, #tpu.memory_space<smem>>
    %605 = vector.broadcast %604 : f32 to vector<15x57xf32>
    %606 = arith.mulf %605, %603 : vector<15x57xf32>
    %607 = arith.addf %602, %606 : vector<15x57xf32>
    %c6_506 = arith.constant 6 : index
    %c0_507 = arith.constant 0 : index
    %608 = tpu.strided_load %arg11[%c6_506, %c0_507] {strides = array<i32: 4, 1>} : memref<67x57xf32, #tpu.memory_space<vmem>>, vector<15x57xf32>
    %c6_508 = arith.constant 6 : index
    %c10_509 = arith.constant 10 : index
    %609 = memref.load %arg2[%c6_508, %c10_509] : memref<11x11xf32, #tpu.memory_space<smem>>
    %610 = vector.broadcast %609 : f32 to vector<15x57xf32>
    %611 = arith.mulf %610, %608 : vector<15x57xf32>
    %612 = arith.addf %607, %611 : vector<15x57xf32>
    %c7_510 = arith.constant 7 : index
    %c0_511 = arith.constant 0 : index
    %613 = tpu.strided_load %arg11[%c7_510, %c0_511] {strides = array<i32: 4, 1>} : memref<67x57xf32, #tpu.memory_space<vmem>>, vector<15x57xf32>
    %c7_512 = arith.constant 7 : index
    %c10_513 = arith.constant 10 : index
    %614 = memref.load %arg2[%c7_512, %c10_513] : memref<11x11xf32, #tpu.memory_space<smem>>
    %615 = vector.broadcast %614 : f32 to vector<15x57xf32>
    %616 = arith.mulf %615, %613 : vector<15x57xf32>
    %617 = arith.addf %612, %616 : vector<15x57xf32>
    %c8_514 = arith.constant 8 : index
    %c0_515 = arith.constant 0 : index
    %618 = tpu.strided_load %arg11[%c8_514, %c0_515] {strides = array<i32: 4, 1>} : memref<67x57xf32, #tpu.memory_space<vmem>>, vector<15x57xf32>
    %c8_516 = arith.constant 8 : index
    %c10_517 = arith.constant 10 : index
    %619 = memref.load %arg2[%c8_516, %c10_517] : memref<11x11xf32, #tpu.memory_space<smem>>
    %620 = vector.broadcast %619 : f32 to vector<15x57xf32>
    %621 = arith.mulf %620, %618 : vector<15x57xf32>
    %622 = arith.addf %617, %621 : vector<15x57xf32>
    %c9_518 = arith.constant 9 : index
    %c0_519 = arith.constant 0 : index
    %623 = tpu.strided_load %arg11[%c9_518, %c0_519] {strides = array<i32: 4, 1>} : memref<67x57xf32, #tpu.memory_space<vmem>>, vector<15x57xf32>
    %c9_520 = arith.constant 9 : index
    %c10_521 = arith.constant 10 : index
    %624 = memref.load %arg2[%c9_520, %c10_521] : memref<11x11xf32, #tpu.memory_space<smem>>
    %625 = vector.broadcast %624 : f32 to vector<15x57xf32>
    %626 = arith.mulf %625, %623 : vector<15x57xf32>
    %627 = arith.addf %622, %626 : vector<15x57xf32>
    %c10_522 = arith.constant 10 : index
    %c0_523 = arith.constant 0 : index
    %628 = tpu.strided_load %arg11[%c10_522, %c0_523] {strides = array<i32: 4, 1>} : memref<67x57xf32, #tpu.memory_space<vmem>>, vector<15x57xf32>
    %c10_524 = arith.constant 10 : index
    %c10_525 = arith.constant 10 : index
    %629 = memref.load %arg2[%c10_524, %c10_525] : memref<11x11xf32, #tpu.memory_space<smem>>
    %630 = vector.broadcast %629 : f32 to vector<15x57xf32>
    %631 = arith.mulf %630, %628 : vector<15x57xf32>
    %632 = arith.addf %627, %631 : vector<15x57xf32>
    %633 = vector.extract_strided_slice %632 {offsets = [0, 0], sizes = [15, 1], strides = [1, 1]} : vector<15x57xf32> to vector<15x1xf32>
    %634 = vector.extract_strided_slice %632 {offsets = [0, 4], sizes = [15, 1], strides = [1, 1]} : vector<15x57xf32> to vector<15x1xf32>
    %635 = vector.extract_strided_slice %632 {offsets = [0, 8], sizes = [15, 1], strides = [1, 1]} : vector<15x57xf32> to vector<15x1xf32>
    %636 = vector.extract_strided_slice %632 {offsets = [0, 12], sizes = [15, 1], strides = [1, 1]} : vector<15x57xf32> to vector<15x1xf32>
    %637 = vector.extract_strided_slice %632 {offsets = [0, 16], sizes = [15, 1], strides = [1, 1]} : vector<15x57xf32> to vector<15x1xf32>
    %638 = vector.extract_strided_slice %632 {offsets = [0, 20], sizes = [15, 1], strides = [1, 1]} : vector<15x57xf32> to vector<15x1xf32>
    %639 = vector.extract_strided_slice %632 {offsets = [0, 24], sizes = [15, 1], strides = [1, 1]} : vector<15x57xf32> to vector<15x1xf32>
    %640 = vector.extract_strided_slice %632 {offsets = [0, 28], sizes = [15, 1], strides = [1, 1]} : vector<15x57xf32> to vector<15x1xf32>
    %641 = vector.extract_strided_slice %632 {offsets = [0, 32], sizes = [15, 1], strides = [1, 1]} : vector<15x57xf32> to vector<15x1xf32>
    %642 = vector.extract_strided_slice %632 {offsets = [0, 36], sizes = [15, 1], strides = [1, 1]} : vector<15x57xf32> to vector<15x1xf32>
    %643 = vector.extract_strided_slice %632 {offsets = [0, 40], sizes = [15, 1], strides = [1, 1]} : vector<15x57xf32> to vector<15x1xf32>
    %644 = vector.extract_strided_slice %632 {offsets = [0, 44], sizes = [15, 1], strides = [1, 1]} : vector<15x57xf32> to vector<15x1xf32>
    %645 = vector.extract_strided_slice %632 {offsets = [0, 48], sizes = [15, 1], strides = [1, 1]} : vector<15x57xf32> to vector<15x1xf32>
    %646 = vector.extract_strided_slice %632 {offsets = [0, 52], sizes = [15, 1], strides = [1, 1]} : vector<15x57xf32> to vector<15x1xf32>
    %647 = vector.extract_strided_slice %632 {offsets = [0, 56], sizes = [15, 1], strides = [1, 1]} : vector<15x57xf32> to vector<15x1xf32>
    %648 = tpu.concatenate %633, %634, %635, %636, %637, %638, %639, %640, %641, %642, %643, %644, %645, %646, %647 in 1 : vector<15x1xf32>, vector<15x1xf32>, vector<15x1xf32>, vector<15x1xf32>, vector<15x1xf32>, vector<15x1xf32>, vector<15x1xf32>, vector<15x1xf32>, vector<15x1xf32>, vector<15x1xf32>, vector<15x1xf32>, vector<15x1xf32>, vector<15x1xf32>, vector<15x1xf32>, vector<15x1xf32> -> vector<15x15xf32>
    %c0_526 = arith.constant 0 : index
    %c0_527 = arith.constant 0 : index
    %649 = vector.load %arg7[%c0_526, %c0_527] : memref<15x15xf32, #tpu.memory_space<vmem>>, vector<15x15xf32>
    tpu.vector_store %arg7[%c0_526, %c0_527], %648 {strides = array<i32>} : memref<15x15xf32, #tpu.memory_space<vmem>>, vector<15x15xf32>,
    %cst_528 = arith.constant 0.000000e+00 : f32
    %650 = vector.broadcast %cst_528 : f32 to vector<7x13xf32>
    %c0_529 = arith.constant 0 : index
    %c0_530 = arith.constant 0 : index
    %651 = vector.load %arg7[%c0_529, %c0_530] : memref<15x15xf32, #tpu.memory_space<vmem>>, vector<15x13xf32>
    %c0_531 = arith.constant 0 : index
    %c0_532 = arith.constant 0 : index
    %652 = vector.load %arg11[%c0_531, %c0_532] : memref<67x57xf32, #tpu.memory_space<vmem>>, vector<15x13xf32>
    tpu.vector_store %arg11[%c0_531, %c0_532], %651 {strides = array<i32>} : memref<67x57xf32, #tpu.memory_space<vmem>>, vector<15x13xf32>,
    %c0_533 = arith.constant 0 : index
    %c0_534 = arith.constant 0 : index
    %653 = tpu.strided_load %arg11[%c0_533, %c0_534] {strides = array<i32: 2, 1>} : memref<67x57xf32, #tpu.memory_space<vmem>>, vector<7x13xf32>
    %654 = arith.addf %650, %653 : vector<7x13xf32>
    %c1_535 = arith.constant 1 : index
    %c0_536 = arith.constant 0 : index
    %655 = tpu.strided_load %arg11[%c1_535, %c0_536] {strides = array<i32: 2, 1>} : memref<67x57xf32, #tpu.memory_space<vmem>>, vector<7x13xf32>
    %656 = arith.addf %654, %655 : vector<7x13xf32>
    %c2_537 = arith.constant 2 : index
    %c0_538 = arith.constant 0 : index
    %657 = tpu.strided_load %arg11[%c2_537, %c0_538] {strides = array<i32: 2, 1>} : memref<67x57xf32, #tpu.memory_space<vmem>>, vector<7x13xf32>
    %658 = arith.addf %656, %657 : vector<7x13xf32>
    %c0_539 = arith.constant 0 : index
    %c1_540 = arith.constant 1 : index
    %659 = vector.load %arg7[%c0_539, %c1_540] : memref<15x15xf32, #tpu.memory_space<vmem>>, vector<15x13xf32>
    %c0_541 = arith.constant 0 : index
    %c0_542 = arith.constant 0 : index
    %660 = vector.load %arg11[%c0_541, %c0_542] : memref<67x57xf32, #tpu.memory_space<vmem>>, vector<15x13xf32>
    tpu.vector_store %arg11[%c0_541, %c0_542], %659 {strides = array<i32>} : memref<67x57xf32, #tpu.memory_space<vmem>>, vector<15x13xf32>,
    %c0_543 = arith.constant 0 : index
    %c0_544 = arith.constant 0 : index
    %661 = tpu.strided_load %arg11[%c0_543, %c0_544] {strides = array<i32: 2, 1>} : memref<67x57xf32, #tpu.memory_space<vmem>>, vector<7x13xf32>
    %662 = arith.addf %658, %661 : vector<7x13xf32>
    %c1_545 = arith.constant 1 : index
    %c0_546 = arith.constant 0 : index
    %663 = tpu.strided_load %arg11[%c1_545, %c0_546] {strides = array<i32: 2, 1>} : memref<67x57xf32, #tpu.memory_space<vmem>>, vector<7x13xf32>
    %664 = arith.addf %662, %663 : vector<7x13xf32>
    %c2_547 = arith.constant 2 : index
    %c0_548 = arith.constant 0 : index
    %665 = tpu.strided_load %arg11[%c2_547, %c0_548] {strides = array<i32: 2, 1>} : memref<67x57xf32, #tpu.memory_space<vmem>>, vector<7x13xf32>
    %666 = arith.addf %664, %665 : vector<7x13xf32>
    %c0_549 = arith.constant 0 : index
    %c2_550 = arith.constant 2 : index
    %667 = vector.load %arg7[%c0_549, %c2_550] : memref<15x15xf32, #tpu.memory_space<vmem>>, vector<15x13xf32>
    %c0_551 = arith.constant 0 : index
    %c0_552 = arith.constant 0 : index
    %668 = vector.load %arg11[%c0_551, %c0_552] : memref<67x57xf32, #tpu.memory_space<vmem>>, vector<15x13xf32>
    tpu.vector_store %arg11[%c0_551, %c0_552], %667 {strides = array<i32>} : memref<67x57xf32, #tpu.memory_space<vmem>>, vector<15x13xf32>,
    %c0_553 = arith.constant 0 : index
    %c0_554 = arith.constant 0 : index
    %669 = tpu.strided_load %arg11[%c0_553, %c0_554] {strides = array<i32: 2, 1>} : memref<67x57xf32, #tpu.memory_space<vmem>>, vector<7x13xf32>
    %670 = arith.addf %666, %669 : vector<7x13xf32>
    %c1_555 = arith.constant 1 : index
    %c0_556 = arith.constant 0 : index
    %671 = tpu.strided_load %arg11[%c1_555, %c0_556] {strides = array<i32: 2, 1>} : memref<67x57xf32, #tpu.memory_space<vmem>>, vector<7x13xf32>
    %672 = arith.addf %670, %671 : vector<7x13xf32>
    %c2_557 = arith.constant 2 : index
    %c0_558 = arith.constant 0 : index
    %673 = tpu.strided_load %arg11[%c2_557, %c0_558] {strides = array<i32: 2, 1>} : memref<67x57xf32, #tpu.memory_space<vmem>>, vector<7x13xf32>
    %674 = arith.addf %672, %673 : vector<7x13xf32>
    %675 = vector.extract_strided_slice %674 {offsets = [0, 0], sizes = [7, 1], strides = [1, 1]} : vector<7x13xf32> to vector<7x1xf32>
    %676 = vector.extract_strided_slice %674 {offsets = [0, 2], sizes = [7, 1], strides = [1, 1]} : vector<7x13xf32> to vector<7x1xf32>
    %677 = vector.extract_strided_slice %674 {offsets = [0, 4], sizes = [7, 1], strides = [1, 1]} : vector<7x13xf32> to vector<7x1xf32>
    %678 = vector.extract_strided_slice %674 {offsets = [0, 6], sizes = [7, 1], strides = [1, 1]} : vector<7x13xf32> to vector<7x1xf32>
    %679 = vector.extract_strided_slice %674 {offsets = [0, 8], sizes = [7, 1], strides = [1, 1]} : vector<7x13xf32> to vector<7x1xf32>
    %680 = vector.extract_strided_slice %674 {offsets = [0, 10], sizes = [7, 1], strides = [1, 1]} : vector<7x13xf32> to vector<7x1xf32>
    %681 = vector.extract_strided_slice %674 {offsets = [0, 12], sizes = [7, 1], strides = [1, 1]} : vector<7x13xf32> to vector<7x1xf32>
    %682 = tpu.concatenate %675, %676, %677, %678, %679, %680, %681 in 1 : vector<7x1xf32>, vector<7x1xf32>, vector<7x1xf32>, vector<7x1xf32>, vector<7x1xf32>, vector<7x1xf32>, vector<7x1xf32> -> vector<7x7xf32>
    %cst_559 = arith.constant 0.111111112 : f32
    %683 = vector.broadcast %cst_559 : f32 to vector<7x7xf32>
    %684 = arith.mulf %682, %683 : vector<7x7xf32>
    %cst_560 = arith.constant 0.000000e+00 : f32
    %685 = vector.broadcast %cst_560 : f32 to vector<11x11xf32>
    %c0_561 = arith.constant 0 : index
    %c0_562 = arith.constant 0 : index
    %686 = vector.load %arg8[%c0_561, %c0_562] : memref<11x11xf32, #tpu.memory_space<vmem>>, vector<11x11xf32>
    tpu.vector_store %arg8[%c0_561, %c0_562], %685 {strides = array<i32>} : memref<11x11xf32, #tpu.memory_space<vmem>>, vector<11x11xf32>,
    %c2_563 = arith.constant 2 : index
    %c2_564 = arith.constant 2 : index
    %687 = vector.load %arg8[%c2_563, %c2_564] : memref<11x11xf32, #tpu.memory_space<vmem>>, vector<7x7xf32>
    tpu.vector_store %arg8[%c2_563, %c2_564], %684 {strides = array<i32>} : memref<11x11xf32, #tpu.memory_space<vmem>>, vector<7x7xf32>,
    %cst_565 = arith.constant 0.000000e+00 : f32
    %688 = vector.broadcast %cst_565 : f32 to vector<7x7xf32>
    %c0_566 = arith.constant 0 : index
    %c0_567 = arith.constant 0 : index
    %689 = vector.load %arg8[%c0_566, %c0_567] : memref<11x11xf32, #tpu.memory_space<vmem>>, vector<7x7xf32>
    %c0_568 = arith.constant 0 : index
    %c0_569 = arith.constant 0 : index
    %690 = memref.load %arg3[%c0_568, %c0_569] : memref<5x5xf32, #tpu.memory_space<smem>>
    %691 = vector.broadcast %690 : f32 to vector<7x7xf32>
    %692 = arith.mulf %691, %689 : vector<7x7xf32>
    %693 = arith.addf %688, %692 : vector<7x7xf32>
    %c0_570 = arith.constant 0 : index
    %c1_571 = arith.constant 1 : index
    %694 = vector.load %arg8[%c0_570, %c1_571] : memref<11x11xf32, #tpu.memory_space<vmem>>, vector<7x7xf32>
    %c0_572 = arith.constant 0 : index
    %c1_573 = arith.constant 1 : index
    %695 = memref.load %arg3[%c0_572, %c1_573] : memref<5x5xf32, #tpu.memory_space<smem>>
    %696 = vector.broadcast %695 : f32 to vector<7x7xf32>
    %697 = arith.mulf %696, %694 : vector<7x7xf32>
    %698 = arith.addf %693, %697 : vector<7x7xf32>
    %c0_574 = arith.constant 0 : index
    %c2_575 = arith.constant 2 : index
    %699 = vector.load %arg8[%c0_574, %c2_575] : memref<11x11xf32, #tpu.memory_space<vmem>>, vector<7x7xf32>
    %c0_576 = arith.constant 0 : index
    %c2_577 = arith.constant 2 : index
    %700 = memref.load %arg3[%c0_576, %c2_577] : memref<5x5xf32, #tpu.memory_space<smem>>
    %701 = vector.broadcast %700 : f32 to vector<7x7xf32>
    %702 = arith.mulf %701, %699 : vector<7x7xf32>
    %703 = arith.addf %698, %702 : vector<7x7xf32>
    %c0_578 = arith.constant 0 : index
    %c3_579 = arith.constant 3 : index
    %704 = vector.load %arg8[%c0_578, %c3_579] : memref<11x11xf32, #tpu.memory_space<vmem>>, vector<7x7xf32>
    %c0_580 = arith.constant 0 : index
    %c3_581 = arith.constant 3 : index
    %705 = memref.load %arg3[%c0_580, %c3_581] : memref<5x5xf32, #tpu.memory_space<smem>>
    %706 = vector.broadcast %705 : f32 to vector<7x7xf32>
    %707 = arith.mulf %706, %704 : vector<7x7xf32>
    %708 = arith.addf %703, %707 : vector<7x7xf32>
    %c0_582 = arith.constant 0 : index
    %c4_583 = arith.constant 4 : index
    %709 = vector.load %arg8[%c0_582, %c4_583] : memref<11x11xf32, #tpu.memory_space<vmem>>, vector<7x7xf32>
    %c0_584 = arith.constant 0 : index
    %c4_585 = arith.constant 4 : index
    %710 = memref.load %arg3[%c0_584, %c4_585] : memref<5x5xf32, #tpu.memory_space<smem>>
    %711 = vector.broadcast %710 : f32 to vector<7x7xf32>
    %712 = arith.mulf %711, %709 : vector<7x7xf32>
    %713 = arith.addf %708, %712 : vector<7x7xf32>
    %c1_586 = arith.constant 1 : index
    %c0_587 = arith.constant 0 : index
    %714 = vector.load %arg8[%c1_586, %c0_587] : memref<11x11xf32, #tpu.memory_space<vmem>>, vector<7x7xf32>
    %c1_588 = arith.constant 1 : index
    %c0_589 = arith.constant 0 : index
    %715 = memref.load %arg3[%c1_588, %c0_589] : memref<5x5xf32, #tpu.memory_space<smem>>
    %716 = vector.broadcast %715 : f32 to vector<7x7xf32>
    %717 = arith.mulf %716, %714 : vector<7x7xf32>
    %718 = arith.addf %713, %717 : vector<7x7xf32>
    %c1_590 = arith.constant 1 : index
    %c1_591 = arith.constant 1 : index
    %719 = vector.load %arg8[%c1_590, %c1_591] : memref<11x11xf32, #tpu.memory_space<vmem>>, vector<7x7xf32>
    %c1_592 = arith.constant 1 : index
    %c1_593 = arith.constant 1 : index
    %720 = memref.load %arg3[%c1_592, %c1_593] : memref<5x5xf32, #tpu.memory_space<smem>>
    %721 = vector.broadcast %720 : f32 to vector<7x7xf32>
    %722 = arith.mulf %721, %719 : vector<7x7xf32>
    %723 = arith.addf %718, %722 : vector<7x7xf32>
    %c1_594 = arith.constant 1 : index
    %c2_595 = arith.constant 2 : index
    %724 = vector.load %arg8[%c1_594, %c2_595] : memref<11x11xf32, #tpu.memory_space<vmem>>, vector<7x7xf32>
    %c1_596 = arith.constant 1 : index
    %c2_597 = arith.constant 2 : index
    %725 = memref.load %arg3[%c1_596, %c2_597] : memref<5x5xf32, #tpu.memory_space<smem>>
    %726 = vector.broadcast %725 : f32 to vector<7x7xf32>
    %727 = arith.mulf %726, %724 : vector<7x7xf32>
    %728 = arith.addf %723, %727 : vector<7x7xf32>
    %c1_598 = arith.constant 1 : index
    %c3_599 = arith.constant 3 : index
    %729 = vector.load %arg8[%c1_598, %c3_599] : memref<11x11xf32, #tpu.memory_space<vmem>>, vector<7x7xf32>
    %c1_600 = arith.constant 1 : index
    %c3_601 = arith.constant 3 : index
    %730 = memref.load %arg3[%c1_600, %c3_601] : memref<5x5xf32, #tpu.memory_space<smem>>
    %731 = vector.broadcast %730 : f32 to vector<7x7xf32>
    %732 = arith.mulf %731, %729 : vector<7x7xf32>
    %733 = arith.addf %728, %732 : vector<7x7xf32>
    %c1_602 = arith.constant 1 : index
    %c4_603 = arith.constant 4 : index
    %734 = vector.load %arg8[%c1_602, %c4_603] : memref<11x11xf32, #tpu.memory_space<vmem>>, vector<7x7xf32>
    %c1_604 = arith.constant 1 : index
    %c4_605 = arith.constant 4 : index
    %735 = memref.load %arg3[%c1_604, %c4_605] : memref<5x5xf32, #tpu.memory_space<smem>>
    %736 = vector.broadcast %735 : f32 to vector<7x7xf32>
    %737 = arith.mulf %736, %734 : vector<7x7xf32>
    %738 = arith.addf %733, %737 : vector<7x7xf32>
    %c2_606 = arith.constant 2 : index
    %c0_607 = arith.constant 0 : index
    %739 = vector.load %arg8[%c2_606, %c0_607] : memref<11x11xf32, #tpu.memory_space<vmem>>, vector<7x7xf32>
    %c2_608 = arith.constant 2 : index
    %c0_609 = arith.constant 0 : index
    %740 = memref.load %arg3[%c2_608, %c0_609] : memref<5x5xf32, #tpu.memory_space<smem>>
    %741 = vector.broadcast %740 : f32 to vector<7x7xf32>
    %742 = arith.mulf %741, %739 : vector<7x7xf32>
    %743 = arith.addf %738, %742 : vector<7x7xf32>
    %c2_610 = arith.constant 2 : index
    %c1_611 = arith.constant 1 : index
    %744 = vector.load %arg8[%c2_610, %c1_611] : memref<11x11xf32, #tpu.memory_space<vmem>>, vector<7x7xf32>
    %c2_612 = arith.constant 2 : index
    %c1_613 = arith.constant 1 : index
    %745 = memref.load %arg3[%c2_612, %c1_613] : memref<5x5xf32, #tpu.memory_space<smem>>
    %746 = vector.broadcast %745 : f32 to vector<7x7xf32>
    %747 = arith.mulf %746, %744 : vector<7x7xf32>
    %748 = arith.addf %743, %747 : vector<7x7xf32>
    %c2_614 = arith.constant 2 : index
    %c2_615 = arith.constant 2 : index
    %749 = vector.load %arg8[%c2_614, %c2_615] : memref<11x11xf32, #tpu.memory_space<vmem>>, vector<7x7xf32>
    %c2_616 = arith.constant 2 : index
    %c2_617 = arith.constant 2 : index
    %750 = memref.load %arg3[%c2_616, %c2_617] : memref<5x5xf32, #tpu.memory_space<smem>>
    %751 = vector.broadcast %750 : f32 to vector<7x7xf32>
    %752 = arith.mulf %751, %749 : vector<7x7xf32>
    %753 = arith.addf %748, %752 : vector<7x7xf32>
    %c2_618 = arith.constant 2 : index
    %c3_619 = arith.constant 3 : index
    %754 = vector.load %arg8[%c2_618, %c3_619] : memref<11x11xf32, #tpu.memory_space<vmem>>, vector<7x7xf32>
    %c2_620 = arith.constant 2 : index
    %c3_621 = arith.constant 3 : index
    %755 = memref.load %arg3[%c2_620, %c3_621] : memref<5x5xf32, #tpu.memory_space<smem>>
    %756 = vector.broadcast %755 : f32 to vector<7x7xf32>
    %757 = arith.mulf %756, %754 : vector<7x7xf32>
    %758 = arith.addf %753, %757 : vector<7x7xf32>
    %c2_622 = arith.constant 2 : index
    %c4_623 = arith.constant 4 : index
    %759 = vector.load %arg8[%c2_622, %c4_623] : memref<11x11xf32, #tpu.memory_space<vmem>>, vector<7x7xf32>
    %c2_624 = arith.constant 2 : index
    %c4_625 = arith.constant 4 : index
    %760 = memref.load %arg3[%c2_624, %c4_625] : memref<5x5xf32, #tpu.memory_space<smem>>
    %761 = vector.broadcast %760 : f32 to vector<7x7xf32>
    %762 = arith.mulf %761, %759 : vector<7x7xf32>
    %763 = arith.addf %758, %762 : vector<7x7xf32>
    %c3_626 = arith.constant 3 : index
    %c0_627 = arith.constant 0 : index
    %764 = vector.load %arg8[%c3_626, %c0_627] : memref<11x11xf32, #tpu.memory_space<vmem>>, vector<7x7xf32>
    %c3_628 = arith.constant 3 : index
    %c0_629 = arith.constant 0 : index
    %765 = memref.load %arg3[%c3_628, %c0_629] : memref<5x5xf32, #tpu.memory_space<smem>>
    %766 = vector.broadcast %765 : f32 to vector<7x7xf32>
    %767 = arith.mulf %766, %764 : vector<7x7xf32>
    %768 = arith.addf %763, %767 : vector<7x7xf32>
    %c3_630 = arith.constant 3 : index
    %c1_631 = arith.constant 1 : index
    %769 = vector.load %arg8[%c3_630, %c1_631] : memref<11x11xf32, #tpu.memory_space<vmem>>, vector<7x7xf32>
    %c3_632 = arith.constant 3 : index
    %c1_633 = arith.constant 1 : index
    %770 = memref.load %arg3[%c3_632, %c1_633] : memref<5x5xf32, #tpu.memory_space<smem>>
    %771 = vector.broadcast %770 : f32 to vector<7x7xf32>
    %772 = arith.mulf %771, %769 : vector<7x7xf32>
    %773 = arith.addf %768, %772 : vector<7x7xf32>
    %c3_634 = arith.constant 3 : index
    %c2_635 = arith.constant 2 : index
    %774 = vector.load %arg8[%c3_634, %c2_635] : memref<11x11xf32, #tpu.memory_space<vmem>>, vector<7x7xf32>
    %c3_636 = arith.constant 3 : index
    %c2_637 = arith.constant 2 : index
    %775 = memref.load %arg3[%c3_636, %c2_637] : memref<5x5xf32, #tpu.memory_space<smem>>
    %776 = vector.broadcast %775 : f32 to vector<7x7xf32>
    %777 = arith.mulf %776, %774 : vector<7x7xf32>
    %778 = arith.addf %773, %777 : vector<7x7xf32>
    %c3_638 = arith.constant 3 : index
    %c3_639 = arith.constant 3 : index
    %779 = vector.load %arg8[%c3_638, %c3_639] : memref<11x11xf32, #tpu.memory_space<vmem>>, vector<7x7xf32>
    %c3_640 = arith.constant 3 : index
    %c3_641 = arith.constant 3 : index
    %780 = memref.load %arg3[%c3_640, %c3_641] : memref<5x5xf32, #tpu.memory_space<smem>>
    %781 = vector.broadcast %780 : f32 to vector<7x7xf32>
    %782 = arith.mulf %781, %779 : vector<7x7xf32>
    %783 = arith.addf %778, %782 : vector<7x7xf32>
    %c3_642 = arith.constant 3 : index
    %c4_643 = arith.constant 4 : index
    %784 = vector.load %arg8[%c3_642, %c4_643] : memref<11x11xf32, #tpu.memory_space<vmem>>, vector<7x7xf32>
    %c3_644 = arith.constant 3 : index
    %c4_645 = arith.constant 4 : index
    %785 = memref.load %arg3[%c3_644, %c4_645] : memref<5x5xf32, #tpu.memory_space<smem>>
    %786 = vector.broadcast %785 : f32 to vector<7x7xf32>
    %787 = arith.mulf %786, %784 : vector<7x7xf32>
    %788 = arith.addf %783, %787 : vector<7x7xf32>
    %c4_646 = arith.constant 4 : index
    %c0_647 = arith.constant 0 : index
    %789 = vector.load %arg8[%c4_646, %c0_647] : memref<11x11xf32, #tpu.memory_space<vmem>>, vector<7x7xf32>
    %c4_648 = arith.constant 4 : index
    %c0_649 = arith.constant 0 : index
    %790 = memref.load %arg3[%c4_648, %c0_649] : memref<5x5xf32, #tpu.memory_space<smem>>
    %791 = vector.broadcast %790 : f32 to vector<7x7xf32>
    %792 = arith.mulf %791, %789 : vector<7x7xf32>
    %793 = arith.addf %788, %792 : vector<7x7xf32>
    %c4_650 = arith.constant 4 : index
    %c1_651 = arith.constant 1 : index
    %794 = vector.load %arg8[%c4_650, %c1_651] : memref<11x11xf32, #tpu.memory_space<vmem>>, vector<7x7xf32>
    %c4_652 = arith.constant 4 : index
    %c1_653 = arith.constant 1 : index
    %795 = memref.load %arg3[%c4_652, %c1_653] : memref<5x5xf32, #tpu.memory_space<smem>>
    %796 = vector.broadcast %795 : f32 to vector<7x7xf32>
    %797 = arith.mulf %796, %794 : vector<7x7xf32>
    %798 = arith.addf %793, %797 : vector<7x7xf32>
    %c4_654 = arith.constant 4 : index
    %c2_655 = arith.constant 2 : index
    %799 = vector.load %arg8[%c4_654, %c2_655] : memref<11x11xf32, #tpu.memory_space<vmem>>, vector<7x7xf32>
    %c4_656 = arith.constant 4 : index
    %c2_657 = arith.constant 2 : index
    %800 = memref.load %arg3[%c4_656, %c2_657] : memref<5x5xf32, #tpu.memory_space<smem>>
    %801 = vector.broadcast %800 : f32 to vector<7x7xf32>
    %802 = arith.mulf %801, %799 : vector<7x7xf32>
    %803 = arith.addf %798, %802 : vector<7x7xf32>
    %c4_658 = arith.constant 4 : index
    %c3_659 = arith.constant 3 : index
    %804 = vector.load %arg8[%c4_658, %c3_659] : memref<11x11xf32, #tpu.memory_space<vmem>>, vector<7x7xf32>
    %c4_660 = arith.constant 4 : index
    %c3_661 = arith.constant 3 : index
    %805 = memref.load %arg3[%c4_660, %c3_661] : memref<5x5xf32, #tpu.memory_space<smem>>
    %806 = vector.broadcast %805 : f32 to vector<7x7xf32>
    %807 = arith.mulf %806, %804 : vector<7x7xf32>
    %808 = arith.addf %803, %807 : vector<7x7xf32>
    %c4_662 = arith.constant 4 : index
    %c4_663 = arith.constant 4 : index
    %809 = vector.load %arg8[%c4_662, %c4_663] : memref<11x11xf32, #tpu.memory_space<vmem>>, vector<7x7xf32>
    %c4_664 = arith.constant 4 : index
    %c4_665 = arith.constant 4 : index
    %810 = memref.load %arg3[%c4_664, %c4_665] : memref<5x5xf32, #tpu.memory_space<smem>>
    %811 = vector.broadcast %810 : f32 to vector<7x7xf32>
    %812 = arith.mulf %811, %809 : vector<7x7xf32>
    %813 = arith.addf %808, %812 : vector<7x7xf32>
    %c0_666 = arith.constant 0 : index
    %c0_667 = arith.constant 0 : index
    %814 = vector.load %arg9[%c0_666, %c0_667] : memref<7x7xf32, #tpu.memory_space<vmem>>, vector<7x7xf32>
    tpu.vector_store %arg9[%c0_666, %c0_667], %813 {strides = array<i32>} : memref<7x7xf32, #tpu.memory_space<vmem>>, vector<7x7xf32>,
    %cst_668 = arith.constant 0.000000e+00 : f32
    %815 = vector.broadcast %cst_668 : f32 to vector<3x5xf32>
    %c0_669 = arith.constant 0 : index
    %c0_670 = arith.constant 0 : index
    %816 = vector.load %arg9[%c0_669, %c0_670] : memref<7x7xf32, #tpu.memory_space<vmem>>, vector<7x5xf32>
    %c0_671 = arith.constant 0 : index
    %c0_672 = arith.constant 0 : index
    %817 = vector.load %arg11[%c0_671, %c0_672] : memref<67x57xf32, #tpu.memory_space<vmem>>, vector<7x5xf32>
    tpu.vector_store %arg11[%c0_671, %c0_672], %816 {strides = array<i32>} : memref<67x57xf32, #tpu.memory_space<vmem>>, vector<7x5xf32>,
    %c0_673 = arith.constant 0 : index
    %c0_674 = arith.constant 0 : index
    %818 = tpu.strided_load %arg11[%c0_673, %c0_674] {strides = array<i32: 2, 1>} : memref<67x57xf32, #tpu.memory_space<vmem>>, vector<3x5xf32>
    %819 = arith.addf %815, %818 : vector<3x5xf32>
    %c1_675 = arith.constant 1 : index
    %c0_676 = arith.constant 0 : index
    %820 = tpu.strided_load %arg11[%c1_675, %c0_676] {strides = array<i32: 2, 1>} : memref<67x57xf32, #tpu.memory_space<vmem>>, vector<3x5xf32>
    %821 = arith.addf %819, %820 : vector<3x5xf32>
    %c2_677 = arith.constant 2 : index
    %c0_678 = arith.constant 0 : index
    %822 = tpu.strided_load %arg11[%c2_677, %c0_678] {strides = array<i32: 2, 1>} : memref<67x57xf32, #tpu.memory_space<vmem>>, vector<3x5xf32>
    %823 = arith.addf %821, %822 : vector<3x5xf32>
    %c0_679 = arith.constant 0 : index
    %c1_680 = arith.constant 1 : index
    %824 = vector.load %arg9[%c0_679, %c1_680] : memref<7x7xf32, #tpu.memory_space<vmem>>, vector<7x5xf32>
    %c0_681 = arith.constant 0 : index
    %c0_682 = arith.constant 0 : index
    %825 = vector.load %arg11[%c0_681, %c0_682] : memref<67x57xf32, #tpu.memory_space<vmem>>, vector<7x5xf32>
    tpu.vector_store %arg11[%c0_681, %c0_682], %824 {strides = array<i32>} : memref<67x57xf32, #tpu.memory_space<vmem>>, vector<7x5xf32>,
    %c0_683 = arith.constant 0 : index
    %c0_684 = arith.constant 0 : index
    %826 = tpu.strided_load %arg11[%c0_683, %c0_684] {strides = array<i32: 2, 1>} : memref<67x57xf32, #tpu.memory_space<vmem>>, vector<3x5xf32>
    %827 = arith.addf %823, %826 : vector<3x5xf32>
    %c1_685 = arith.constant 1 : index
    %c0_686 = arith.constant 0 : index
    %828 = tpu.strided_load %arg11[%c1_685, %c0_686] {strides = array<i32: 2, 1>} : memref<67x57xf32, #tpu.memory_space<vmem>>, vector<3x5xf32>
    %829 = arith.addf %827, %828 : vector<3x5xf32>
    %c2_687 = arith.constant 2 : index
    %c0_688 = arith.constant 0 : index
    %830 = tpu.strided_load %arg11[%c2_687, %c0_688] {strides = array<i32: 2, 1>} : memref<67x57xf32, #tpu.memory_space<vmem>>, vector<3x5xf32>
    %831 = arith.addf %829, %830 : vector<3x5xf32>
    %c0_689 = arith.constant 0 : index
    %c2_690 = arith.constant 2 : index
    %832 = vector.load %arg9[%c0_689, %c2_690] : memref<7x7xf32, #tpu.memory_space<vmem>>, vector<7x5xf32>
    %c0_691 = arith.constant 0 : index
    %c0_692 = arith.constant 0 : index
    %833 = vector.load %arg11[%c0_691, %c0_692] : memref<67x57xf32, #tpu.memory_space<vmem>>, vector<7x5xf32>
    tpu.vector_store %arg11[%c0_691, %c0_692], %832 {strides = array<i32>} : memref<67x57xf32, #tpu.memory_space<vmem>>, vector<7x5xf32>,
    %c0_693 = arith.constant 0 : index
    %c0_694 = arith.constant 0 : index
    %834 = tpu.strided_load %arg11[%c0_693, %c0_694] {strides = array<i32: 2, 1>} : memref<67x57xf32, #tpu.memory_space<vmem>>, vector<3x5xf32>
    %835 = arith.addf %831, %834 : vector<3x5xf32>
    %c1_695 = arith.constant 1 : index
    %c0_696 = arith.constant 0 : index
    %836 = tpu.strided_load %arg11[%c1_695, %c0_696] {strides = array<i32: 2, 1>} : memref<67x57xf32, #tpu.memory_space<vmem>>, vector<3x5xf32>
    %837 = arith.addf %835, %836 : vector<3x5xf32>
    %c2_697 = arith.constant 2 : index
    %c0_698 = arith.constant 0 : index
    %838 = tpu.strided_load %arg11[%c2_697, %c0_698] {strides = array<i32: 2, 1>} : memref<67x57xf32, #tpu.memory_space<vmem>>, vector<3x5xf32>
    %839 = arith.addf %837, %838 : vector<3x5xf32>
    %840 = vector.extract_strided_slice %839 {offsets = [0, 0], sizes = [3, 1], strides = [1, 1]} : vector<3x5xf32> to vector<3x1xf32>
    %841 = vector.extract_strided_slice %839 {offsets = [0, 2], sizes = [3, 1], strides = [1, 1]} : vector<3x5xf32> to vector<3x1xf32>
    %842 = vector.extract_strided_slice %839 {offsets = [0, 4], sizes = [3, 1], strides = [1, 1]} : vector<3x5xf32> to vector<3x1xf32>
    %843 = tpu.concatenate %840, %841, %842 in 1 : vector<3x1xf32>, vector<3x1xf32>, vector<3x1xf32> -> vector<3x3xf32>
    %cst_699 = arith.constant 0.111111112 : f32
    %844 = vector.broadcast %cst_699 : f32 to vector<3x3xf32>
    %845 = arith.mulf %843, %844 : vector<3x3xf32>
    %cst_700 = arith.constant 0.000000e+00 : f32
    %846 = vector.broadcast %cst_700 : f32 to vector<5x5xf32>
    %c0_701 = arith.constant 0 : index
    %c0_702 = arith.constant 0 : index
    %847 = vector.load %arg10[%c0_701, %c0_702] : memref<5x5xf32, #tpu.memory_space<vmem>>, vector<5x5xf32>
    tpu.vector_store %arg10[%c0_701, %c0_702], %846 {strides = array<i32>} : memref<5x5xf32, #tpu.memory_space<vmem>>, vector<5x5xf32>,
    %c1_703 = arith.constant 1 : index
    %c1_704 = arith.constant 1 : index
    %848 = vector.load %arg10[%c1_703, %c1_704] : memref<5x5xf32, #tpu.memory_space<vmem>>, vector<3x3xf32>
    tpu.vector_store %arg10[%c1_703, %c1_704], %845 {strides = array<i32>} : memref<5x5xf32, #tpu.memory_space<vmem>>, vector<3x3xf32>,
    %cst_705 = arith.constant 0.000000e+00 : f32
    %849 = vector.broadcast %cst_705 : f32 to vector<3x3xf32>
    %c0_706 = arith.constant 0 : index
    %c0_707 = arith.constant 0 : index
    %850 = vector.load %arg10[%c0_706, %c0_707] : memref<5x5xf32, #tpu.memory_space<vmem>>, vector<3x3xf32>
    %c0_708 = arith.constant 0 : index
    %c0_709 = arith.constant 0 : index
    %851 = memref.load %arg4[%c0_708, %c0_709] : memref<3x3xf32, #tpu.memory_space<smem>>
    %852 = vector.broadcast %851 : f32 to vector<3x3xf32>
    %853 = arith.mulf %852, %850 : vector<3x3xf32>
    %854 = arith.addf %849, %853 : vector<3x3xf32>
    %c0_710 = arith.constant 0 : index
    %c1_711 = arith.constant 1 : index
    %855 = vector.load %arg10[%c0_710, %c1_711] : memref<5x5xf32, #tpu.memory_space<vmem>>, vector<3x3xf32>
    %c0_712 = arith.constant 0 : index
    %c1_713 = arith.constant 1 : index
    %856 = memref.load %arg4[%c0_712, %c1_713] : memref<3x3xf32, #tpu.memory_space<smem>>
    %857 = vector.broadcast %856 : f32 to vector<3x3xf32>
    %858 = arith.mulf %857, %855 : vector<3x3xf32>
    %859 = arith.addf %854, %858 : vector<3x3xf32>
    %c0_714 = arith.constant 0 : index
    %c2_715 = arith.constant 2 : index
    %860 = vector.load %arg10[%c0_714, %c2_715] : memref<5x5xf32, #tpu.memory_space<vmem>>, vector<3x3xf32>
    %c0_716 = arith.constant 0 : index
    %c2_717 = arith.constant 2 : index
    %861 = memref.load %arg4[%c0_716, %c2_717] : memref<3x3xf32, #tpu.memory_space<smem>>
    %862 = vector.broadcast %861 : f32 to vector<3x3xf32>
    %863 = arith.mulf %862, %860 : vector<3x3xf32>
    %864 = arith.addf %859, %863 : vector<3x3xf32>
    %c1_718 = arith.constant 1 : index
    %c0_719 = arith.constant 0 : index
    %865 = vector.load %arg10[%c1_718, %c0_719] : memref<5x5xf32, #tpu.memory_space<vmem>>, vector<3x3xf32>
    %c1_720 = arith.constant 1 : index
    %c0_721 = arith.constant 0 : index
    %866 = memref.load %arg4[%c1_720, %c0_721] : memref<3x3xf32, #tpu.memory_space<smem>>
    %867 = vector.broadcast %866 : f32 to vector<3x3xf32>
    %868 = arith.mulf %867, %865 : vector<3x3xf32>
    %869 = arith.addf %864, %868 : vector<3x3xf32>
    %c1_722 = arith.constant 1 : index
    %c1_723 = arith.constant 1 : index
    %870 = vector.load %arg10[%c1_722, %c1_723] : memref<5x5xf32, #tpu.memory_space<vmem>>, vector<3x3xf32>
    %c1_724 = arith.constant 1 : index
    %c1_725 = arith.constant 1 : index
    %871 = memref.load %arg4[%c1_724, %c1_725] : memref<3x3xf32, #tpu.memory_space<smem>>
    %872 = vector.broadcast %871 : f32 to vector<3x3xf32>
    %873 = arith.mulf %872, %870 : vector<3x3xf32>
    %874 = arith.addf %869, %873 : vector<3x3xf32>
    %c1_726 = arith.constant 1 : index
    %c2_727 = arith.constant 2 : index
    %875 = vector.load %arg10[%c1_726, %c2_727] : memref<5x5xf32, #tpu.memory_space<vmem>>, vector<3x3xf32>
    %c1_728 = arith.constant 1 : index
    %c2_729 = arith.constant 2 : index
    %876 = memref.load %arg4[%c1_728, %c2_729] : memref<3x3xf32, #tpu.memory_space<smem>>
    %877 = vector.broadcast %876 : f32 to vector<3x3xf32>
    %878 = arith.mulf %877, %875 : vector<3x3xf32>
    %879 = arith.addf %874, %878 : vector<3x3xf32>
    %c2_730 = arith.constant 2 : index
    %c0_731 = arith.constant 0 : index
    %880 = vector.load %arg10[%c2_730, %c0_731] : memref<5x5xf32, #tpu.memory_space<vmem>>, vector<3x3xf32>
    %c2_732 = arith.constant 2 : index
    %c0_733 = arith.constant 0 : index
    %881 = memref.load %arg4[%c2_732, %c0_733] : memref<3x3xf32, #tpu.memory_space<smem>>
    %882 = vector.broadcast %881 : f32 to vector<3x3xf32>
    %883 = arith.mulf %882, %880 : vector<3x3xf32>
    %884 = arith.addf %879, %883 : vector<3x3xf32>
    %c2_734 = arith.constant 2 : index
    %c1_735 = arith.constant 1 : index
    %885 = vector.load %arg10[%c2_734, %c1_735] : memref<5x5xf32, #tpu.memory_space<vmem>>, vector<3x3xf32>
    %c2_736 = arith.constant 2 : index
    %c1_737 = arith.constant 1 : index
    %886 = memref.load %arg4[%c2_736, %c1_737] : memref<3x3xf32, #tpu.memory_space<smem>>
    %887 = vector.broadcast %886 : f32 to vector<3x3xf32>
    %888 = arith.mulf %887, %885 : vector<3x3xf32>
    %889 = arith.addf %884, %888 : vector<3x3xf32>
    %c2_738 = arith.constant 2 : index
    %c2_739 = arith.constant 2 : index
    %890 = vector.load %arg10[%c2_738, %c2_739] : memref<5x5xf32, #tpu.memory_space<vmem>>, vector<3x3xf32>
    %c2_740 = arith.constant 2 : index
    %c2_741 = arith.constant 2 : index
    %891 = memref.load %arg4[%c2_740, %c2_741] : memref<3x3xf32, #tpu.memory_space<smem>>
    %892 = vector.broadcast %891 : f32 to vector<3x3xf32>
    %893 = arith.mulf %892, %890 : vector<3x3xf32>
    %894 = arith.addf %889, %893 : vector<3x3xf32>
    %c0_742 = arith.constant 0 : index
    %c0_743 = arith.constant 0 : index
    %c0_744 = arith.constant 0 : index
    %c0_745 = arith.constant 0 : index
    %895 = vector.load %arg5[%c0_742, %c0_743, %c0_744, %c0_745] : memref<1x1x3x3xf32, #tpu.memory_space<vmem>>, vector<1x1x3x3xf32>
    %896 = vector.shape_cast %895 : vector<1x1x3x3xf32> to vector<3x3xf32>
    %897 = vector.shape_cast %894 : vector<3x3xf32> to vector<1x1x3x3xf32>
    tpu.vector_store %arg5[%c0_742, %c0_743, %c0_744, %c0_745], %897 {strides = array<i32>} : memref<1x1x3x3xf32, #tpu.memory_space<vmem>>, vector<1x1x3x3xf32>,
    return
  }
  func.func @transform_0(%arg0: i32) -> (i32, i32, i32, i32) {
    %c0_i32 = arith.constant 0 : i32
    %c0_i32_0 = arith.constant 0 : i32
    %c0_i32_1 = arith.constant 0 : i32
    %c0_i32_2 = arith.constant 0 : i32
    return %arg0, %c0_i32, %c0_i32_0, %c0_i32_1 : i32, i32, i32, i32
  }
  func.func @transform_1(%arg0: i32) -> (i32, i32) {
    %c0_i32 = arith.constant 0 : i32
    %c0_i32_0 = arith.constant 0 : i32
    %c0_i32_1 = arith.constant 0 : i32
    return %c0_i32, %c0_i32_0 : i32, i32
  }
  func.func @transform_2(%arg0: i32) -> (i32, i32) {
    %c0_i32 = arith.constant 0 : i32
    %c0_i32_0 = arith.constant 0 : i32
    %c0_i32_1 = arith.constant 0 : i32
    return %c0_i32, %c0_i32_0 : i32, i32
  }
  func.func @transform_3(%arg0: i32) -> (i32, i32) {
    %c0_i32 = arith.constant 0 : i32
    %c0_i32_0 = arith.constant 0 : i32
    %c0_i32_1 = arith.constant 0 : i32
    return %c0_i32, %c0_i32_0 : i32, i32
  }
  func.func @transform_4(%arg0: i32) -> (i32, i32, i32, i32) {
    %c0_i32 = arith.constant 0 : i32
    %c0_i32_0 = arith.constant 0 : i32
    %c0_i32_1 = arith.constant 0 : i32
    %c0_i32_2 = arith.constant 0 : i32
    return %arg0, %c0_i32, %c0_i32_0, %c0_i32_1 : i32, i32, i32, i32
  }
}

</mosaic_0001>

<bundles_post_ra>
// kernel: my_alexnet_map_forward.1
= control target key start
LH: loop header
LB: loop body
LE: loop exit
PB: predicated region body
PF: predicated region fallthrough
CT: control target
= control target key end

     0   :  { %9 = vsyncpa [#allocation9], 0  ;;  %s4329_s0 = inlined_call_operand.vmem [shape: f32[2,1,63,63], index: 0, kind: input, shape index: {}]   ;;  %s4330_s1 = inlined_call_operand.vmem [shape: f32[11,11], index: 1, kind: input, shape index: {}]   ;;  %s4331_s2 = inlined_call_operand.vmem [shape: f32[5,5], index: 2, kind: input, shape index: {}]   ;;  %s4332_s3 = inlined_call_operand.vmem [shape: f32[3,3], index: 3, kind: input, shape index: {}]   ;;  %s4333_s4 = inlined_call_operand.vmem [shape: f32[2,1,3,3], index: 4, kind: output, shape index: {}]  }
   0x1   :  { %10 = vsyncpa [#allocation11], 0  ;;  %s2797_s15 = smov 0  }
   0x2 LB: > { %s162_s18 = sshll.u32 %s4331_s2, 4  ;;  %s2806_s19 = sadd.s32 4294967295, %s2741_s15   ;;  %s2741_s15 = sphi %s2797_s15, %s16_s15   ;;  %s163_s18 = int_to_ptr.vmem [resolvable:$true] %s162_s18 }
   0x3   : > { %p2450_p0 = scmp.ge.s32.totalorder %s2741_s15, 1  ;;  %p136_p1 = scmp.lt.s32.totalorder %s2741_s15, 3 }
   0x4   : > { %p2639_p2 = scmp.eq.s32.totalorder %s2806_s19, 0  ;;  %s148_s23 = sshll.u32 %s4330_s1, 4  ;;  %s2820_s23 = int_to_ptr.vmem [resolvable:$true] %s148_s23 }
   0x5   : > { %p2811_p3 = pnand %p2450_p0, %p136_p1  ;;  %s173_s26 = sshll.u32 %s4332_s3, 4  ;;  %s2831_s26 = int_to_ptr.vmem [resolvable:$true] %s173_s26 }
   0x6   : > { %s2682_s28 = scalar_lea.vmem %s163_s18, 128  ;;  %p2690_p10 = scmp.lt.s32.totalorder %s163_s18, %s163_s18 }
   0x7   : > { %p2629_p4 = pneg %p2811_p3  ;;  %p2683_p6 = scmp.ne.s32.totalorder %s163_s18, %s2682_s28 }
   0x8   : > { %p2691_p11 = scmp.lt.s32.totalorder %s2682_s28, %s2682_s28 }
   0x9   : > { %p2827_p5 = pnand %p2639_p2, %p2629_p4 }
   0xa   : > { %p2692_p12 = por %p2691_p11, %p2690_p10 }
   0xb   : > { %p2684_p7 = pneg %p2827_p5 }
   0xd   : > { %p2685_p8 = pnand %p2684_p7, %p2683_p6 }
   0xf   : > { %p2686_p9 = pneg %p2685_p8 }
  0x11   : > { %p2693_p13 = pnand %p2692_p12, %p2686_p9 }
  0x13   : > { %2696 = shalt.err (!%p2693_p13)
}
  0x14   : > { %s2743_s29 = smov [#allocation10]   ;;  %s2697_s30 = scalar_lea.vmem %s2820_s23, 256 }
  0x15   : > { %2635 = dma.vmem_to_smem (!%p2827_p5), %s163_s18, 128, %s2743_s29, [#allocation11]  }
  0x16   : > { %p2698_p0 = scmp.ne.s32.totalorder %s2820_s23, %s2697_s30  ;;  %p2705_p6 = scmp.lt.s32.totalorder %s2820_s23, %s2820_s23 }
  0x17   : > { %p2706_p8 = scmp.lt.s32.totalorder %s2697_s30, %s2697_s30 }
  0x18   : > { %p2700_p1 = pnand %p2698_p0, %p2684_p7 }
  0x19   : > { %p2707_p10 = por %p2706_p8, %p2705_p6 }
  0x1a   : > { %p2701_p4 = pneg %p2700_p1 }
  0x1c   : > { %p2708_p9 = pnand %p2707_p10, %p2701_p4 }
  0x1e   : > { %2711 = shalt.err (!%p2708_p9)
}
  0x1f   : > { %s2744_s5 = smov [#allocation8]   ;;  %s2745_s6 = smov 128  }
  0x20   : > { %s2746_s7 = smov 8   ;;  %s2712_s8 = scalar_lea.vmem %s2831_s26, 64 }
  0x21   : > { %2632 = dma.vmem_to_smem (!%p2827_p5), %s2820_s23, 256, %s2744_s5, [#allocation9], %s2745_s6, %s2745_s6, %s2746_s7  }
  0x22   : > { %p2713_p11 = scmp.ne.s32.totalorder %s2831_s26, %s2712_s8  ;;  %p2720_p0 = scmp.lt.s32.totalorder %s2831_s26, %s2831_s26 }
  0x23   : > { %p2721_p1 = scmp.lt.s32.totalorder %s2712_s8, %s2712_s8 }
  0x24   : > { %p2715_p12 = pnand %p2713_p11, %p2684_p7 }
  0x25   : > { %p2722_p4 = por %p2721_p1, %p2720_p0 }
  0x26   : > { %p2716_p13 = pneg %p2715_p12 }
  0x28   : > { %p2723_p6 = pnand %p2722_p4, %p2716_p13 }
  0x2a   : > { %2726 = shalt.err (!%p2723_p6)
}
  0x2b   : > { %s2747_s9 = smov [#allocation12]   ;;  %194 = sbr.rel (%p2811_p3) target bundleno = 1799 (0x707), region = 36 }
  0x2c   : > { %2638 = dma.vmem_to_smem (!%p2827_p5), %s2831_s26, 64, %s2747_s9, [#allocation11]  }
  0x30   : > { %2732 = dma.done.wait (%p2639_p2), [#allocation9], 256  }
  0x31   : > { %2734 = vsyncadd (%p2639_p2), [#allocation9], 4294967040 }
  0x32   : > { %2736 = dma.done.wait (%p2639_p2), [#allocation11], 192  }
  0x33   : > { %2738 = vsyncadd (%p2639_p2), [#allocation11], 4294967104 }
  0x34   : > { %208 = sfence }
  0x35   : > { %p228_p7 = scmp.lt.s32.totalorder %s2806_s19, 1  ;;  %vm237_vm0 = vcmask 547840   ;;  %v4334_v0 = vmov 0.0   ;;  %vm246_vm1 = vcmask 542720   ;;  %s2749_s14 = smov 2   ;;  %vm288_vm2 = vcmask 531472  }
  0x36   : > { %240 = vst.msk [vmem:[#allocation2 + $0x10] sm:$0xff] %vm237_vm0, %v4334_v0  ;;  %241 = vst.msk [vmem:[#allocation2 + $0x18] sm:$0xff] %vm237_vm0, %v4334_v0  ;;  %vm307_vm3 = vcmask 465920   ;;  %s2750_s16 = smov 127   ;;  %vm296_vm4 = vcmask 530448   ;;  %vm316_vm5 = vcmask 460800  }
  0x37   : > { %238 = vst.msk [vmem:[#allocation2] sm:$0xff] %vm237_vm0, %v4334_v0  ;;  %239 = vst.msk [vmem:[#allocation2 + $0x8] sm:$0xff] %vm237_vm0, %v4334_v0  ;;  %s4348_s19 = smov (!%p228_p7, %s2806_s19), 1  ;;  %s2751_s17 = smov 126   ;;  %vm1963_vm6 = vcmask 89088   ;;  %vm1933_vm7 = vcmask 7168  }
  0x38   : > { %242 = vst.msk [vmem:[#allocation2 + $0x20] sm:$0xff] %vm237_vm0, %v4334_v0  ;;  %243 = vst.msk [vmem:[#allocation2 + $0x28] sm:$0xff] %vm237_vm0, %v4334_v0  ;;  %s2616_s10 = sshll.u32 %s4348_s19, 6  ;;  %s2752_s18 = smov 125   ;;  %vm1936_vm8 = vcmask 15360   ;;  %vm1939_vm9 = vcmask 23552  }
  0x39   : > { %244 = vst.msk [vmem:[#allocation2 + $0x30] sm:$0xff] %vm237_vm0, %v4334_v0  ;;  %245 = vst.msk [vmem:[#allocation2 + $0x38] sm:$0xff] %vm237_vm0, %v4334_v0  ;;  %s232_s13 = scalar_lea.vmem %s4329_s0, %s2616_s10  ;;  %s2753_s20 = smov 124   ;;  %vm1942_vm10 = vcmask 31744   ;;  %vm1945_vm11 = vcmask 39936   ;;  %vm1948_vm12 = vcmask 48128  }
  0x3a   : > { %v250_v1 = vld [vmem:[%s232_s13 + $0x10] sm:$0xff]  ;;  %v248_v2 = vld [vmem:[%s232_s13] sm:$0xff]  ;;  %247 = vst.msk [vmem:[#allocation2 + $0x40] sm:$0x7] %vm246_vm1, %v4334_v0  ;;  %v251_v3 = vld [vmem:[%s232_s13 + $0x18] sm:$0xff]  ;;  %s2754_s21 = smov 123  }
  0x3b   : > { %268 = vrot.lane.b32.xlu1 %v250_v1, %s2749_s14  ;;  %264 = vrot.lane.b32.xlu0 %v248_v2, %s2749_s14  ;;  %v249_v4 = vld [vmem:[%s232_s13 + $0x8] sm:$0xff]  ;;  %v252_v6 = vld [vmem:[%s232_s13 + $0x20] sm:$0xff]  ;;  %s3009_s22 = sld [smem:[#allocation8]]  ;;  %s2755_s26 = smov 122   ;;  %vm1951_vm13 = vcmask 56320   ;;  %vm1954_vm14 = vcmask 64512  }
  0x3c   : > { %v253_v5 = vld [vmem:[%s232_s13 + $0x28] sm:$0xff]  ;;  %v255_v7 = vld [vmem:[%s232_s13 + $0x38] sm:$0x7f]  ;;  %v254_v8 = vld [vmem:[%s232_s13 + $0x30] sm:$0xff]  ;;  %s3013_s23 = sld [smem:[#allocation8 + $0x80]]  ;;  %s2756_s5 = smov 121  }
  0x3d   : > { %s3021_s24 = sld [smem:[#allocation8 + $0x100]]  ;;  %s2757_s13 = smov 120   ;;  %vm1957_vm15 = vcmask 72704   ;;  %vm1960_vm0 = vcmask 80896   ;;  %vm1966_vm1 = vcmask 97280  }
  0x3e   : > { %s3028_s25 = sld [smem:[#allocation8 + $0x180]] }
  0x3f   : > { %270 = vrot.lane.b32.xlu1 %v251_v3, %s2749_s14  ;;  %266 = vrot.lane.b32.xlu0 %v249_v4, %s2749_s14  ;;  %s3035_s27 = sld [smem:[#allocation8 + $0x200]] }
  0x40   : > { %s3042_s28 = sld [smem:[#allocation8 + $0x280]] }
  0x41   : > { %v322_v33 = vstv %s3009_s22  ;;  %s3048_s29 = sld [smem:[#allocation8 + $0x300]] }
  0x42   : > { %v332_v34 = vstv %s3013_s23  ;;  %s3055_s30 = sld [smem:[#allocation8 + $0x380]] }
  0x43   : > { %274 = vrot.lane.b32.xlu1 %v253_v5, %s2749_s14  ;;  %272 = vrot.lane.b32.xlu0 %v252_v6, %s2749_s14  ;;  %v342_v38 = vstv %s3021_s24  ;;  %s3061_s6 = sld [smem:[#allocation8 + $0x400]] }
  0x44   : > { %v352_v44 = vstv %s3028_s25  ;;  %s3068_s7 = sld [smem:[#allocation8 + $0x480]] }
  0x45   : > { %v362_v51 = vstv %s3035_s27  ;;  %s3076_s8 = sld [smem:[#allocation8 + $0x500]] }
  0x46   : > { %v372_v58 = vstv %s3042_s28  ;;  %s3083_s9 = sld [smem:[#allocation8 + $0x1]] }
  0x47   : > { %278 = vrot.lane.b32.xlu1 %v255_v7, %s2749_s14  ;;  %276 = vrot.lane.b32.xlu0 %v254_v8, %s2749_s14  ;;  %v382_v3 = vstv %s3048_s29  ;;  %s3088_s10 = sld [smem:[#allocation8 + $0x81]] }
  0x48   : > { %s3094_s11 = sld [smem:[#allocation8 + $0x101]] }
  0x49   : > { %s3097_s12 = sld [smem:[#allocation8 + $0x181]] }
  0x4a   : > { %s3105_s22 = sld [smem:[#allocation8 + $0x201]] }
  0x4b   : > { %s3110_s23 = sld [smem:[#allocation8 + $0x281]] }
  0x4c   : > { %s3112_s24 = sld [smem:[#allocation8 + $0x301]] }
  0x4d   : > { %s3116_s25 = sld [smem:[#allocation8 + $0x381]] }
  0x4e   : > { %s3121_s27 = sld [smem:[#allocation8 + $0x401]] }
  0x4f   : > { %s3141_s28 = sld [smem:[#allocation8 + $0x481]] }
  0x50   : > { %s3145_s29 = sld [smem:[#allocation8 + $0x501]] }
  0xad   : > { %v269_v9 = vpop.permute.xlu1 %268  ;;  %v265_v10 = vpop.permute.xlu0 %264 }
  0xae   : > { %291 = vst.msk [vmem:[#allocation2 + $0x12] sm:$0xff] %vm288_vm2, %v269_v9  ;;  %289 = vst.msk [vmem:[#allocation2 + $0x2] sm:$0xff] %vm288_vm2, %v265_v10 }
  0xb1   : > { %v271_v11 = vpop.permute.xlu1 %270  ;;  %v267_v12 = vpop.permute.xlu0 %266 }
  0xb2   : > { %292 = vst.msk [vmem:[#allocation2 + $0x1a] sm:$0xff] %vm288_vm2, %v271_v11  ;;  %290 = vst.msk [vmem:[#allocation2 + $0xa] sm:$0xff] %vm288_vm2, %v267_v12  ;;  %v392_v11 = vstv %s3055_s30  ;;  %s3149_s30 = sld [smem:[#allocation8 + $0x2]] }
  0xb5   : > { %v2899_v13 = vld [vmem:[#allocation2] sm:$0xff]  ;;  %v275_v14 = vpop.permute.xlu1 %274  ;;  %v273_v15 = vpop.permute.xlu0 %272 }
  0xb6   : > { %308 = vst.msk [vmem:[#allocation7] sm:$0xff] %vm307_vm3, %v2899_v13  ;;  %445 = vrot.lane.b32.xlu0 %v2899_v13, %s2750_s16 }
  0xb7   : > { %294 = vst.msk [vmem:[#allocation2 + $0x2a] sm:$0xff] %vm288_vm2, %v275_v14  ;;  %293 = vst.msk [vmem:[#allocation2 + $0x22] sm:$0xff] %vm288_vm2, %v273_v15 }
  0xb9   : > { %v2907_v16 = vld [vmem:[#allocation2 + $0x18] sm:$0xff]  ;;  %v2909_v17 = vld [vmem:[#allocation2 + $0x8] sm:$0xff]  ;;  %v2911_v18 = vld [vmem:[#allocation2 + $0x10] sm:$0xff]  ;;  %v279_v19 = vpop.permute.xlu1 %278  ;;  %v277_v20 = vpop.permute.xlu0 %276 }
  0xba   : > { %311 = vst.msk [vmem:[#allocation7 + $0x18] sm:$0xff] %vm307_vm3, %v2907_v16  ;;  %309 = vst.msk [vmem:[#allocation7 + $0x8] sm:$0xff] %vm307_vm3, %v2909_v17  ;;  %449 = vrot.lane.b32.xlu0 %v2911_v18, %s2750_s16  ;;  %447 = vrot.lane.b32.xlu1 %v2909_v17, %s2750_s16 }
  0xbb   : > { %310 = vst.msk [vmem:[#allocation7 + $0x10] sm:$0xff] %vm307_vm3, %v2911_v18 }
  0xbc   : > { %297 = vst.msk [vmem:[#allocation2 + $0x3a] sm:$0x7f] %vm296_vm4, %v279_v19  ;;  %vm1975_vm4 = vcmask 121856  }
  0xbd   : > { %295 = vst.msk [vmem:[#allocation2 + $0x32] sm:$0xff] %vm288_vm2, %v277_v20  ;;  %vm1969_vm2 = vcmask 105472  }
  0xbe   : > { %v2924_v21 = vld [vmem:[#allocation2 + $0x20] sm:$0xff]  ;;  %v2926_v22 = vld [vmem:[#allocation2 + $0x28] sm:$0xff]  ;;  %451 = vrot.lane.b32.xlu1 %v2907_v16, %s2750_s16 }
  0xbf   : > { %312 = vst.msk [vmem:[#allocation7 + $0x20] sm:$0xff] %vm307_vm3, %v2924_v21  ;;  %313 = vst.msk [vmem:[#allocation7 + $0x28] sm:$0xff] %vm307_vm3, %v2926_v22  ;;  %453 = vrot.lane.b32.xlu0 %v2924_v21, %s2750_s16 }
  0xc2   : > { %455 = vrot.lane.b32.xlu1 %v2926_v22, %s2750_s16  ;;  %v318_v30 = vld [vmem:[#allocation7] ss:$4 sm:$0xff]  ;;  %v328_v31 = vld [vmem:[#allocation7 + $0x1] ss:$4 sm:$0xff]  ;;  %v338_v37 = vld [vmem:[#allocation7 + $0x2] ss:$4 sm:$0xff] }
  0xc3   : > { %v435_v25 = vld [vmem:[#allocation2 + $0x40] sm:$0x7]  ;;  %v323_v35 = vmul.f32 %v322_v33, %v318_v30  ;;  %v333_v36 = vmul.f32 %v332_v34, %v328_v31  ;;  %v343_v42 = vmul.f32 %v342_v38, %v338_v37  ;;  %v348_v43 = vld [vmem:[#allocation7 + $0x3] ss:$4 sm:$0xff]  ;;  %v402_v30 = vstv %s3061_s6  ;;  %s2758_s6 = smov 119  }
  0xc4   : > { %v2936_v23 = vld [vmem:[#allocation2 + $0x30] sm:$0xff]  ;;  %v2938_v24 = vld [vmem:[#allocation2 + $0x38] sm:$0xff]  ;;  %v306_v26 = vld [vmem:[#allocation2 + $0x40] sm:$0x7]  ;;  %v353_v48 = vmul.f32 %v352_v44, %v348_v43 }
  0xc5   : > { %314 = vst.msk [vmem:[#allocation7 + $0x30] sm:$0xff] %vm307_vm3, %v2936_v23  ;;  %315 = vst.msk [vmem:[#allocation7 + $0x38] sm:$0xff] %vm307_vm3, %v2938_v24  ;;  %457 = vrot.lane.b32.xlu0 %v2936_v23, %s2750_s16  ;;  %v577_v27 = vld [vmem:[#allocation2 + $0x40] sm:$0x7]  ;;  %v335_v39 = vadd.f32 %v333_v36, %v323_v35 }
  0xc6   : > { %459 = vrot.lane.b32.xlu1 %v2938_v24, %s2750_s16  ;;  %317 = vst.msk [vmem:[#allocation7 + $0x40] sm:$0x7] %vm316_vm5, %v306_v26  ;;  %v719_v28 = vld [vmem:[#allocation2 + $0x40] sm:$0x7]  ;;  %v388_v8 = vld [vmem:[#allocation7 + $0x7] ss:$4 sm:$0xff] }
  0xc7   : > { %v861_v29 = vld [vmem:[#allocation2 + $0x40] sm:$0x7]  ;;  %v345_v45 = vadd.f32 %v343_v42, %v335_v39  ;;  %v393_v20 = vmul.f32 %v392_v11, %v388_v8 }
  0xc8   : > { %v1003_v32 = vld [vmem:[#allocation2 + $0x40] sm:$0x7] }
  0xc9   : > { %461 = vrot.lane.b32.xlu0 %v435_v25, %s2750_s16  ;;  %v358_v49 = vld [vmem:[#allocation7 + $0x4] ss:$4 sm:$0xff]  ;;  %v355_v52 = vadd.f32 %v353_v48, %v345_v45  ;;  %v368_v56 = vld [vmem:[#allocation7 + $0x5] ss:$4 sm:$0xff]  ;;  %v378_v1 = vld [vmem:[#allocation7 + $0x6] ss:$4 sm:$0xff]  ;;  %v422_v48 = vstv %s3076_s8 }
  0xca   : > { %587 = vrot.lane.b32.xlu1 %v2899_v13, %s2751_s17  ;;  %v363_v54 = vmul.f32 %v362_v51, %v358_v49  ;;  %v1145_v59 = vld [vmem:[#allocation2 + $0x40] sm:$0x7]  ;;  %v373_v62 = vmul.f32 %v372_v58, %v368_v56  ;;  %v383_v6 = vmul.f32 %v382_v3, %v378_v1  ;;  %v500_v1 = vstv %s3094_s11  ;;  %s3184_s8 = sld [smem:[#allocation8 + $0x182]] }
  0xcb   : > { %v398_v15 = vld [vmem:[#allocation7 + $0x8] ss:$4 sm:$0xff]  ;;  %v408_v19 = vld [vmem:[#allocation7 + $0x9] ss:$4 sm:$0xff]  ;;  %v418_v26 = vld [vmem:[#allocation7 + $0xa] ss:$4 sm:$0xff] }
  0xcc   : > { %v320_v40 = vld [vmem:[#allocation7 + $0x20] ss:$4 sm:$0x7f]  ;;  %v330_v41 = vld [vmem:[#allocation7 + $0x21] ss:$4 sm:$0x7f]  ;;  %v365_v60 = vadd.f32 %v363_v54, %v355_v52  ;;  %v484_v52 = vstv %s3083_s9 }
  0xcd   : > { %589 = vrot.lane.b32.xlu0 %v2909_v17, %s2751_s17  ;;  %v324_v46 = vmul.f32 %v322_v33, %v320_v40  ;;  %v334_v47 = vmul.f32 %v332_v34, %v330_v41  ;;  %v340_v50 = vld [vmem:[#allocation7 + $0x22] ss:$4 sm:$0x7f]  ;;  %v350_v57 = vld [vmem:[#allocation7 + $0x23] ss:$4 sm:$0x7f]  ;;  %v403_v33 = vmul.f32 %v402_v30, %v398_v15 }
  0xce   : > { %591 = vrot.lane.b32.xlu1 %v2911_v18, %s2751_s17  ;;  %v344_v55 = vmul.f32 %v342_v38, %v340_v50  ;;  %v354_v63 = vmul.f32 %v352_v44, %v350_v57  ;;  %v360_v2 = vld [vmem:[#allocation7 + $0x24] ss:$4 sm:$0x7f]  ;;  %v375_v4 = vadd.f32 %v373_v62, %v365_v60  ;;  %v370_v9 = vld [vmem:[#allocation7 + $0x25] ss:$4 sm:$0x7f]  ;;  %v412_v38 = vstv %s3068_s7 }
  0xcf   : > { %v336_v53 = vadd.f32 %v334_v47, %v324_v46  ;;  %v364_v7 = vmul.f32 %v362_v51, %v360_v2  ;;  %v374_v25 = vmul.f32 %v372_v58, %v370_v9  ;;  %v390_v35 = vld [vmem:[#allocation7 + $0x27] ss:$4 sm:$0x7f]  ;;  %v1287_v41 = vld [vmem:[#allocation2 + $0x40] sm:$0x7]  ;;  %v413_v43 = vmul.f32 %v412_v38, %v408_v19  ;;  %s3176_s7 = sld [smem:[#allocation8 + $0x102]] }
  0xd0   : > { %v385_v12 = vadd.f32 %v383_v6, %v375_v4  ;;  %v400_v42 = vld [vmem:[#allocation7 + $0x28] ss:$4 sm:$0x7f]  ;;  %v394_v44 = vmul.f32 %v392_v11, %v390_v35  ;;  %v410_v46 = vld [vmem:[#allocation7 + $0x29] ss:$4 sm:$0x7f]  ;;  %v492_v57 = vstv %s3088_s10 }
  0xd1   : > { %593 = vrot.lane.b32.xlu0 %v2907_v16, %s2751_s17  ;;  %v346_v61 = vadd.f32 %v344_v55, %v336_v53  ;;  %v420_v47 = vld [vmem:[#allocation7 + $0x2a] ss:$4 sm:$0x7f]  ;;  %v423_v53 = vmul.f32 %v422_v48, %v418_v26  ;;  %v404_v54 = vmul.f32 %v402_v30, %v400_v42  ;;  %v414_v4 = vmul.f32 %v412_v38, %v410_v46  ;;  %s3188_s9 = sld [smem:[#allocation8 + $0x202]] }
  0xd2   : > { %595 = vrot.lane.b32.xlu1 %v2924_v21, %s2751_s17  ;;  %v395_v31 = vadd.f32 %v393_v20, %v385_v12  ;;  %s3210_s10 = sld [smem:[#allocation8 + $0x282]] }
  0xd3   : > { %v356_v5 = vadd.f32 %v354_v63, %v346_v61  ;;  %s3214_s11 = sld [smem:[#allocation8 + $0x302]] }
  0xd4   : > { %v405_v39 = vadd.f32 %v403_v33, %v395_v31  ;;  %v524_v31 = vstv %s3110_s23  ;;  %s3264_s23 = sld [smem:[#allocation8 + $0x502]] }
  0xd5   : > { %597 = vrot.lane.b32.xlu0 %v2926_v22, %s2751_s17  ;;  %v366_v14 = vadd.f32 %v364_v7, %v356_v5 }
  0xd6   : > { %599 = vrot.lane.b32.xlu1 %v2936_v23, %s2751_s17  ;;  %v415_v50 = vadd.f32 %v413_v43, %v405_v39 }
  0xd9   : > { %601 = vrot.lane.b32.xlu0 %v2938_v24, %s2751_s17 }
  0xda   : > { %603 = vrot.lane.b32.xlu1 %v577_v27, %s2751_s17  ;;  %v380_v27 = vld [vmem:[#allocation7 + $0x26] ss:$4 sm:$0x7f] }
  0xdb   : > { %v384_v34 = vmul.f32 %v382_v3, %v380_v27  ;;  %v516_v27 = vstv %s3105_s22  ;;  %s3259_s22 = sld [smem:[#allocation8 + $0x482]] }
  0xdd   : > { %729 = vrot.lane.b32.xlu0 %v2899_v13, %s2752_s18 }
  0xde   : > { %731 = vrot.lane.b32.xlu1 %v2909_v17, %s2752_s18 }
  0xe1   : > { %733 = vrot.lane.b32.xlu0 %v2911_v18, %s2752_s18 }
  0xe2   : > { %735 = vrot.lane.b32.xlu1 %v2907_v16, %s2752_s18 }
  0xe5   : > { %737 = vrot.lane.b32.xlu0 %v2924_v21, %s2752_s18 }
  0xe6   : > { %739 = vrot.lane.b32.xlu1 %v2926_v22, %s2752_s18 }
  0xe9   : > { %741 = vrot.lane.b32.xlu0 %v2936_v23, %s2752_s18 }
  0xea   : > { %743 = vrot.lane.b32.xlu1 %v2938_v24, %s2752_s18 }
  0xed   : > { %745 = vrot.lane.b32.xlu0 %v719_v28, %s2752_s18 }
  0xee   : > { %871 = vrot.lane.b32.xlu1 %v2899_v13, %s2753_s20 }
  0xf1   : > { %873 = vrot.lane.b32.xlu0 %v2909_v17, %s2753_s20 }
  0xf2   : > { %875 = vrot.lane.b32.xlu1 %v2911_v18, %s2753_s20 }
  0xf5   : > { %877 = vrot.lane.b32.xlu0 %v2907_v16, %s2753_s20 }
  0xf6   : > { %879 = vrot.lane.b32.xlu1 %v2924_v21, %s2753_s20 }
  0xf9   : > { %881 = vrot.lane.b32.xlu0 %v2926_v22, %s2753_s20 }
  0xfa   : > { %883 = vrot.lane.b32.xlu1 %v2936_v23, %s2753_s20 }
  0xfd   : > { %885 = vrot.lane.b32.xlu0 %v2938_v24, %s2753_s20 }
  0xfe   : > { %887 = vrot.lane.b32.xlu1 %v861_v29, %s2753_s20 }
 0x101   : > { %1013 = vrot.lane.b32.xlu0 %v2899_v13, %s2754_s21 }
 0x102   : > { %1015 = vrot.lane.b32.xlu1 %v2909_v17, %s2754_s21 }
 0x105   : > { %1017 = vrot.lane.b32.xlu0 %v2911_v18, %s2754_s21 }
 0x106   : > { %1019 = vrot.lane.b32.xlu1 %v2907_v16, %s2754_s21 }
 0x109   : > { %1021 = vrot.lane.b32.xlu0 %v2924_v21, %s2754_s21 }
 0x10a   : > { %1023 = vrot.lane.b32.xlu1 %v2926_v22, %s2754_s21 }
 0x10d   : > { %1025 = vrot.lane.b32.xlu0 %v2936_v23, %s2754_s21 }
 0x10e   : > { %1027 = vrot.lane.b32.xlu1 %v2938_v24, %s2754_s21 }
 0x111   : > { %1029 = vrot.lane.b32.xlu0 %v1003_v32, %s2754_s21  ;;  %v376_v32 = vadd.f32 %v374_v25, %v366_v14 }
 0x112   : > { %1155 = vrot.lane.b32.xlu1 %v2899_v13, %s2755_s26 }
 0x113   : > { %v386_v40 = vadd.f32 %v384_v34, %v376_v32 }
 0x115   : > { %1157 = vrot.lane.b32.xlu0 %v2909_v17, %s2755_s26  ;;  %v396_v51 = vadd.f32 %v394_v44, %v386_v40 }
 0x116   : > { %1159 = vrot.lane.b32.xlu1 %v2911_v18, %s2755_s26 }
 0x117   : > { %v406_v60 = vadd.f32 %v404_v54, %v396_v51  ;;  %v540_v51 = vstv %s3116_s25  ;;  %s3284_s25 = sld [smem:[#allocation8 + $0x3]] }
 0x119   : > { %1161 = vrot.lane.b32.xlu0 %v2907_v16, %s2755_s26  ;;  %v416_v19 = vadd.f32 %v414_v4, %v406_v60 }
 0x11a   : > { %1163 = vrot.lane.b32.xlu1 %v2924_v21, %s2755_s26 }
 0x11d   : > { %1165 = vrot.lane.b32.xlu0 %v2926_v22, %s2755_s26 }
 0x11e   : > { %1167 = vrot.lane.b32.xlu1 %v2936_v23, %s2755_s26 }
 0x121   : > { %1169 = vrot.lane.b32.xlu0 %v2938_v24, %s2755_s26 }
 0x122   : > { %1171 = vrot.lane.b32.xlu1 %v1145_v59, %s2755_s26  ;;  %v425_v59 = vadd.f32 %v423_v53, %v415_v50  ;;  %v1429_v50 = vld [vmem:[#allocation2 + $0x40] sm:$0x7] }
 0x125   : > { %1297 = vrot.lane.b32.xlu0 %v2899_v13, %s2756_s5 }
 0x126   : > { %1299 = vrot.lane.b32.xlu1 %v2909_v17, %s2756_s5 }
 0x128   : > { %v446_v10 = vpop.permute.xlu0 %445 }
 0x129   : > { %1301 = vrot.lane.b32.xlu0 %v2911_v18, %s2756_s5  ;;  %472 = vst.msk [vmem:[#allocation7] sm:$0xff] %vm307_vm3, %v446_v10  ;;  %v508_v10 = vstv %s3097_s12  ;;  %s3227_s12 = sld [smem:[#allocation8 + $0x382]] }
 0x12a   : > { %1303 = vrot.lane.b32.xlu1 %v2907_v16, %s2756_s5 }
 0x12c   : > { %v448_v28 = vpop.permute.xlu1 %447  ;;  %v450_v29 = vpop.permute.xlu0 %449 }
 0x12d   : > { %1305 = vrot.lane.b32.xlu0 %v2924_v21, %s2756_s5  ;;  %473 = vst.msk [vmem:[#allocation7 + $0x8] sm:$0xff] %vm307_vm3, %v448_v28  ;;  %474 = vst.msk [vmem:[#allocation7 + $0x10] sm:$0xff] %vm307_vm3, %v450_v29  ;;  %v424_v28 = vmul.f32 %v422_v48, %v420_v47 }
 0x12e   : > { %1307 = vrot.lane.b32.xlu1 %v2926_v22, %s2756_s5 }
 0x12f   : > { %v426_v35 = vadd.f32 %v424_v28, %v416_v19 }
 0x130   : > { %v452_v36 = vpop.permute.xlu1 %451 }
 0x131   : > { %1309 = vrot.lane.b32.xlu0 %v2936_v23, %s2756_s5  ;;  %v454_v37 = vpop.permute.xlu0 %453  ;;  %475 = vst.msk [vmem:[#allocation7 + $0x18] sm:$0xff] %vm307_vm3, %v452_v36 }
 0x132   : > { %476 = vst.msk [vmem:[#allocation7 + $0x20] sm:$0xff] %vm307_vm3, %v454_v37  ;;  %1311 = vrot.lane.b32.xlu1 %v2938_v24, %s2756_s5 }
 0x134   : > { %v456_v45 = vpop.permute.xlu1 %455 }
 0x135   : > { %1313 = vrot.lane.b32.xlu0 %v1287_v41, %s2756_s5  ;;  %477 = vst.msk [vmem:[#allocation7 + $0x28] sm:$0xff] %vm307_vm3, %v456_v45  ;;  %v532_v41 = vstv %s3112_s24  ;;  %s3170_s5 = sld [smem:[#allocation8 + $0x82]]  ;;  %s2759_s24 = smov 118  }
 0x136   : > { %1439 = vrot.lane.b32.xlu1 %v2899_v13, %s2757_s13 }
 0x137   : > { %v458_v49 = vpop.permute.xlu0 %457 }
 0x138   : > { %478 = vst.msk [vmem:[#allocation7 + $0x30] sm:$0xff] %vm307_vm3, %v458_v49  ;;  %v481_v55 = vld [vmem:[#allocation7] ss:$4 sm:$0xff]  ;;  %v489_v56 = vld [vmem:[#allocation7 + $0x1] ss:$4 sm:$0xff]  ;;  %v460_v58 = vpop.permute.xlu1 %459 }
 0x139   : > { %1441 = vrot.lane.b32.xlu0 %v2909_v17, %s2757_s13  ;;  %479 = vst.msk [vmem:[#allocation7 + $0x38] sm:$0xff] %vm307_vm3, %v460_v58  ;;  %v485_v61 = vmul.f32 %v484_v52, %v481_v55  ;;  %v497_v63 = vld [vmem:[#allocation7 + $0x2] ss:$4 sm:$0xff]  ;;  %v505_v2 = vld [vmem:[#allocation7 + $0x3] ss:$4 sm:$0xff]  ;;  %v493_v6 = vmul.f32 %v492_v57, %v489_v56 }
 0x13a   : > { %1443 = vrot.lane.b32.xlu1 %v2911_v18, %s2757_s13  ;;  %v513_v3 = vld [vmem:[#allocation7 + $0x4] ss:$4 sm:$0xff]  ;;  %v521_v7 = vld [vmem:[#allocation7 + $0x5] ss:$4 sm:$0xff]  ;;  %v529_v8 = vld [vmem:[#allocation7 + $0x6] ss:$4 sm:$0xff]  ;;  %v501_v25 = vmul.f32 %v500_v1, %v497_v63  ;;  %v509_v30 = vmul.f32 %v508_v10, %v505_v2 }
 0x13b   : > { %v462_v62 = vpop.permute.xlu0 %461  ;;  %v487_v5 = vadd.f32 %v485_v61, %v425_v59  ;;  %v3125_v9 = vld [vmem:[#allocation7 + $0x7] ss:$4 sm:$0xff]  ;;  %v3128_v12 = vld [vmem:[#allocation7 + $0x8] ss:$4 sm:$0xff]  ;;  %v3130_v14 = vld [vmem:[#allocation7 + $0x9] ss:$4 sm:$0xff]  ;;  %v517_v39 = vmul.f32 %v516_v27, %v513_v3  ;;  %v525_v48 = vmul.f32 %v524_v31, %v521_v7  ;;  %v533_v59 = vmul.f32 %v532_v41, %v529_v8 }
 0x13c   : > { %480 = vst.msk [vmem:[#allocation7 + $0x40] sm:$0x7] %vm316_vm5, %v462_v62  ;;  %v588_v11 = vpop.permute.xlu1 %587  ;;  %v3132_v15 = vld [vmem:[#allocation7 + $0xa] ss:$4 sm:$0xff]  ;;  %v548_v62 = vstv %s3121_s27  ;;  %v541_v3 = vmul.f32 %v540_v51, %v3125_v9  ;;  %v564_v9 = vstv %s3145_s29  ;;  %s3290_s27 = sld [smem:[#allocation8 + $0x83]] }
 0x13d   : > { %1445 = vrot.lane.b32.xlu0 %v2907_v16, %s2757_s13  ;;  %v495_v20 = vadd.f32 %v493_v6, %v487_v5  ;;  %614 = vst.msk [vmem:[#allocation7] sm:$0xff] %vm307_vm3, %v588_v11  ;;  %v556_v5 = vstv %s3141_s28  ;;  %v549_v11 = vmul.f32 %v548_v62, %v3128_v12  ;;  %s3293_s28 = sld [smem:[#allocation8 + $0x103]] }
 0x13e   : > { %1447 = vrot.lane.b32.xlu1 %v2924_v21, %s2757_s13  ;;  %v557_v12 = vmul.f32 %v556_v5, %v3130_v14  ;;  %s3300_s29 = sld [smem:[#allocation8 + $0x183]] }
 0x13f   : > { %v590_v26 = vpop.permute.xlu0 %589  ;;  %v503_v29 = vadd.f32 %v501_v25, %v495_v20 }
 0x140   : > { %615 = vst.msk [vmem:[#allocation7 + $0x8] sm:$0xff] %vm307_vm3, %v590_v26  ;;  %v482_v32 = vld [vmem:[#allocation7 + $0x20] ss:$4 sm:$0x7f]  ;;  %v592_v34 = vpop.permute.xlu1 %591 }
 0x141   : > { %1449 = vrot.lane.b32.xlu0 %v2926_v22, %s2757_s13  ;;  %v490_v33 = vld [vmem:[#allocation7 + $0x21] ss:$4 sm:$0x7f]  ;;  %v486_v36 = vmul.f32 %v484_v52, %v482_v32  ;;  %v498_v37 = vld [vmem:[#allocation7 + $0x22] ss:$4 sm:$0x7f]  ;;  %v511_v38 = vadd.f32 %v509_v30, %v503_v29  ;;  %v626_v32 = vstv %s3149_s30 }
 0x142   : > { %616 = vst.msk [vmem:[#allocation7 + $0x10] sm:$0xff] %vm307_vm3, %v592_v34  ;;  %v506_v42 = vld [vmem:[#allocation7 + $0x23] ss:$4 sm:$0x7f]  ;;  %1451 = vrot.lane.b32.xlu1 %v2936_v23, %s2757_s13  ;;  %v494_v45 = vmul.f32 %v492_v57, %v490_v33  ;;  %v502_v56 = vmul.f32 %v500_v1, %v498_v37  ;;  %s3338_s30 = sld [smem:[#allocation8 + $0x203]] }
 0x143   : > { %v594_v40 = vpop.permute.xlu0 %593  ;;  %v514_v43 = vld [vmem:[#allocation7 + $0x24] ss:$4 sm:$0x7f]  ;;  %v488_v44 = vadd.f32 %v486_v36, %v426_v35  ;;  %v519_v46 = vadd.f32 %v517_v39, %v511_v38  ;;  %v522_v47 = vld [vmem:[#allocation7 + $0x25] ss:$4 sm:$0x7f]  ;;  %v510_v2 = vmul.f32 %v508_v10, %v506_v42  ;;  %v565_v39 = vmul.f32 %v564_v9, %v3132_v15 }
 0x144   : > { %617 = vst.msk [vmem:[#allocation7 + $0x18] sm:$0xff] %vm307_vm3, %v594_v40  ;;  %v530_v49 = vld [vmem:[#allocation7 + $0x26] ss:$4 sm:$0x7f]  ;;  %v596_v54 = vpop.permute.xlu1 %595  ;;  %v518_v7 = vmul.f32 %v516_v27, %v514_v43  ;;  %v526_v20 = vmul.f32 %v524_v31, %v522_v47  ;;  %v634_v40 = vstv %s3170_s5  ;;  %s3342_s5 = sld [smem:[#allocation8 + $0x283]] }
 0x145   : > { %1453 = vrot.lane.b32.xlu0 %v2938_v24, %s2757_s13  ;;  %v538_v52 = vld [vmem:[#allocation7 + $0x27] ss:$4 sm:$0x7f]  ;;  %v3158_v53 = vld [vmem:[#allocation7 + $0x28] ss:$4 sm:$0x7f]  ;;  %v496_v55 = vadd.f32 %v494_v45, %v488_v44  ;;  %v527_v58 = vadd.f32 %v525_v48, %v519_v46  ;;  %v534_v34 = vmul.f32 %v532_v41, %v530_v49  ;;  %v642_v48 = vstv %s3176_s7 }
 0x146   : > { %v3162_v57 = vld [vmem:[#allocation7 + $0x29] ss:$4 sm:$0x7f]  ;;  %v3164_v60 = vld [vmem:[#allocation7 + $0x2a] ss:$4 sm:$0x7f]  ;;  %1455 = vrot.lane.b32.xlu1 %v1429_v50, %s2757_s13  ;;  %v542_v42 = vmul.f32 %v540_v51, %v538_v52  ;;  %v550_v50 = vmul.f32 %v548_v62, %v3158_v53 }
 0x147   : > { %618 = vst.msk [vmem:[#allocation7 + $0x20] sm:$0xff] %vm307_vm3, %v596_v54  ;;  %v598_v61 = vpop.permute.xlu0 %597  ;;  %v504_v63 = vadd.f32 %v502_v56, %v496_v55  ;;  %v535_v1 = vadd.f32 %v533_v59, %v527_v58  ;;  %v650_v56 = vstv %s3184_s8  ;;  %s3235_s13 = sld [smem:[#allocation8 + $0x402]]  ;;  %v558_v62 = vmul.f32 %v556_v5, %v3162_v57 }
 0x148   : > { %619 = vst.msk [vmem:[#allocation7 + $0x28] sm:$0xff] %vm307_vm3, %v598_v61  ;;  %v600_v4 = vpop.permute.xlu1 %599  ;;  %v566_v57 = vmul.f32 %v564_v9, %v3164_v60  ;;  %s3349_s7 = sld [smem:[#allocation8 + $0x303]] }
 0x149   : > { %1581 = vrot.lane.b32.xlu0 %v2899_v13, %s2758_s6  ;;  %v512_v6 = vadd.f32 %v510_v2, %v504_v63  ;;  %v543_v8 = vadd.f32 %v541_v3, %v535_v1  ;;  %620 = vst.msk [vmem:[#allocation7 + $0x30] sm:$0xff] %vm307_vm3, %v600_v4  ;;  %s3352_s8 = sld [smem:[#allocation8 + $0x383]] }
 0x14a   : > { %1583 = vrot.lane.b32.xlu1 %v2909_v17, %s2758_s6 }
 0x14b   : > { %v602_v10 = vpop.permute.xlu0 %601  ;;  %v520_v19 = vadd.f32 %v518_v7, %v512_v6  ;;  %v551_v25 = vadd.f32 %v549_v11, %v543_v8  ;;  %v623_v26 = vld [vmem:[#allocation7] ss:$4 sm:$0xff]  ;;  %v631_v27 = vld [vmem:[#allocation7 + $0x1] ss:$4 sm:$0xff]  ;;  %v639_v35 = vld [vmem:[#allocation7 + $0x2] ss:$4 sm:$0xff]  ;;  %v658_v6 = vstv %s3188_s9 }
 0x14c   : > { %621 = vst.msk [vmem:[#allocation7 + $0x38] sm:$0xff] %vm307_vm3, %v602_v10  ;;  %v604_v31 = vpop.permute.xlu1 %603  ;;  %v647_v36 = vld [vmem:[#allocation7 + $0x3] ss:$4 sm:$0xff]  ;;  %v627_v44 = vmul.f32 %v626_v32, %v623_v26  ;;  %v635_v54 = vmul.f32 %v634_v40, %v631_v27  ;;  %v643_v2 = vmul.f32 %v642_v48, %v639_v35  ;;  %v674_v35 = vstv %s3214_s11  ;;  %s3389_s9 = sld [smem:[#allocation8 + $0x403]] }
 0x14d   : > { %1585 = vrot.lane.b32.xlu0 %v2911_v18, %s2758_s6  ;;  %v528_v33 = vadd.f32 %v526_v20, %v520_v19  ;;  %622 = vst.msk [vmem:[#allocation7 + $0x40] sm:$0x7] %vm316_vm5, %v604_v31  ;;  %v559_v14 = vadd.f32 %v557_v12, %v551_v25  ;;  %v651_v19 = vmul.f32 %v650_v56, %v647_v36  ;;  %v1571_v20 = vld [vmem:[#allocation2 + $0x40] sm:$0x7]  ;;  %v666_v25 = vstv %s3210_s10  ;;  %s3396_s10 = sld [smem:[#allocation8 + $0x483]] }
 0x14e   : > { %v3193_v28 = vld [vmem:[#allocation7 + $0x4] ss:$4 sm:$0xff]  ;;  %v3195_v29 = vld [vmem:[#allocation7 + $0x5] ss:$4 sm:$0xff]  ;;  %v3197_v30 = vld [vmem:[#allocation7 + $0x6] ss:$4 sm:$0xff]  ;;  %1587 = vrot.lane.b32.xlu1 %v2907_v16, %s2758_s6 }
 0x14f   : > { %v3200_v37 = vld [vmem:[#allocation7 + $0x7] ss:$4 sm:$0xff]  ;;  %v730_v38 = vpop.permute.xlu0 %729  ;;  %v536_v41 = vadd.f32 %v534_v34, %v528_v33  ;;  %v567_v43 = vadd.f32 %v565_v39, %v559_v14  ;;  %v3218_v15 = vld [vmem:[#allocation7 + $0x8] ss:$4 sm:$0xff]  ;;  %v3220_v45 = vld [vmem:[#allocation7 + $0x9] ss:$4 sm:$0xff]  ;;  %v659_v12 = vmul.f32 %v658_v6, %v3193_v28  ;;  %v682_v28 = vstv %s3227_s12 }
 0x150   : > { %756 = vst.msk [vmem:[#allocation7] sm:$0xff] %vm307_vm3, %v730_v38  ;;  %v3222_v46 = vld [vmem:[#allocation7 + $0xa] ss:$4 sm:$0xff]  ;;  %v732_v47 = vpop.permute.xlu1 %731  ;;  %s3402_s11 = sld [smem:[#allocation8 + $0x503]] }
 0x151   : > { %1589 = vrot.lane.b32.xlu0 %v2924_v21, %s2758_s6  ;;  %v544_v49 = vadd.f32 %v542_v42, %v536_v41  ;;  %757 = vst.msk [vmem:[#allocation7 + $0x8] sm:$0xff] %vm307_vm3, %v732_v47  ;;  %v629_v52 = vadd.f32 %v627_v44, %v567_v43  ;;  %s3404_s12 = sld [smem:[#allocation8 + $0x4]] }
 0x152   : > { %1591 = vrot.lane.b32.xlu1 %v2926_v22, %s2758_s6 }
 0x153   : > { %v734_v51 = vpop.permute.xlu0 %733  ;;  %v624_v55 = vld [vmem:[#allocation7 + $0x20] ss:$4 sm:$0x7f]  ;;  %v552_v53 = vadd.f32 %v550_v50, %v544_v49  ;;  %v632_v58 = vld [vmem:[#allocation7 + $0x21] ss:$4 sm:$0x7f]  ;;  %v637_v63 = vadd.f32 %v635_v54, %v629_v52 }
 0x154   : > { %758 = vst.msk [vmem:[#allocation7 + $0x10] sm:$0xff] %vm307_vm3, %v734_v51  ;;  %v640_v59 = vld [vmem:[#allocation7 + $0x22] ss:$4 sm:$0x7f]  ;;  %v736_v4 = vpop.permute.xlu1 %735  ;;  %v628_v9 = vmul.f32 %v626_v32, %v624_v55  ;;  %v636_v14 = vmul.f32 %v634_v40, %v632_v58  ;;  %v667_v32 = vmul.f32 %v666_v25, %v3195_v29  ;;  %v675_v40 = vmul.f32 %v674_v35, %v3197_v30 }
 0x155   : > { %v648_v61 = vld [vmem:[#allocation7 + $0x23] ss:$4 sm:$0x7f]  ;;  %1593 = vrot.lane.b32.xlu0 %v2936_v23, %s2758_s6  ;;  %v3242_v1 = vld [vmem:[#allocation7 + $0x24] ss:$4 sm:$0x7f]  ;;  %v560_v10 = vadd.f32 %v558_v62, %v552_v53  ;;  %v645_v5 = vadd.f32 %v643_v2, %v637_v63  ;;  %v644_v42 = vmul.f32 %v642_v48, %v640_v59  ;;  %v690_v29 = vstv %s3235_s13 }
 0x156   : > { %v3244_v3 = vld [vmem:[#allocation7 + $0x25] ss:$4 sm:$0x7f]  ;;  %v3247_v7 = vld [vmem:[#allocation7 + $0x26] ss:$4 sm:$0x7f]  ;;  %1595 = vrot.lane.b32.xlu1 %v2938_v24, %s2758_s6  ;;  %v652_v49 = vmul.f32 %v650_v56, %v648_v61  ;;  %v698_v30 = vstv %s3259_s22  ;;  %v660_v56 = vmul.f32 %v658_v6, %v3242_v1  ;;  %v706_v63 = vstv %s3264_s23 }
 0x157   : > { %v3249_v8 = vld [vmem:[#allocation7 + $0x27] ss:$4 sm:$0x7f]  ;;  %759 = vst.msk [vmem:[#allocation7 + $0x18] sm:$0xff] %vm307_vm3, %v736_v4  ;;  %v738_v11 = vpop.permute.xlu0 %737  ;;  %v568_v60 = vadd.f32 %v566_v57, %v560_v10  ;;  %v653_v27 = vadd.f32 %v651_v19, %v645_v5  ;;  %v668_v6 = vmul.f32 %v666_v25, %v3244_v3  ;;  %v699_v10 = vmul.f32 %v698_v30, %v3220_v45  ;;  %s3412_s13 = sld [smem:[#allocation8 + $0x84]] }
 0x158   : > { %760 = vst.msk [vmem:[#allocation7 + $0x20] sm:$0xff] %vm307_vm3, %v738_v11  ;;  %v3261_v26 = vld [vmem:[#allocation7 + $0x28] ss:$4 sm:$0x7f]  ;;  %v740_v34 = vpop.permute.xlu1 %739  ;;  %v768_v57 = vstv %s3284_s25  ;;  %v676_v3 = vmul.f32 %v674_v35, %v3247_v7  ;;  %v707_v45 = vmul.f32 %v706_v63, %v3222_v46  ;;  %v776_v25 = vstv %s3290_s27  ;;  %s3429_s22 = sld [smem:[#allocation8 + $0x104]] }
 0x159   : > { %1597 = vrot.lane.b32.xlu0 %v1571_v20, %s2758_s6  ;;  %v3269_v31 = vld [vmem:[#allocation7 + $0x29] ss:$4 sm:$0x7f]  ;;  %v3271_v33 = vld [vmem:[#allocation7 + $0x2a] ss:$4 sm:$0x7f]  ;;  %v630_v38 = vadd.f32 %v628_v9, %v568_v60  ;;  %v661_v39 = vadd.f32 %v659_v12, %v653_v27  ;;  %v684_v60 = vmul.f32 %v682_v28, %v3249_v8 }
 0x15a   : > { %761 = vst.msk [vmem:[#allocation7 + $0x28] sm:$0xff] %vm307_vm3, %v740_v34  ;;  %1723 = vrot.lane.b32.xlu1 %v2899_v13, %s2759_s24  ;;  %s3441_s23 = sld [smem:[#allocation8 + $0x184]] }
 0x15b   : > { %v742_v36 = vpop.permute.xlu0 %741  ;;  %v638_v41 = vadd.f32 %v636_v14, %v630_v38  ;;  %v669_v43 = vadd.f32 %v667_v32, %v661_v39  ;;  %v1713_v14 = vld [vmem:[#allocation2 + $0x40] sm:$0x7]  ;;  %v692_v32 = vmul.f32 %v690_v29, %v3261_v26  ;;  %v700_v26 = vmul.f32 %v698_v30, %v3269_v31  ;;  %s3471_s25 = sld [smem:[#allocation8 + $0x284]] }
 0x15c   : > { %762 = vst.msk [vmem:[#allocation7 + $0x30] sm:$0xff] %vm307_vm3, %v742_v36  ;;  %v744_v44 = vpop.permute.xlu1 %743  ;;  %v784_v36 = vstv %s3293_s28  ;;  %v808_v31 = vstv %s3342_s5  ;;  %s3474_s27 = sld [smem:[#allocation8 + $0x304]] }
 0x15d   : > { %1725 = vrot.lane.b32.xlu0 %v2909_v17, %s2759_s24  ;;  %763 = vst.msk [vmem:[#allocation7 + $0x38] sm:$0xff] %vm307_vm3, %v744_v44  ;;  %v646_v13 = vadd.f32 %v644_v42, %v638_v41  ;;  %v677_v50 = vadd.f32 %v675_v40, %v669_v43  ;;  %v683_v17 = vmul.f32 %v682_v28, %v3200_v37  ;;  %v792_v40 = vstv %s3300_s29  ;;  %s3489_s28 = sld [smem:[#allocation8 + $0x384]] }
 0x15e   : > { %v765_v48 = vld [vmem:[#allocation7] ss:$4 sm:$0xff]  ;;  %v773_v51 = vld [vmem:[#allocation7 + $0x1] ss:$4 sm:$0xff]  ;;  %1727 = vrot.lane.b32.xlu1 %v2911_v18, %s2759_s24  ;;  %v3302_v52 = vld [vmem:[#allocation7 + $0x2] ss:$4 sm:$0xff]  ;;  %v691_v18 = vmul.f32 %v690_v29, %v3218_v15 }
 0x15f   : > { %v746_v47 = vpop.permute.xlu0 %745  ;;  %v3304_v54 = vld [vmem:[#allocation7 + $0x3] ss:$4 sm:$0xff]  ;;  %v3306_v55 = vld [vmem:[#allocation7 + $0x4] ss:$4 sm:$0xff]  ;;  %v654_v37 = vadd.f32 %v652_v49, %v646_v13  ;;  %v685_v53 = vadd.f32 %v683_v17, %v677_v50  ;;  %v3314_v58 = vld [vmem:[#allocation7 + $0x5] ss:$4 sm:$0xff]  ;;  %v769_v7 = vmul.f32 %v768_v57, %v765_v48  ;;  %v777_v41 = vmul.f32 %v776_v25, %v773_v51 }
 0x160   : > { %764 = vst.msk [vmem:[#allocation7 + $0x40] sm:$0x7] %vm316_vm5, %v746_v47  ;;  %v3316_v59 = vld [vmem:[#allocation7 + $0x6] ss:$4 sm:$0xff]  ;;  %v3318_v61 = vld [vmem:[#allocation7 + $0x7] ss:$4 sm:$0xff]  ;;  %v872_v62 = vpop.permute.xlu1 %871  ;;  %v785_v49 = vmul.f32 %v784_v36, %v3302_v52  ;;  %v800_v50 = vstv %s3338_s30  ;;  %v708_v48 = vmul.f32 %v706_v63, %v3271_v33 }
 0x161   : > { %1729 = vrot.lane.b32.xlu0 %v2907_v16, %s2759_s24  ;;  %v3321_v2 = vld [vmem:[#allocation7 + $0x8] ss:$4 sm:$0xff]  ;;  %v3323_v16 = vld [vmem:[#allocation7 + $0x9] ss:$4 sm:$0xff]  ;;  %v3325_v4 = vld [vmem:[#allocation7 + $0xa] ss:$4 sm:$0xff]  ;;  %v662_v15 = vadd.f32 %v660_v56, %v654_v37  ;;  %v693_v11 = vadd.f32 %v691_v18, %v685_v53  ;;  %v793_v37 = vmul.f32 %v792_v40, %v3304_v54 }
 0x162   : > { %898 = vst.msk [vmem:[#allocation7] sm:$0xff] %vm307_vm3, %v872_v62  ;;  %1731 = vrot.lane.b32.xlu1 %v2924_v21, %s2759_s24  ;;  %v801_v62 = vmul.f32 %v800_v50, %v3306_v55  ;;  %s3495_s29 = sld [smem:[#allocation8 + $0x404]] }
 0x163   : > { %v874_v1 = vpop.permute.xlu0 %873  ;;  %v670_v5 = vadd.f32 %v668_v6, %v662_v15  ;;  %v701_v19 = vadd.f32 %v699_v10, %v693_v11  ;;  %v809_v15 = vmul.f32 %v808_v31, %v3314_v58  ;;  %v824_v10 = vstv %s3352_s8  ;;  %s3497_s30 = sld [smem:[#allocation8 + $0x484]] }
 0x164   : > { %899 = vst.msk [vmem:[#allocation7 + $0x8] sm:$0xff] %vm307_vm3, %v874_v1  ;;  %v876_v20 = vpop.permute.xlu1 %875  ;;  %v766_v27 = vld [vmem:[#allocation7 + $0x20] ss:$4 sm:$0x7f]  ;;  %v816_v1 = vstv %s3349_s7  ;;  %s3503_s5 = sld [smem:[#allocation8 + $0x504]] }
 0x165   : > { %1733 = vrot.lane.b32.xlu0 %v2926_v22, %s2759_s24  ;;  %900 = vst.msk [vmem:[#allocation7 + $0x10] sm:$0xff] %vm307_vm3, %v876_v20  ;;  %v678_v22 = vadd.f32 %v676_v3, %v670_v5  ;;  %v709_v9 = vadd.f32 %v707_v45, %v701_v19  ;;  %v774_v12 = vld [vmem:[#allocation7 + $0x21] ss:$4 sm:$0x7f]  ;;  %v770_v53 = vmul.f32 %v768_v57, %v766_v27  ;;  %s3534_s7 = sld [smem:[#allocation8 + $0x5]] }
 0x166   : > { %v782_v34 = vld [vmem:[#allocation7 + $0x22] ss:$4 sm:$0x7f]  ;;  %v3355_v46 = vld [vmem:[#allocation7 + $0x23] ss:$4 sm:$0x7f]  ;;  %1735 = vrot.lane.b32.xlu1 %v2936_v23, %s2759_s24  ;;  %v778_v54 = vmul.f32 %v776_v25, %v774_v12  ;;  %v817_v25 = vmul.f32 %v816_v1, %v3316_v59  ;;  %v840_v59 = vstv %s3396_s10 }
 0x167   : > { %v878_v21 = vpop.permute.xlu0 %877  ;;  %v3357_v35 = vld [vmem:[#allocation7 + $0x24] ss:$4 sm:$0x7f]  ;;  %v3363_v38 = vld [vmem:[#allocation7 + $0x25] ss:$4 sm:$0x7f]  ;;  %v686_v39 = vadd.f32 %v684_v60, %v678_v22  ;;  %v771_v28 = vadd.f32 %v769_v7, %v709_v9  ;;  %v786_v5 = vmul.f32 %v784_v36, %v782_v34  ;;  %v832_v60 = vstv %s3389_s9 }
 0x168   : > { %901 = vst.msk [vmem:[#allocation7 + $0x18] sm:$0xff] %vm307_vm3, %v878_v21  ;;  %v3365_v8 = vld [vmem:[#allocation7 + $0x26] ss:$4 sm:$0x7f]  ;;  %v880_v43 = vpop.permute.xlu1 %879  ;;  %v794_v27 = vmul.f32 %v792_v40, %v3355_v46  ;;  %v825_v34 = vmul.f32 %v824_v10, %v3318_v61  ;;  %v833_v61 = vmul.f32 %v832_v60, %v3321_v2  ;;  %v848_v40 = vstv %s3402_s11  ;;  %s3538_s8 = sld [smem:[#allocation8 + $0x85]] }
 0x169   : > { %1737 = vrot.lane.b32.xlu0 %v2938_v24, %s2759_s24  ;;  %v3372_v42 = vld [vmem:[#allocation7 + $0x27] ss:$4 sm:$0x7f]  ;;  %v3374_v23 = vld [vmem:[#allocation7 + $0x28] ss:$4 sm:$0x7f]  ;;  %v694_v13 = vadd.f32 %v692_v32, %v686_v39  ;;  %v779_v29 = vadd.f32 %v777_v41, %v771_v28  ;;  %v802_v41 = vmul.f32 %v800_v50, %v3357_v35  ;;  %v910_v2 = vstv %s3404_s12 }
 0x16a   : > { %v3377_v44 = vld [vmem:[#allocation7 + $0x29] ss:$4 sm:$0x7f]  ;;  %v3379_v47 = vld [vmem:[#allocation7 + $0x2a] ss:$4 sm:$0x7f]  ;;  %1739 = vrot.lane.b32.xlu1 %v1713_v14, %s2759_s24 }
 0x16b   : > { %902 = vst.msk [vmem:[#allocation7 + $0x20] sm:$0xff] %vm307_vm3, %v880_v43  ;;  %v882_v24 = vpop.permute.xlu0 %881  ;;  %v702_v17 = vadd.f32 %v700_v26, %v694_v13  ;;  %v787_v51 = vadd.f32 %v785_v49, %v779_v29  ;;  %s3447_s24 = sld [smem:[#allocation8 + $0x204]]  ;;  %v810_v13 = vmul.f32 %v808_v31, %v3363_v38  ;;  %v818_v38 = vmul.f32 %v816_v1, %v3365_v8 }
 0x16c   : > { %903 = vst.msk [vmem:[#allocation7 + $0x28] sm:$0xff] %vm307_vm3, %v882_v24  ;;  %v884_v56 = vpop.permute.xlu1 %883  ;;  %s3542_s9 = sld [smem:[#allocation8 + $0x105]] }
 0x16d   : > { %904 = vst.msk [vmem:[#allocation7 + $0x30] sm:$0xff] %vm307_vm3, %v884_v56  ;;  %v710_v52 = vadd.f32 %v708_v48, %v702_v17  ;;  %v795_v18 = vadd.f32 %v793_v37, %v787_v51  ;;  %v841_v17 = vmul.f32 %v840_v59, %v3323_v16  ;;  %v849_v16 = vmul.f32 %v848_v40, %v3325_v4  ;;  %s3545_s10 = sld [smem:[#allocation8 + $0x185]] }
 0x16e   : > { %s3580_s11 = sld [smem:[#allocation8 + $0x205]] }
 0x16f   : > { %v886_v30 = vpop.permute.xlu0 %885  ;;  %v772_v33 = vadd.f32 %v770_v53, %v710_v52  ;;  %v803_v63 = vadd.f32 %v801_v62, %v795_v18  ;;  %v3407_v6 = vld [vmem:[#allocation7] ss:$4 sm:$0xff]  ;;  %v3409_v11 = vld [vmem:[#allocation7 + $0x1] ss:$4 sm:$0xff]  ;;  %v3422_v21 = vld [vmem:[#allocation7 + $0x2] ss:$4 sm:$0xff]  ;;  %v918_v18 = vstv %s3412_s13  ;;  %v826_v62 = vmul.f32 %v824_v10, %v3372_v42 }
 0x170   : > { %905 = vst.msk [vmem:[#allocation7 + $0x38] sm:$0xff] %vm307_vm3, %v886_v30  ;;  %v888_v55 = vpop.permute.xlu1 %887  ;;  %v3424_v22 = vld [vmem:[#allocation7 + $0x3] ss:$4 sm:$0xff]  ;;  %v919_v42 = vmul.f32 %v918_v18, %v3409_v11  ;;  %v934_v10 = vstv %s3441_s23  ;;  %v850_v11 = vmul.f32 %v848_v40, %v3379_v47  ;;  %s3586_s12 = sld [smem:[#allocation8 + $0x285]] }
 0x171   : > { %v780_v57 = vadd.f32 %v778_v54, %v772_v33  ;;  %906 = vst.msk [vmem:[#allocation7 + $0x40] sm:$0x7] %vm316_vm5, %v888_v55  ;;  %v811_v20 = vadd.f32 %v809_v15, %v803_v63  ;;  %v911_v54 = vmul.f32 %v910_v2, %v3407_v6  ;;  %v926_v63 = vstv %s3429_s22  ;;  %s3592_s13 = sld [smem:[#allocation8 + $0x305]] }
 0x172   : > { %v3415_v3 = vld [vmem:[#allocation7 + $0x4] ss:$4 sm:$0xff]  ;;  %v3417_v19 = vld [vmem:[#allocation7 + $0x5] ss:$4 sm:$0xff]  ;;  %v3419_v45 = vld [vmem:[#allocation7 + $0x6] ss:$4 sm:$0xff] }
 0x173   : > { %v1014_v58 = vpop.permute.xlu0 %1013  ;;  %v3427_v9 = vld [vmem:[#allocation7 + $0x7] ss:$4 sm:$0xff]  ;;  %v788_v7 = vadd.f32 %v786_v5, %v780_v57  ;;  %v819_v12 = vadd.f32 %v817_v25, %v811_v20  ;;  %v3434_v36 = vld [vmem:[#allocation7 + $0xa] ss:$4 sm:$0xff]  ;;  %v3437_v14 = vld [vmem:[#allocation7 + $0x8] ss:$4 sm:$0xff]  ;;  %v834_v5 = vmul.f32 %v832_v60, %v3374_v23  ;;  %v842_v25 = vmul.f32 %v840_v59, %v3377_v44 }
 0x174   : > { %1040 = vst.msk [vmem:[#allocation7] sm:$0xff] %vm307_vm3, %v1014_v58  ;;  %v3439_v39 = vld [vmem:[#allocation7 + $0x9] ss:$4 sm:$0xff]  ;;  %v1016_v32 = vpop.permute.xlu1 %1015  ;;  %v950_v44 = vstv %s3471_s25  ;;  %s3596_s22 = sld [smem:[#allocation8 + $0x385]] }
 0x175   : > { %v796_v28 = vadd.f32 %v794_v27, %v788_v7  ;;  %1041 = vst.msk [vmem:[#allocation7 + $0x8] sm:$0xff] %vm307_vm3, %v1016_v32  ;;  %v827_v43 = vadd.f32 %v825_v34, %v819_v12  ;;  %v927_v27 = vmul.f32 %v926_v63, %v3422_v21  ;;  %v942_v12 = vstv %s3447_s24  ;;  %s3620_s23 = sld [smem:[#allocation8 + $0x405]] }
 0x176   : > { %s3624_s24 = sld [smem:[#allocation8 + $0x485]] }
 0x177   : > { %v1018_v46 = vpop.permute.xlu0 %1017  ;;  %v804_v24 = vadd.f32 %v802_v41, %v796_v28  ;;  %v908_v26 = vld [vmem:[#allocation7 + $0x20] ss:$4 sm:$0x7f]  ;;  %v3451_v29 = vld [vmem:[#allocation7 + $0x21] ss:$4 sm:$0x7f]  ;;  %v835_v50 = vadd.f32 %v833_v61, %v827_v43  ;;  %v935_v28 = vmul.f32 %v934_v10, %v3424_v22  ;;  %v943_v22 = vmul.f32 %v942_v12, %v3415_v3 }
 0x178   : > { %1042 = vst.msk [vmem:[#allocation7 + $0x10] sm:$0xff] %vm307_vm3, %v1018_v46  ;;  %v3453_v49 = vld [vmem:[#allocation7 + $0x22] ss:$4 sm:$0x7f]  ;;  %v1020_v37 = vpop.permute.xlu1 %1019  ;;  %v912_v46 = vmul.f32 %v910_v2, %v908_v26  ;;  %v920_v26 = vmul.f32 %v918_v18, %v3451_v29  ;;  %s3635_s25 = sld [smem:[#allocation8 + $0x505]] }
 0x179   : > { %v3455_v35 = vld [vmem:[#allocation7 + $0x23] ss:$4 sm:$0x7f]  ;;  %v3459_v48 = vld [vmem:[#allocation7 + $0x24] ss:$4 sm:$0x7f]  ;;  %v812_v56 = vadd.f32 %v810_v13, %v804_v24  ;;  %v843_v53 = vadd.f32 %v841_v17, %v835_v50  ;;  %v958_v24 = vstv %s3474_s27  ;;  %v928_v18 = vmul.f32 %v926_v63, %v3453_v49 }
 0x17a   : > { %v3461_v51 = vld [vmem:[#allocation7 + $0x25] ss:$4 sm:$0x7f]  ;;  %v3464_v31 = vld [vmem:[#allocation7 + $0x26] ss:$4 sm:$0x7f]  ;;  %v982_v63 = vstv %s3497_s30 }
 0x17b   : > { %v3466_v30 = vld [vmem:[#allocation7 + $0x27] ss:$4 sm:$0x7f]  ;;  %1043 = vst.msk [vmem:[#allocation7 + $0x18] sm:$0xff] %vm307_vm3, %v1020_v37  ;;  %v1022_v52 = vpop.permute.xlu0 %1021  ;;  %v820_v8 = vadd.f32 %v818_v38, %v812_v56  ;;  %v851_v33 = vadd.f32 %v849_v16, %v843_v53  ;;  %v951_v16 = vmul.f32 %v950_v44, %v3417_v19  ;;  %v936_v19 = vmul.f32 %v934_v10, %v3455_v35  ;;  %s3641_s27 = sld [smem:[#allocation8 + $0x6]] }
 0x17c   : > { %1044 = vst.msk [vmem:[#allocation7 + $0x20] sm:$0xff] %vm307_vm3, %v1022_v52  ;;  %v3477_v1 = vld [vmem:[#allocation7 + $0x28] ss:$4 sm:$0x7f]  ;;  %v1024_v55 = vpop.permute.xlu1 %1023  ;;  %v944_v10 = vmul.f32 %v942_v12, %v3459_v48  ;;  %v983_v48 = vmul.f32 %v982_v63, %v3439_v39  ;;  %s3685_s30 = sld [smem:[#allocation8 + $0x186]] }
 0x17d   : > { %v3481_v15 = vld [vmem:[#allocation7 + $0x29] ss:$4 sm:$0x7f]  ;;  %v3483_v4 = vld [vmem:[#allocation7 + $0x2a] ss:$4 sm:$0x7f]  ;;  %v828_v57 = vadd.f32 %v826_v62, %v820_v8  ;;  %v913_v20 = vadd.f32 %v911_v54, %v851_v33  ;;  %v966_v8 = vstv %s3489_s28  ;;  %v959_v33 = vmul.f32 %v958_v24, %v3419_v45 }
 0x17e   : > { %1045 = vst.msk [vmem:[#allocation7 + $0x28] sm:$0xff] %vm307_vm3, %v1024_v55  ;;  %v974_v54 = vstv %s3495_s29  ;;  %v967_v49 = vmul.f32 %v966_v8, %v3427_v9  ;;  %s3667_s28 = sld [smem:[#allocation8 + $0x86]] }
 0x17f   : > { %v1026_v58 = vpop.permute.xlu0 %1025  ;;  %v836_v6 = vadd.f32 %v834_v5, %v828_v57  ;;  %v921_v7 = vadd.f32 %v919_v42, %v913_v20  ;;  %s3673_s29 = sld [smem:[#allocation8 + $0x106]] }
 0x180   : > { %1046 = vst.msk [vmem:[#allocation7 + $0x30] sm:$0xff] %vm307_vm3, %v1026_v58  ;;  %v1028_v23 = vpop.permute.xlu1 %1027 }
 0x181   : > { %v844_v60 = vadd.f32 %v842_v25, %v836_v6  ;;  %1047 = vst.msk [vmem:[#allocation7 + $0x38] sm:$0xff] %vm307_vm3, %v1028_v23  ;;  %v929_v32 = vadd.f32 %v927_v27, %v921_v7  ;;  %v975_v7 = vmul.f32 %v974_v54, %v3437_v14 }
 0x182   : > { %v3505_v21 = vld [vmem:[#allocation7] ss:$4 sm:$0xff]  ;;  %v3507_v59 = vld [vmem:[#allocation7 + $0x1] ss:$4 sm:$0xff]  ;;  %v3510_v43 = vld [vmem:[#allocation7 + $0x2] ss:$4 sm:$0xff] }
 0x183   : > { %v1030_v34 = vpop.permute.xlu0 %1029  ;;  %v852_v41 = vadd.f32 %v850_v11, %v844_v60  ;;  %v3512_v47 = vld [vmem:[#allocation7 + $0x3] ss:$4 sm:$0xff]  ;;  %v3514_v61 = vld [vmem:[#allocation7 + $0x4] ss:$4 sm:$0xff]  ;;  %v937_v40 = vadd.f32 %v935_v28, %v929_v32  ;;  %v3518_v13 = vld [vmem:[#allocation7 + $0x5] ss:$4 sm:$0xff]  ;;  %v990_v60 = vstv %s3503_s5 }
 0x184   : > { %1048 = vst.msk [vmem:[#allocation7 + $0x40] sm:$0x7] %vm316_vm5, %v1030_v34  ;;  %v3520_v50 = vld [vmem:[#allocation7 + $0x6] ss:$4 sm:$0xff]  ;;  %v3522_v17 = vld [vmem:[#allocation7 + $0x7] ss:$4 sm:$0xff]  ;;  %v1156_v37 = vpop.permute.xlu1 %1155  ;;  %v991_v39 = vmul.f32 %v990_v60, %v3434_v36 }
 0x185   : > { %v914_v56 = vadd.f32 %v912_v46, %v852_v41  ;;  %v3525_v2 = vld [vmem:[#allocation7 + $0x8] ss:$4 sm:$0xff]  ;;  %v3527_v38 = vld [vmem:[#allocation7 + $0x9] ss:$4 sm:$0xff]  ;;  %1182 = vst.msk [vmem:[#allocation7] sm:$0xff] %vm307_vm3, %v1156_v37  ;;  %v945_v53 = vadd.f32 %v943_v22, %v937_v40  ;;  %v952_v41 = vmul.f32 %v950_v44, %v3461_v51  ;;  %v1052_v22 = vstv %s3534_s7  ;;  %s3690_s5 = sld [smem:[#allocation8 + $0x206]] }
 0x186   : > { %v3530_v3 = vld [vmem:[#allocation7 + $0xa] ss:$4 sm:$0xff]  ;;  %v1060_v44 = vstv %s3538_s8  ;;  %s3695_s7 = sld [smem:[#allocation8 + $0x286]] }
 0x187   : > { %v1158_v52 = vpop.permute.xlu0 %1157  ;;  %v922_v29 = vadd.f32 %v920_v26, %v914_v56  ;;  %v953_v62 = vadd.f32 %v951_v16, %v945_v53  ;;  %v960_v56 = vmul.f32 %v958_v24, %v3464_v31  ;;  %v968_v53 = vmul.f32 %v966_v8, %v3466_v30  ;;  %s3703_s8 = sld [smem:[#allocation8 + $0x306]] }
 0x188   : > { %1183 = vst.msk [vmem:[#allocation7 + $0x8] sm:$0xff] %vm307_vm3, %v1158_v52  ;;  %v1160_v55 = vpop.permute.xlu1 %1159  ;;  %v3550_v20 = vld [vmem:[#allocation7 + $0x20] ss:$4 sm:$0x7f]  ;;  %v976_v31 = vmul.f32 %v974_v54, %v3477_v1  ;;  %v1061_v8 = vmul.f32 %v1060_v44, %v3507_v59  ;;  %v984_v1 = vmul.f32 %v982_v63, %v3481_v15  ;;  %v992_v15 = vmul.f32 %v990_v60, %v3483_v4 }
 0x189   : > { %v930_v57 = vadd.f32 %v928_v18, %v922_v29  ;;  %1184 = vst.msk [vmem:[#allocation7 + $0x10] sm:$0xff] %vm307_vm3, %v1160_v55  ;;  %v961_v58 = vadd.f32 %v959_v33, %v953_v62  ;;  %v3552_v45 = vld [vmem:[#allocation7 + $0x21] ss:$4 sm:$0x7f]  ;;  %v1053_v18 = vmul.f32 %v1052_v22, %v3505_v21  ;;  %v1068_v62 = vstv %s3542_s9  ;;  %s3735_s9 = sld [smem:[#allocation8 + $0x386]] }
 0x18a   : > { %v3554_v42 = vld [vmem:[#allocation7 + $0x22] ss:$4 sm:$0x7f]  ;;  %v3556_v6 = vld [vmem:[#allocation7 + $0x23] ss:$4 sm:$0x7f]  ;;  %v1076_v55 = vstv %s3545_s10 }
 0x18b   : > { %v1162_v5 = vpop.permute.xlu0 %1161  ;;  %v3558_v25 = vld [vmem:[#allocation7 + $0x24] ss:$4 sm:$0x7f]  ;;  %v938_v35 = vadd.f32 %v936_v19, %v930_v57  ;;  %v3563_v9 = vld [vmem:[#allocation7 + $0x25] ss:$4 sm:$0x7f]  ;;  %v969_v23 = vadd.f32 %v967_v49, %v961_v58 }
 0x18c   : > { %1185 = vst.msk [vmem:[#allocation7 + $0x18] sm:$0xff] %vm307_vm3, %v1162_v5  ;;  %v3565_v27 = vld [vmem:[#allocation7 + $0x26] ss:$4 sm:$0x7f]  ;;  %v1164_v32 = vpop.permute.xlu1 %1163  ;;  %s3739_s10 = sld [smem:[#allocation8 + $0x406]] }
 0x18d   : > { %v3568_v11 = vld [vmem:[#allocation7 + $0x27] ss:$4 sm:$0x7f]  ;;  %v3570_v34 = vld [vmem:[#allocation7 + $0x28] ss:$4 sm:$0x7f]  ;;  %v946_v28 = vadd.f32 %v944_v10, %v938_v35  ;;  %v977_v40 = vadd.f32 %v975_v7, %v969_v23  ;;  %v1069_v7 = vmul.f32 %v1068_v62, %v3510_v43  ;;  %v1084_v23 = vstv %s3580_s11 }
 0x18e   : > { %v3574_v12 = vld [vmem:[#allocation7 + $0x29] ss:$4 sm:$0x7f]  ;;  %v3576_v14 = vld [vmem:[#allocation7 + $0x2a] ss:$4 sm:$0x7f] }
 0x18f   : > { %v1166_v46 = vpop.permute.xlu0 %1165  ;;  %1186 = vst.msk [vmem:[#allocation7 + $0x20] sm:$0xff] %vm307_vm3, %v1164_v32  ;;  %v954_v37 = vadd.f32 %v952_v41, %v946_v28  ;;  %v985_v51 = vadd.f32 %v983_v48, %v977_v40  ;;  %v1077_v28 = vmul.f32 %v1076_v55, %v3512_v47  ;;  %v1092_v41 = vstv %s3586_s12  ;;  %s3742_s11 = sld [smem:[#allocation8 + $0x486]] }
 0x190   : > { %1187 = vst.msk [vmem:[#allocation7 + $0x28] sm:$0xff] %vm307_vm3, %v1166_v46  ;;  %v1168_v26 = vpop.permute.xlu1 %1167  ;;  %v1085_v47 = vmul.f32 %v1084_v23, %v3514_v61  ;;  %v1093_v61 = vmul.f32 %v1092_v41, %v3518_v13  ;;  %s3747_s12 = sld [smem:[#allocation8 + $0x506]] }
 0x191   : > { %v962_v52 = vadd.f32 %v960_v56, %v954_v37  ;;  %1188 = vst.msk [vmem:[#allocation7 + $0x30] sm:$0xff] %vm307_vm3, %v1168_v26  ;;  %v993_v29 = vadd.f32 %v991_v39, %v985_v51  ;;  %v1054_v56 = vmul.f32 %v1052_v22, %v3550_v20  ;;  %v1100_v51 = vstv %s3592_s13  ;;  %s3787_s13 = sld [smem:[#allocation8 + $0x7]] }
 0x192   : > { %v1062_v26 = vmul.f32 %v1060_v44, %v3552_v45  ;;  %v1070_v45 = vmul.f32 %v1068_v62, %v3554_v42  ;;  %v1101_v13 = vmul.f32 %v1100_v51, %v3520_v50  ;;  %v1078_v42 = vmul.f32 %v1076_v55, %v3556_v6 }
 0x193   : > { %v1170_v16 = vpop.permute.xlu0 %1169  ;;  %v970_v36 = vadd.f32 %v968_v53, %v962_v52  ;;  %v3598_v24 = vld [vmem:[#allocation7] ss:$4 sm:$0xff]  ;;  %v3600_v33 = vld [vmem:[#allocation7 + $0x1] ss:$4 sm:$0xff]  ;;  %v1055_v30 = vadd.f32 %v1053_v18, %v993_v29  ;;  %v3614_v35 = vld [vmem:[#allocation7 + $0x2] ss:$4 sm:$0xff]  ;;  %v1108_v29 = vstv %s3596_s22 }
 0x194   : > { %1189 = vst.msk [vmem:[#allocation7 + $0x38] sm:$0xff] %vm307_vm3, %v1170_v16  ;;  %v1172_v21 = vpop.permute.xlu1 %1171  ;;  %v3616_v59 = vld [vmem:[#allocation7 + $0x3] ss:$4 sm:$0xff]  ;;  %s3792_s22 = sld [smem:[#allocation8 + $0x87]] }
 0x195   : > { %v978_v58 = vadd.f32 %v976_v31, %v970_v36  ;;  %1190 = vst.msk [vmem:[#allocation7 + $0x40] sm:$0x7] %vm316_vm5, %v1172_v21  ;;  %v1063_v10 = vadd.f32 %v1061_v8, %v1055_v30 }
 0x196   : > { %v3604_v57 = vld [vmem:[#allocation7 + $0x4] ss:$4 sm:$0xff]  ;;  %v3606_v19 = vld [vmem:[#allocation7 + $0x5] ss:$4 sm:$0xff]  ;;  %v3608_v5 = vld [vmem:[#allocation7 + $0x6] ss:$4 sm:$0xff] }
 0x197   : > { %v1298_v54 = vpop.permute.xlu0 %1297  ;;  %v3612_v49 = vld [vmem:[#allocation7 + $0x7] ss:$4 sm:$0xff]  ;;  %v986_v63 = vadd.f32 %v984_v1, %v978_v58  ;;  %v1071_v32 = vadd.f32 %v1069_v7, %v1063_v10  ;;  %v3628_v46 = vld [vmem:[#allocation7 + $0x8] ss:$4 sm:$0xff]  ;;  %v3630_v40 = vld [vmem:[#allocation7 + $0x9] ss:$4 sm:$0xff]  ;;  %v1116_v1 = vstv %s3620_s23  ;;  %v1109_v7 = vmul.f32 %v1108_v29, %v3522_v17 }
 0x198   : > { %1324 = vst.msk [vmem:[#allocation7] sm:$0xff] %vm307_vm3, %v1298_v54  ;;  %v1300_v48 = vpop.permute.xlu1 %1299  ;;  %v3632_v43 = vld [vmem:[#allocation7 + $0xa] ss:$4 sm:$0xff]  ;;  %s3799_s23 = sld [smem:[#allocation8 + $0x107]] }
 0x199   : > { %v994_v37 = vadd.f32 %v992_v15, %v986_v63  ;;  %1325 = vst.msk [vmem:[#allocation7 + $0x8] sm:$0xff] %vm307_vm3, %v1300_v48  ;;  %v1079_v60 = vadd.f32 %v1077_v28, %v1071_v32  ;;  %v1124_v15 = vstv %s3624_s24  ;;  %v1086_v48 = vmul.f32 %v1084_v23, %v3558_v25  ;;  %s3804_s24 = sld [smem:[#allocation8 + $0x187]] }
 0x19a   : > { %v1194_v25 = vstv %s3641_s27  ;;  %v1102_v23 = vmul.f32 %v1100_v51, %v3565_v27  ;;  %v1110_v51 = vmul.f32 %v1108_v29, %v3568_v11  ;;  %v1210_v11 = vstv %s3673_s29  ;;  %s3838_s27 = sld [smem:[#allocation8 + $0x287]] }
 0x19b   : > { %v1302_v4 = vpop.permute.xlu0 %1301  ;;  %v1056_v39 = vadd.f32 %v1054_v56, %v994_v37  ;;  %v3644_v52 = vld [vmem:[#allocation7 + $0x20] ss:$4 sm:$0x7f]  ;;  %v3646_v20 = vld [vmem:[#allocation7 + $0x21] ss:$4 sm:$0x7f]  ;;  %v1087_v16 = vadd.f32 %v1085_v47, %v1079_v60  ;;  %v1117_v37 = vmul.f32 %v1116_v1, %v3525_v2  ;;  %v1132_v56 = vstv %s3635_s25 }
 0x19c   : > { %1326 = vst.msk [vmem:[#allocation7 + $0x10] sm:$0xff] %vm307_vm3, %v1302_v4  ;;  %v3648_v22 = vld [vmem:[#allocation7 + $0x22] ss:$4 sm:$0x7f]  ;;  %v1304_v31 = vpop.permute.xlu1 %1303  ;;  %v1094_v4 = vmul.f32 %v1092_v41, %v3563_v9  ;;  %v1125_v60 = vmul.f32 %v1124_v15, %v3527_v38  ;;  %v1202_v41 = vstv %s3667_s28  ;;  %s3831_s25 = sld [smem:[#allocation8 + $0x207]] }
 0x19d   : > { %v3650_v53 = vld [vmem:[#allocation7 + $0x23] ss:$4 sm:$0x7f]  ;;  %v3654_v18 = vld [vmem:[#allocation7 + $0x24] ss:$4 sm:$0x7f]  ;;  %v1064_v30 = vadd.f32 %v1062_v26, %v1056_v39  ;;  %v1095_v58 = vadd.f32 %v1093_v61, %v1087_v16  ;;  %v1133_v61 = vmul.f32 %v1132_v56, %v3530_v3 }
 0x19e   : > { %v3656_v36 = vld [vmem:[#allocation7 + $0x25] ss:$4 sm:$0x7f]  ;;  %v3659_v44 = vld [vmem:[#allocation7 + $0x26] ss:$4 sm:$0x7f] }
 0x19f   : > { %v3661_v8 = vld [vmem:[#allocation7 + $0x27] ss:$4 sm:$0x7f]  ;;  %v1306_v21 = vpop.permute.xlu0 %1305  ;;  %1327 = vst.msk [vmem:[#allocation7 + $0x18] sm:$0xff] %vm307_vm3, %v1304_v31  ;;  %v1072_v54 = vadd.f32 %v1070_v45, %v1064_v30  ;;  %v1103_v10 = vadd.f32 %v1101_v13, %v1095_v58  ;;  %s3851_s28 = sld [smem:[#allocation8 + $0x307]] }
 0x1a0   : > { %1328 = vst.msk [vmem:[#allocation7 + $0x20] sm:$0xff] %vm307_vm3, %v1306_v21  ;;  %v3670_v62 = vld [vmem:[#allocation7 + $0x28] ss:$4 sm:$0x7f]  ;;  %v1308_v32 = vpop.permute.xlu1 %1307  ;;  %v1195_v21 = vmul.f32 %v1194_v25, %v3598_v24  ;;  %s3855_s29 = sld [smem:[#allocation8 + $0x387]] }
 0x1a1   : > { %v3676_v63 = vld [vmem:[#allocation7 + $0x29] ss:$4 sm:$0x7f]  ;;  %v3678_v50 = vld [vmem:[#allocation7 + $0x2a] ss:$4 sm:$0x7f]  ;;  %v1080_v28 = vadd.f32 %v1078_v42, %v1072_v54  ;;  %v1111_v55 = vadd.f32 %v1109_v7, %v1103_v10  ;;  %v1118_v10 = vmul.f32 %v1116_v1, %v3570_v34  ;;  %v1126_v1 = vmul.f32 %v1124_v15, %v3574_v12 }
 0x1a2   : > { %1329 = vst.msk [vmem:[#allocation7 + $0x28] sm:$0xff] %vm307_vm3, %v1308_v32 }
 0x1a3   : > { %v1310_v6 = vpop.permute.xlu0 %1309  ;;  %v1088_v17 = vadd.f32 %v1086_v48, %v1080_v28  ;;  %v1119_v47 = vadd.f32 %v1117_v37, %v1111_v55  ;;  %v1203_v37 = vmul.f32 %v1202_v41, %v3600_v33  ;;  %v1134_v33 = vmul.f32 %v1132_v56, %v3576_v14 }
 0x1a4   : > { %1330 = vst.msk [vmem:[#allocation7 + $0x30] sm:$0xff] %vm307_vm3, %v1310_v6  ;;  %v1312_v39 = vpop.permute.xlu1 %1311  ;;  %v1218_v6 = vstv %s3685_s30  ;;  %v1234_v56 = vstv %s3695_s7  ;;  %s3886_s30 = sld [smem:[#allocation8 + $0x407]] }
 0x1a5   : > { %v1096_v2 = vadd.f32 %v1094_v4, %v1088_v17  ;;  %1331 = vst.msk [vmem:[#allocation7 + $0x38] sm:$0xff] %vm307_vm3, %v1312_v39  ;;  %v1127_v16 = vadd.f32 %v1125_v60, %v1119_v47  ;;  %v1211_v17 = vmul.f32 %v1210_v11, %v3614_v35  ;;  %v1226_v60 = vstv %s3690_s5  ;;  %s3896_s5 = sld [smem:[#allocation8 + $0x487]] }
 0x1a6   : > { %v3698_v38 = vld [vmem:[#allocation7] ss:$4 sm:$0xff]  ;;  %v3700_v9 = vld [vmem:[#allocation7 + $0x1] ss:$4 sm:$0xff]  ;;  %v3710_v3 = vld [vmem:[#allocation7 + $0x2] ss:$4 sm:$0xff]  ;;  %v1219_v12 = vmul.f32 %v1218_v6, %v3616_v59 }
 0x1a7   : > { %v1314_v26 = vpop.permute.xlu0 %1313  ;;  %v1104_v27 = vadd.f32 %v1102_v23, %v1096_v2  ;;  %v3706_v31 = vld [vmem:[#allocation7 + $0x4] ss:$4 sm:$0xff]  ;;  %v3708_v30 = vld [vmem:[#allocation7 + $0x5] ss:$4 sm:$0xff]  ;;  %v1135_v45 = vadd.f32 %v1133_v61, %v1127_v16  ;;  %v3715_v13 = vld [vmem:[#allocation7 + $0x6] ss:$4 sm:$0xff] }
 0x1a8   : > { %1332 = vst.msk [vmem:[#allocation7 + $0x40] sm:$0x7] %vm316_vm5, %v1314_v26  ;;  %v1440_v58 = vpop.permute.xlu1 %1439  ;;  %v3717_v54 = vld [vmem:[#allocation7 + $0x7] ss:$4 sm:$0xff]  ;;  %v3723_v32 = vld [vmem:[#allocation7 + $0x8] ss:$4 sm:$0xff] }
 0x1a9   : > { %v3719_v42 = vld [vmem:[#allocation7 + $0x3] ss:$4 sm:$0xff]  ;;  %v1112_v29 = vadd.f32 %v1110_v51, %v1104_v27  ;;  %v3725_v28 = vld [vmem:[#allocation7 + $0x9] ss:$4 sm:$0xff]  ;;  %v3727_v48 = vld [vmem:[#allocation7 + $0xa] ss:$4 sm:$0xff]  ;;  %v1197_v24 = vadd.f32 %v1195_v21, %v1135_v45  ;;  %v1227_v27 = vmul.f32 %v1226_v60, %v3604_v57  ;;  %v1196_v45 = vmul.f32 %v1194_v25, %v3644_v52 }
 0x1aa   : > { %1466 = vst.msk [vmem:[#allocation7] sm:$0xff] %vm307_vm3, %v1440_v58  ;;  %v1204_v52 = vmul.f32 %v1202_v41, %v3646_v20  ;;  %v1250_v25 = vstv %s3735_s9  ;;  %s3912_s7 = sld [smem:[#allocation8 + $0x507]] }
 0x1ab   : > { %v1442_v7 = vpop.permute.xlu0 %1441  ;;  %v1120_v34 = vadd.f32 %v1118_v10, %v1112_v29  ;;  %v1205_v55 = vadd.f32 %v1203_v37, %v1197_v24  ;;  %v1242_v10 = vstv %s3703_s8  ;;  %v1251_v41 = vmul.f32 %v1250_v25, %v3612_v49  ;;  %s3919_s8 = sld [smem:[#allocation8 + $0x8]] }
 0x1ac   : > { %1467 = vst.msk [vmem:[#allocation7 + $0x8] sm:$0xff] %vm307_vm3, %v1442_v7  ;;  %v1444_v4 = vpop.permute.xlu1 %1443  ;;  %v3749_v15 = vld [vmem:[#allocation7 + $0x20] ss:$4 sm:$0x7f]  ;;  %s3926_s9 = sld [smem:[#allocation8 + $0x88]] }
 0x1ad   : > { %1468 = vst.msk [vmem:[#allocation7 + $0x10] sm:$0xff] %vm307_vm3, %v1444_v4  ;;  %v1213_v39 = vadd.f32 %v1211_v17, %v1205_v55  ;;  %v1128_v35 = vadd.f32 %v1126_v1, %v1120_v34  ;;  %v3751_v2 = vld [vmem:[#allocation7 + $0x21] ss:$4 sm:$0x7f]  ;;  %v1235_v34 = vmul.f32 %v1234_v56, %v3606_v19  ;;  %v1243_v17 = vmul.f32 %v1242_v10, %v3608_v5 }
 0x1ae   : > { %v3753_v23 = vld [vmem:[#allocation7 + $0x22] ss:$4 sm:$0x7f]  ;;  %v3755_v26 = vld [vmem:[#allocation7 + $0x23] ss:$4 sm:$0x7f]  ;;  %v1266_v5 = vstv %s3742_s11 }
 0x1af   : > { %v1446_v47 = vpop.permute.xlu0 %1445  ;;  %v3757_v14 = vld [vmem:[#allocation7 + $0x24] ss:$4 sm:$0x7f]  ;;  %v3761_v16 = vld [vmem:[#allocation7 + $0x25] ss:$4 sm:$0x7f]  ;;  %v1221_v61 = vadd.f32 %v1219_v12, %v1213_v39  ;;  %v1136_v51 = vadd.f32 %v1134_v33, %v1128_v35  ;;  %v1212_v33 = vmul.f32 %v1210_v11, %v3648_v22  ;;  %v1258_v39 = vstv %s3739_s10 }
 0x1b0   : > { %1469 = vst.msk [vmem:[#allocation7 + $0x18] sm:$0xff] %vm307_vm3, %v1446_v47  ;;  %v3763_v59 = vld [vmem:[#allocation7 + $0x26] ss:$4 sm:$0x7f]  ;;  %v1448_v29 = vpop.permute.xlu1 %1447  ;;  %v1220_v35 = vmul.f32 %v1218_v6, %v3650_v53  ;;  %v1259_v11 = vmul.f32 %v1258_v39, %v3628_v46  ;;  %v1228_v46 = vmul.f32 %v1226_v60, %v3654_v18  ;;  %v1236_v60 = vmul.f32 %v1234_v56, %v3656_v36  ;;  %s3930_s10 = sld [smem:[#allocation8 + $0x108]] }
 0x1b1   : > { %v3771_v21 = vld [vmem:[#allocation7 + $0x27] ss:$4 sm:$0x7f]  ;;  %v3773_v58 = vld [vmem:[#allocation7 + $0x28] ss:$4 sm:$0x7f]  ;;  %v1229_v57 = vadd.f32 %v1227_v27, %v1221_v61  ;;  %v1198_v1 = vadd.f32 %v1196_v45, %v1136_v51 }
 0x1b2   : > { %v3776_v7 = vld [vmem:[#allocation7 + $0x29] ss:$4 sm:$0x7f]  ;;  %v3778_v24 = vld [vmem:[#allocation7 + $0x2a] ss:$4 sm:$0x7f] }
 0x1b3   : > { %v1450_v37 = vpop.permute.xlu0 %1449  ;;  %1470 = vst.msk [vmem:[#allocation7 + $0x20] sm:$0xff] %vm307_vm3, %v1448_v29  ;;  %v1237_v55 = vadd.f32 %v1235_v34, %v1229_v57  ;;  %v1206_v4 = vadd.f32 %v1204_v52, %v1198_v1  ;;  %v1274_v29 = vstv %s3747_s12  ;;  %v1267_v1 = vmul.f32 %v1266_v5, %v3630_v40  ;;  %s3969_s11 = sld [smem:[#allocation8 + $0x188]] }
 0x1b4   : > { %1471 = vst.msk [vmem:[#allocation7 + $0x28] sm:$0xff] %vm307_vm3, %v1450_v37  ;;  %v1452_v47 = vpop.permute.xlu1 %1451  ;;  %s3978_s12 = sld [smem:[#allocation8 + $0x208]] }
 0x1b5   : > { %1472 = vst.msk [vmem:[#allocation7 + $0x30] sm:$0xff] %vm307_vm3, %v1452_v47  ;;  %v1245_v20 = vadd.f32 %v1243_v17, %v1237_v55  ;;  %v1214_v12 = vadd.f32 %v1212_v33, %v1206_v4  ;;  %v1336_v17 = vstv %s3787_s13  ;;  %v1275_v33 = vmul.f32 %v1274_v29, %v3632_v43  ;;  %s3981_s13 = sld [smem:[#allocation8 + $0x288]] }
 0x1b6   : > { %v1337_v56 = vmul.f32 %v1336_v17, %v3698_v38  ;;  %v1352_v43 = vstv %s3799_s23  ;;  %v1494_v0 = vstv %s3930_s10  ;;  %s4023_s23 = sld [smem:[#allocation8 + $0x388]] }
 0x1b7   : > { %v1454_v19 = vpop.permute.xlu0 %1453  ;;  %v1253_v22 = vadd.f32 %v1251_v41, %v1245_v20  ;;  %v3806_v61 = vld [vmem:[#allocation7] ss:$4 sm:$0xff]  ;;  %v3808_v49 = vld [vmem:[#allocation7 + $0x1] ss:$4 sm:$0xff]  ;;  %v1222_v27 = vadd.f32 %v1220_v35, %v1214_v12  ;;  %v3826_v52 = vld [vmem:[#allocation7 + $0x2] ss:$4 sm:$0xff]  ;;  %v1344_v41 = vstv %s3792_s22  ;;  %v1244_v35 = vmul.f32 %v1242_v10, %v3659_v44 }
 0x1b8   : > { %1473 = vst.msk [vmem:[#allocation7 + $0x38] sm:$0xff] %vm307_vm3, %v1454_v19  ;;  %v1456_v51 = vpop.permute.xlu1 %1455  ;;  %v3828_v55 = vld [vmem:[#allocation7 + $0x3] ss:$4 sm:$0xff]  ;;  %s3985_s22 = sld [smem:[#allocation8 + $0x308]] }
 0x1b9   : > { %1474 = vst.msk [vmem:[#allocation7 + $0x40] sm:$0x7] %vm316_vm5, %v1456_v51  ;;  %v1261_v34 = vadd.f32 %v1259_v11, %v1253_v22  ;;  %v1230_v18 = vadd.f32 %v1228_v46, %v1222_v27  ;;  %v1252_v27 = vmul.f32 %v1250_v25, %v3661_v8  ;;  %v1360_v8 = vstv %s3804_s24  ;;  %s4031_s24 = sld [smem:[#allocation8 + $0x408]] }
 0x1ba   : > { %v3810_v53 = vld [vmem:[#allocation7 + $0x4] ss:$4 sm:$0xff]  ;;  %v3812_v6 = vld [vmem:[#allocation7 + $0x5] ss:$4 sm:$0xff]  ;;  %v3814_v45 = vld [vmem:[#allocation7 + $0x6] ss:$4 sm:$0xff] }
 0x1bb   : > { %v1582_v37 = vpop.permute.xlu0 %1581  ;;  %v3821_v57 = vld [vmem:[#allocation7 + $0x7] ss:$4 sm:$0xff]  ;;  %v1269_v4 = vadd.f32 %v1267_v1, %v1261_v34  ;;  %v3840_v47 = vld [vmem:[#allocation7 + $0x8] ss:$4 sm:$0xff]  ;;  %v3842_v19 = vld [vmem:[#allocation7 + $0x9] ss:$4 sm:$0xff]  ;;  %v1238_v12 = vadd.f32 %v1236_v60, %v1230_v18  ;;  %v1260_v60 = vmul.f32 %v1258_v39, %v3670_v62  ;;  %v1268_v39 = vmul.f32 %v1266_v5, %v3676_v63 }
 0x1bc   : > { %1608 = vst.msk [vmem:[#allocation7] sm:$0xff] %vm307_vm3, %v1582_v37  ;;  %v1584_v40 = vpop.permute.xlu1 %1583  ;;  %v3844_v20 = vld [vmem:[#allocation7 + $0xa] ss:$4 sm:$0xff]  ;;  %v1345_v37 = vmul.f32 %v1344_v41, %v3700_v9  ;;  %v1353_v9 = vmul.f32 %v1352_v43, %v3710_v3  ;;  %v1361_v3 = vmul.f32 %v1360_v8, %v3719_v42  ;;  %v1276_v63 = vmul.f32 %v1274_v29, %v3678_v50  ;;  %s4086_s10 = sld [smem:[#allocation8 + $0x389]] }
 0x1bd   : > { %v1277_v36 = vadd.f32 %v1275_v33, %v1269_v4  ;;  %1609 = vst.msk [vmem:[#allocation7 + $0x8] sm:$0xff] %vm307_vm3, %v1584_v40  ;;  %v1246_v11 = vadd.f32 %v1244_v35, %v1238_v12  ;;  %v1368_v35 = vstv %s3831_s25  ;;  %s4039_s25 = sld [smem:[#allocation8 + $0x488]] }
 0x1be   : > { %v1369_v42 = vmul.f32 %v1368_v35, %v3706_v31 }
 0x1bf   : > { %v1586_v22 = vpop.permute.xlu0 %1585  ;;  %v3859_v44 = vld [vmem:[#allocation7 + $0x20] ss:$4 sm:$0x7f]  ;;  %v3861_v10 = vld [vmem:[#allocation7 + $0x21] ss:$4 sm:$0x7f]  ;;  %v1339_v46 = vadd.f32 %v1337_v56, %v1277_v36  ;;  %v1254_v25 = vadd.f32 %v1252_v27, %v1246_v11 }
 0x1c0   : > { %1610 = vst.msk [vmem:[#allocation7 + $0x10] sm:$0xff] %vm307_vm3, %v1586_v22  ;;  %v3863_v38 = vld [vmem:[#allocation7 + $0x22] ss:$4 sm:$0x7f]  ;;  %v1588_v18 = vpop.permute.xlu1 %1587 }
 0x1c1   : > { %v3865_v51 = vld [vmem:[#allocation7 + $0x23] ss:$4 sm:$0x7f]  ;;  %v3868_v34 = vld [vmem:[#allocation7 + $0x24] ss:$4 sm:$0x7f]  ;;  %v1347_v12 = vadd.f32 %v1345_v37, %v1339_v46  ;;  %v1262_v62 = vadd.f32 %v1260_v60, %v1254_v25  ;;  %v1376_v46 = vstv %s3838_s27  ;;  %v1384_v25 = vstv %s3851_s28 }
 0x1c2   : > { %v3870_v1 = vld [vmem:[#allocation7 + $0x25] ss:$4 sm:$0x7f]  ;;  %v3876_v4 = vld [vmem:[#allocation7 + $0x26] ss:$4 sm:$0x7f]  ;;  %v1377_v50 = vmul.f32 %v1376_v46, %v3708_v30  ;;  %v1400_v30 = vstv %s3886_s30 }
 0x1c3   : > { %v3878_v33 = vld [vmem:[#allocation7 + $0x27] ss:$4 sm:$0x7f]  ;;  %v1590_v40 = vpop.permute.xlu0 %1589  ;;  %1611 = vst.msk [vmem:[#allocation7 + $0x18] sm:$0xff] %vm307_vm3, %v1588_v18  ;;  %v1355_v36 = vadd.f32 %v1353_v9, %v1347_v12  ;;  %v1270_v37 = vadd.f32 %v1268_v39, %v1262_v62  ;;  %v1392_v9 = vstv %s3855_s29  ;;  %v1346_v62 = vmul.f32 %v1344_v41, %v3751_v2  ;;  %s4045_s27 = sld [smem:[#allocation8 + $0x508]] }
 0x1c4   : > { %1612 = vst.msk [vmem:[#allocation7 + $0x20] sm:$0xff] %vm307_vm3, %v1590_v40  ;;  %v3891_v22 = vld [vmem:[#allocation7 + $0x28] ss:$4 sm:$0x7f]  ;;  %v1592_v27 = vpop.permute.xlu1 %1591  ;;  %v1338_v40 = vmul.f32 %v1336_v17, %v3749_v15  ;;  %v1385_v15 = vmul.f32 %v1384_v25, %v3715_v13  ;;  %v1354_v41 = vmul.f32 %v1352_v43, %v3753_v23  ;;  %v1393_v13 = vmul.f32 %v1392_v9, %v3717_v54  ;;  %s4051_s28 = sld [smem:[#allocation8 + $0x9]] }
 0x1c5   : > { %v3898_v56 = vld [vmem:[#allocation7 + $0x29] ss:$4 sm:$0x7f]  ;;  %v3900_v11 = vld [vmem:[#allocation7 + $0x2a] ss:$4 sm:$0x7f]  ;;  %v1363_v18 = vadd.f32 %v1361_v3, %v1355_v36  ;;  %v1278_v60 = vadd.f32 %v1276_v63, %v1270_v37  ;;  %v1362_v54 = vmul.f32 %v1360_v8, %v3755_v26  ;;  %v1370_v8 = vmul.f32 %v1368_v35, %v3757_v14 }
 0x1c6   : > { %1613 = vst.msk [vmem:[#allocation7 + $0x28] sm:$0xff] %vm307_vm3, %v1592_v27  ;;  %s4056_s29 = sld [smem:[#allocation8 + $0x89]] }
 0x1c7   : > { %v1594_v5 = vpop.permute.xlu0 %1593  ;;  %v1371_v12 = vadd.f32 %v1369_v42, %v1363_v18  ;;  %v1340_v31 = vadd.f32 %v1338_v40, %v1278_v60  ;;  %v4336_v42 = vstv %s3896_s5  ;;  %s4061_s30 = sld [smem:[#allocation8 + $0x109]] }
 0x1c8   : > { %1614 = vst.msk [vmem:[#allocation7 + $0x30] sm:$0xff] %vm307_vm3, %v1594_v5  ;;  %v1596_v29 = vpop.permute.xlu1 %1595 }
 0x1c9   : > { %1615 = vst.msk [vmem:[#allocation7 + $0x38] sm:$0xff] %vm307_vm3, %v1596_v29  ;;  %v1379_v36 = vadd.f32 %v1377_v50, %v1371_v12  ;;  %v1348_v2 = vadd.f32 %v1346_v62, %v1340_v31  ;;  %v1401_v29 = vmul.f32 %v1400_v30, %v3723_v32  ;;  %v1409_v32 = vmul.f32 %v4336_v42, %v3725_v28 }
 0x1ca   : > { %v3932_v17 = vld [vmem:[#allocation7] ss:$4 sm:$0xff]  ;;  %v3934_v3 = vld [vmem:[#allocation7 + $0x1] ss:$4 sm:$0xff]  ;;  %v3942_v37 = vld [vmem:[#allocation7 + $0x2] ss:$4 sm:$0xff] }
 0x1cb   : > { %v1598_v39 = vpop.permute.xlu0 %1597  ;;  %v1387_v27 = vadd.f32 %v1385_v15, %v1379_v36  ;;  %v3944_v63 = vld [vmem:[#allocation7 + $0x3] ss:$4 sm:$0xff]  ;;  %v3946_v5 = vld [vmem:[#allocation7 + $0x4] ss:$4 sm:$0xff]  ;;  %v3949_v60 = vld [vmem:[#allocation7 + $0x5] ss:$4 sm:$0xff]  ;;  %v1356_v23 = vadd.f32 %v1354_v41, %v1348_v2  ;;  %v1416_v36 = vstv %s3912_s7  ;;  %v1478_v41 = vstv %s3919_s8 }
 0x1cc   : > { %1616 = vst.msk [vmem:[#allocation7 + $0x40] sm:$0x7] %vm316_vm5, %v1598_v39  ;;  %v1724_v18 = vpop.permute.xlu1 %1723  ;;  %v3951_v40 = vld [vmem:[#allocation7 + $0x6] ss:$4 sm:$0xff]  ;;  %v3953_v12 = vld [vmem:[#allocation7 + $0x7] ss:$4 sm:$0xff] }
 0x1cd   : > { %v1395_v50 = vadd.f32 %v1393_v13, %v1387_v27  ;;  %v3961_v31 = vld [vmem:[#allocation7 + $0x8] ss:$4 sm:$0xff]  ;;  %v3963_v62 = vld [vmem:[#allocation7 + $0x9] ss:$4 sm:$0xff]  ;;  %v3965_v39 = vld [vmem:[#allocation7 + $0xa] ss:$4 sm:$0xff]  ;;  %v1364_v26 = vadd.f32 %v1362_v54, %v1356_v23  ;;  %v1378_v13 = vmul.f32 %v1376_v46, %v3761_v16  ;;  %v1417_v54 = vmul.f32 %v1416_v36, %v3727_v48 }
 0x1ce   : > { %1750 = vst.msk [vmem:[#allocation7] sm:$0xff] %vm307_vm3, %v1724_v18  ;;  %v1486_v16 = vstv %s3926_s9  ;;  %v1386_v46 = vmul.f32 %v1384_v25, %v3763_v59  ;;  %s4071_s7 = sld [smem:[#allocation8 + $0x209]] }
 0x1cf   : > { %v1726_v43 = vpop.permute.xlu0 %1725  ;;  %v1403_v15 = vadd.f32 %v1401_v29, %v1395_v50  ;;  %v1372_v27 = vadd.f32 %v1370_v8, %v1364_v26  ;;  %s4076_s8 = sld [smem:[#allocation8 + $0x289]] }
 0x1d0   : > { %1751 = vst.msk [vmem:[#allocation7 + $0x8] sm:$0xff] %vm307_vm3, %v1726_v43  ;;  %v1728_v2 = vpop.permute.xlu1 %1727  ;;  %v3988_v28 = vld [vmem:[#allocation7 + $0x20] ss:$4 sm:$0x7f]  ;;  %s4081_s9 = sld [smem:[#allocation8 + $0x309]] }
 0x1d1   : > { %v1411_v23 = vadd.f32 %v1409_v32, %v1403_v15  ;;  %1752 = vst.msk [vmem:[#allocation7 + $0x10] sm:$0xff] %vm307_vm3, %v1728_v2  ;;  %v3990_v14 = vld [vmem:[#allocation7 + $0x21] ss:$4 sm:$0x7f]  ;;  %v1380_v48 = vadd.f32 %v1378_v13, %v1372_v27  ;;  %v1479_v15 = vmul.f32 %v1478_v41, %v3806_v61  ;;  %v1394_v27 = vmul.f32 %v1392_v9, %v3771_v21 }
 0x1d2   : > { %v3992_v35 = vld [vmem:[#allocation7 + $0x22] ss:$4 sm:$0x7f]  ;;  %v3994_v43 = vld [vmem:[#allocation7 + $0x23] ss:$4 sm:$0x7f]  ;;  %v1402_v21 = vmul.f32 %v1400_v30, %v3773_v58  ;;  %v1518_v58 = vstv %s3981_s13  ;;  %v1418_v30 = vmul.f32 %v1416_v36, %v3778_v24  ;;  %v1534_v24 = vstv %s4023_s23 }
 0x1d3   : > { %v1730_v18 = vpop.permute.xlu0 %1729  ;;  %v3996_v50 = vld [vmem:[#allocation7 + $0x24] ss:$4 sm:$0x7f]  ;;  %v4003_v29 = vld [vmem:[#allocation7 + $0x25] ss:$4 sm:$0x7f]  ;;  %v1419_v8 = vadd.f32 %v1417_v54, %v1411_v23  ;;  %v1388_v42 = vadd.f32 %v1386_v46, %v1380_v48  ;;  %v1502_v54 = vstv %s3969_s11  ;;  %v1495_v46 = vmul.f32 %v1494_v0, %v3826_v52 }
 0x1d4   : > { %1753 = vst.msk [vmem:[#allocation7 + $0x18] sm:$0xff] %vm307_vm3, %v1730_v18  ;;  %v4005_v26 = vld [vmem:[#allocation7 + $0x26] ss:$4 sm:$0x7f]  ;;  %v1732_v2 = vpop.permute.xlu1 %1731  ;;  %v1487_v18 = vmul.f32 %v1486_v16, %v3808_v49  ;;  %s4091_s11 = sld [smem:[#allocation8 + $0x409]] }
 0x1d5   : > { %v4008_v32 = vld [vmem:[#allocation7 + $0x27] ss:$4 sm:$0x7f]  ;;  %v4014_v13 = vld [vmem:[#allocation7 + $0x28] ss:$4 sm:$0x7f]  ;;  %v1481_v25 = vadd.f32 %v1479_v15, %v1419_v8  ;;  %v1396_v48 = vadd.f32 %v1394_v27, %v1388_v42  ;;  %v1510_v8 = vstv %s3978_s12  ;;  %v1503_v42 = vmul.f32 %v1502_v54, %v3828_v55 }
 0x1d6   : > { %4339 = vst [vmem:[#allocation15_spill] sm:$0xff] %v4014_v13  ;;  %1754 = vst.msk [vmem:[#allocation7 + $0x20] sm:$0xff] %vm307_vm3, %v1732_v2  ;;  %v4018_v61 = vld [vmem:[#allocation7 + $0x29] ss:$4 sm:$0x7f]  ;;  %v4342_v2 = vstv %s3896_s5  ;;  %s4066_s5 = sld [smem:[#allocation8 + $0x189]] }
 0x1d7   : > { %v1734_v59 = vpop.permute.xlu0 %1733  ;;  %4340 = vst [vmem:[#allocation16_spill] sm:$0xff] %v4018_v61  ;;  %v4020_v23 = vld [vmem:[#allocation7 + $0x2a] ss:$4 sm:$0x7f]  ;;  %v1489_v9 = vadd.f32 %v1487_v18, %v1481_v25  ;;  %v1404_v15 = vadd.f32 %v1402_v21, %v1396_v48  ;;  %v1526_v25 = vstv %s3985_s22  ;;  %v1480_v18 = vmul.f32 %v1478_v41, %v3859_v44  ;;  %s4096_s12 = sld [smem:[#allocation8 + $0x489]] }
 0x1d8   : > { %4341 = vst [vmem:[#allocation17_spill] sm:$0xff] %v4020_v23  ;;  %1755 = vst.msk [vmem:[#allocation7 + $0x28] sm:$0xff] %vm307_vm3, %v1734_v59  ;;  %v1736_v49 = vpop.permute.xlu1 %1735  ;;  %v1410_v23 = vmul.f32 %v4342_v2, %v3776_v7  ;;  %v1511_v59 = vmul.f32 %v1510_v8, %v3810_v53  ;;  %v1519_v21 = vmul.f32 %v1518_v58, %v3812_v6  ;;  %s4101_s13 = sld [smem:[#allocation8 + $0x509]] }
 0x1d9   : > { %v1497_v13 = vadd.f32 %v1495_v46, %v1489_v9  ;;  %1756 = vst.msk [vmem:[#allocation7 + $0x30] sm:$0xff] %vm307_vm3, %v1736_v49  ;;  %v1488_v53 = vmul.f32 %v1486_v16, %v3861_v10  ;;  %v1496_v41 = vmul.f32 %v1494_v0, %v3863_v38  ;;  %v1535_v9 = vmul.f32 %v1534_v24, %v3821_v57  ;;  %s4106_s22 = sld [smem:[#allocation8 + $0xa]] }
 0x1da   : > { %v1412_v52 = vadd.f32 %v1410_v23, %v1404_v15  ;;  %v1542_v23 = vstv %s4031_s24  ;;  %v1550_v46 = vstv %s4039_s25  ;;  %v1504_v10 = vmul.f32 %v1502_v54, %v3865_v51  ;;  %s4111_s23 = sld [smem:[#allocation8 + $0x8a]] }
 0x1db   : > { %v1738_v61 = vpop.permute.xlu0 %1737  ;;  %v1505_v27 = vadd.f32 %v1503_v42, %v1497_v13  ;;  %v1558_v15 = vstv %s4045_s27  ;;  %v1512_v0 = vmul.f32 %v1510_v8, %v3868_v34  ;;  %v1551_v57 = vmul.f32 %v1550_v46, %v3842_v19  ;;  %s4116_s24 = sld [smem:[#allocation8 + $0x10a]] }
 0x1dc   : > { %1757 = vst.msk [vmem:[#allocation7 + $0x38] sm:$0xff] %vm307_vm3, %v1738_v61  ;;  %v1740_v7 = vpop.permute.xlu1 %1739  ;;  %v1420_v55 = vadd.f32 %v1418_v30, %v1412_v52  ;;  %v1527_v61 = vmul.f32 %v1526_v25, %v3814_v45  ;;  %v1543_v45 = vmul.f32 %v1542_v23, %v3840_v47  ;;  %v1620_v42 = vstv %s4051_s28  ;;  %s4121_s25 = sld [smem:[#allocation8 + $0x18a]] }
 0x1dd   : > { %v1513_v48 = vadd.f32 %v1511_v59, %v1505_v27  ;;  %1758 = vst.msk [vmem:[#allocation7 + $0x40] sm:$0x7] %vm316_vm5, %v1740_v7  ;;  %v1520_v51 = vmul.f32 %v1518_v58, %v3870_v1  ;;  %v1559_v47 = vmul.f32 %v1558_v15, %v3844_v20  ;;  %v1628_v30 = vstv %s4056_s29  ;;  %s4126_s27 = sld [smem:[#allocation8 + $0x20a]] }
 0x1de   : > { %v1482_v36 = vadd.f32 %v1480_v18, %v1420_v55  ;;  %v1528_v34 = vmul.f32 %v1526_v25, %v3876_v4  ;;  %v1621_v19 = vmul.f32 %v1620_v42, %v3932_v17  ;;  %v1636_v59 = vstv %s4061_s30  ;;  %s4131_s28 = sld [smem:[#allocation8 + $0x28a]] }
 0x1df   : > { %v1521_v13 = vadd.f32 %v1519_v21, %v1513_v48  ;;  %v1536_v1 = vmul.f32 %v1534_v24, %v3878_v33  ;;  %v1629_v20 = vmul.f32 %v1628_v30, %v3934_v3  ;;  %v1644_v55 = vstv %s4066_s5  ;;  %s4135_s29 = sld [smem:[#allocation8 + $0x30a]] }
 0x1e0   : > { %v1490_v44 = vadd.f32 %v1488_v53, %v1482_v36  ;;  %v1544_v4 = vmul.f32 %v1542_v23, %v3891_v22  ;;  %v1637_v17 = vmul.f32 %v1636_v59, %v3942_v37  ;;  %v1652_v48 = vstv %s4071_s7  ;;  %s4139_s30 = sld [smem:[#allocation8 + $0x38a]] }
 0x1e1   : > { %v1529_v6 = vadd.f32 %v1527_v61, %v1521_v13  ;;  %v1552_v33 = vmul.f32 %v1550_v46, %v3898_v56  ;;  %v1645_v3 = vmul.f32 %v1644_v55, %v3944_v63  ;;  %v1660_v36 = vstv %s4076_s8  ;;  %s4143_s5 = sld [smem:[#allocation8 + $0x40a]] }
 0x1e2   : > { %v1498_v49 = vadd.f32 %v1496_v41, %v1490_v44  ;;  %v1560_v22 = vmul.f32 %v1558_v15, %v3900_v11  ;;  %v1653_v37 = vmul.f32 %v1652_v48, %v3946_v5  ;;  %v1668_v61 = vstv %s4081_s9  ;;  %s4147_s7 = sld [smem:[#allocation8 + $0x48a]]  ;;  %s2760_s9 = smov 116  }
 0x1e3   : > { %v1537_v16 = vadd.f32 %v1535_v9, %v1529_v6  ;;  %v1622_v56 = vmul.f32 %v1620_v42, %v3988_v28  ;;  %v1661_v63 = vmul.f32 %v1660_v36, %v3949_v60  ;;  %v1676_v41 = vstv %s4086_s10  ;;  %s4151_s8 = sld [smem:[#allocation8 + $0x50a]]  ;;  %s2761_s10 = smov 113  }
 0x1e4   : > { %v1506_v2 = vadd.f32 %v1504_v10, %v1498_v49  ;;  %v1630_v11 = vmul.f32 %v1628_v30, %v3990_v14  ;;  %v1669_v5 = vmul.f32 %v1668_v61, %v3951_v40  ;;  %v1684_v46 = vstv %s4091_s11  ;;  %s2762_s11 = smov 110  }
 0x1e5   : > { %v1545_v38 = vadd.f32 %v1543_v45, %v1537_v16  ;;  %v1638_v10 = vmul.f32 %v1636_v59, %v3992_v35  ;;  %v1677_v60 = vmul.f32 %v1676_v41, %v3953_v12  ;;  %v1692_v16 = vstv %s4096_s12  ;;  %v1759_v12 = vld [vmem:[#allocation7] ss:$4 sm:$0xff]  ;;  %s2763_s12 = smov 107  }
 0x1e6   : > { %v1514_v52 = vadd.f32 %v1512_v0, %v1506_v2  ;;  %v1646_v15 = vmul.f32 %v1644_v55, %v3994_v43  ;;  %v1685_v40 = vmul.f32 %v1684_v46, %v3961_v31  ;;  %v1700_v2 = vstv %s4101_s13  ;;  %s2764_s13 = smov 104  }
 0x1e7   : > { %v1553_v54 = vadd.f32 %v1551_v57, %v1545_v38  ;;  %v1654_v35 = vmul.f32 %v1652_v48, %v3996_v50  ;;  %v1693_v57 = vmul.f32 %v1692_v16, %v3963_v62  ;;  %v1762_v42 = vstv %s4106_s22  ;;  %v4344_v48 = vld [vmem:[#allocation16_spill] sm:$0xff]  ;;  %s2766_s22 = smov 98  }
 0x1e8   : > { %v1522_v27 = vadd.f32 %v1520_v51, %v1514_v52  ;;  %v1662_v43 = vmul.f32 %v1660_v36, %v4003_v29  ;;  %v1701_v31 = vmul.f32 %v1700_v2, %v3965_v39  ;;  %v1670_v30 = vmul.f32 %v1668_v61, %v4005_v26 }
 0x1e9   : > { %v1561_v8 = vadd.f32 %v1559_v47, %v1553_v54  ;;  %v1767_v54 = vld [vmem:[#allocation7 + $0x1] ss:$4 sm:$0xff]  ;;  %v1770_v47 = vstv %s4111_s23  ;;  %v1678_v29 = vmul.f32 %v1676_v41, %v4008_v32  ;;  %v1694_v32 = vmul.f32 %v1692_v16, %v4344_v48  ;;  %v1784_v16 = vld [vmem:[#allocation7 + $0x23] ss:$4 sm:$0x7f]  ;;  %s2767_s23 = smov 95  }
 0x1ea   : > { %v1530_v7 = vadd.f32 %v1528_v34, %v1522_v27  ;;  %v1763_v27 = vmul.f32 %v1762_v42, %v1759_v12  ;;  %v1775_v34 = vld [vmem:[#allocation7 + $0x2] ss:$4 sm:$0xff]  ;;  %v1771_v39 = vmul.f32 %v1770_v47, %v1767_v54  ;;  %v1802_v36 = vstv %s4131_s28  ;;  %s2585_s28 = sld [smem:[#allocation10 + $0x4]] }
 0x1eb   : > { %v1623_v58 = vadd.f32 %v1621_v19, %v1561_v8  ;;  %v1778_v8 = vstv %s4116_s24  ;;  %v1842_v54 = vstv %s4151_s8  ;;  %s2768_s24 = smov 92   ;;  %vm1972_vm3 = vcmask 113664   ;;  %s2593_s8 = sld [smem:[#allocation10 + $0x102]] }
 0x1ec   : > { %v1538_v18 = vadd.f32 %v1536_v1, %v1530_v7  ;;  %v1783_v7 = vld [vmem:[#allocation7 + $0x3] ss:$4 sm:$0xff]  ;;  %v1786_v1 = vstv %s4121_s25  ;;  %s2769_s25 = smov 89   ;;  %vm1977_vm5 = vcmask 120832  }
 0x1ed   : > { %v1631_v25 = vadd.f32 %v1629_v20, %v1623_v58  ;;  %v4343_v20 = vld [vmem:[#allocation15_spill] sm:$0xff] }
 0x1ee   : > { %v1546_v21 = vadd.f32 %v1544_v4, %v1538_v18  ;;  %v1686_v26 = vmul.f32 %v1684_v46, %v4343_v20  ;;  %v1779_v18 = vmul.f32 %v1778_v8, %v1775_v34  ;;  %v1791_v4 = vld [vmem:[#allocation7 + $0x4] ss:$4 sm:$0xff]  ;;  %v1818_v46 = vstv %s4139_s30  ;;  %s2588_s30 = sld [smem:[#allocation10 + $0x82]] }
 0x1ef   : > { %v1639_v24 = vadd.f32 %v1637_v17, %v1631_v25  ;;  %v1794_v25 = vstv %s4126_s27  ;;  %s2770_s27 = smov 86  }
 0x1f0   : > { %v1554_v53 = vadd.f32 %v1552_v33, %v1546_v21  ;;  %v1787_v33 = vmul.f32 %v1786_v1, %v1783_v7  ;;  %v1795_v61 = vmul.f32 %v1794_v25, %v1791_v4 }
 0x1f1   : > { %v1647_v13 = vadd.f32 %v1645_v3, %v1639_v24  ;;  %v1760_v24 = vld [vmem:[#allocation7 + $0x20] ss:$4 sm:$0x7f]  ;;  %v1799_v3 = vld [vmem:[#allocation7 + $0x5] ss:$4 sm:$0xff] }
 0x1f2   : > { %v1562_v23 = vadd.f32 %v1560_v22, %v1554_v53  ;;  %v4345_v22 = vld [vmem:[#allocation17_spill] sm:$0xff]  ;;  %v1764_v41 = vmul.f32 %v1762_v42, %v1760_v24  ;;  %v1788_v42 = vmul.f32 %v1786_v1, %v1784_v16  ;;  %v4346_v24 = vmov 0.0  }
 0x1f3   : > { %v1655_v44 = vadd.f32 %v1653_v37, %v1647_v13  ;;  %v1702_v13 = vmul.f32 %v1700_v2, %v4345_v22  ;;  %v1824_v1 = vld [vmem:[#allocation7 + $0x28] ss:$4 sm:$0x7f]  ;;  %2052 = vst.msk [vmem:[#allocation4] sm:$0xff] %vm1963_vm6, %v4346_v24 }
 0x1f4   : > { %v1624_v6 = vadd.f32 %v1622_v56, %v1562_v23  ;;  %v1768_v23 = vld [vmem:[#allocation7 + $0x21] ss:$4 sm:$0x7f]  ;;  %v1807_v56 = vld [vmem:[#allocation7 + $0x6] ss:$4 sm:$0xff] }
 0x1f5   : > { %v1663_v9 = vadd.f32 %v1661_v63, %v1655_v44  ;;  %v1810_v44 = vstv %s4135_s29  ;;  %s2584_s29 = sld [smem:[#allocation10 + $0x3]] }
 0x1f6   : > { %v1632_v49 = vadd.f32 %v1630_v11, %v1624_v6  ;;  %v1803_v11 = vmul.f32 %v1802_v36, %v1799_v3 }
 0x1f7   : > { %v1671_v28 = vadd.f32 %v1669_v5, %v1663_v9  ;;  %v1776_v9 = vld [vmem:[#allocation7 + $0x22] ss:$4 sm:$0x7f]  ;;  %v1815_v5 = vld [vmem:[#allocation7 + $0x7] ss:$4 sm:$0xff] }
 0x1f8   : > { %v1640_v45 = vadd.f32 %v1638_v10, %v1632_v49  ;;  %v1772_v10 = vmul.f32 %v1770_v47, %v1768_v23 }
 0x1f9   : > { %v1679_v14 = vadd.f32 %v1677_v60, %v1671_v28  ;;  %v1811_v60 = vmul.f32 %v1810_v44, %v1807_v56 }
 0x1fa   : > { %v1648_v0 = vadd.f32 %v1646_v15, %v1640_v45  ;;  %v1823_v45 = vld [vmem:[#allocation7 + $0x8] ss:$4 sm:$0xff]  ;;  %v1826_v15 = vstv %s4143_s5  ;;  %s2587_s5 = sld [smem:[#allocation10 + $0x81]] }
 0x1fb   : > { %v1687_v38 = vadd.f32 %v1685_v40, %v1679_v14  ;;  %v1780_v40 = vmul.f32 %v1778_v8, %v1776_v9  ;;  %v1828_v4 = vmul.f32 %v1826_v15, %v1824_v1 }
 0x1fc   : > { %v1656_v52 = vadd.f32 %v1654_v35, %v1648_v0  ;;  %v1819_v0 = vmul.f32 %v1818_v46, %v1815_v5  ;;  %v1792_v35 = vld [vmem:[#allocation7 + $0x24] ss:$4 sm:$0x7f] }
 0x1fd   : > { %v1695_v51 = vadd.f32 %v1693_v57, %v1687_v38  ;;  %v1831_v38 = vld [vmem:[#allocation7 + $0x9] ss:$4 sm:$0xff]  ;;  %v1834_v57 = vstv %s4147_s7  ;;  %s2590_s7 = sld [smem:[#allocation10 + $0x84]] }
 0x1fe   : > { %v1664_v50 = vadd.f32 %v1662_v43, %v1656_v52  ;;  %v1827_v43 = vmul.f32 %v1826_v15, %v1823_v45 }
 0x1ff   : > { %v1703_v62 = vadd.f32 %v1701_v31, %v1695_v51  ;;  %v1800_v51 = vld [vmem:[#allocation7 + $0x25] ss:$4 sm:$0x7f]  ;;  %v1839_v31 = vld [vmem:[#allocation7 + $0xa] ss:$4 sm:$0xff] }
 0x200   : > { %v1672_v19 = vadd.f32 %v1670_v30, %v1664_v50  ;;  %v1796_v50 = vmul.f32 %v1794_v25, %v1792_v35  ;;  %v1840_v25 = vld [vmem:[#allocation7 + $0x2a] ss:$4 sm:$0x7f] }
 0x201   : > { %v1765_v59 = vadd.f32 %v1763_v27, %v1703_v62  ;;  %v1835_v62 = vmul.f32 %v1834_v57, %v1831_v38  ;;  %v1808_v27 = vld [vmem:[#allocation7 + $0x26] ss:$4 sm:$0x7f] }
 0x202   : > { %v1680_v58 = vadd.f32 %v1678_v29, %v1672_v19  ;;  %v1804_v19 = vmul.f32 %v1802_v36, %v1800_v51  ;;  %v1843_v29 = vmul.f32 %v1842_v54, %v1839_v31  ;;  %v1812_v7 = vmul.f32 %v1810_v44, %v1808_v27 }
 0x203   : > { %v1773_v55 = vadd.f32 %v1771_v39, %v1765_v59  ;;  %v1816_v59 = vld [vmem:[#allocation7 + $0x27] ss:$4 sm:$0x7f] }
 0x204   : > { %v1688_v17 = vadd.f32 %v1686_v26, %v1680_v58  ;;  %v1820_v26 = vmul.f32 %v1818_v46, %v1816_v59 }
 0x205   : > { %v1781_v21 = vadd.f32 %v1779_v18, %v1773_v55  ;;  %v1832_v55 = vld [vmem:[#allocation7 + $0x29] ss:$4 sm:$0x7f] }
 0x206   : > { %v1696_v53 = vadd.f32 %v1694_v32, %v1688_v17  ;;  %v1836_v48 = vmul.f32 %v1834_v57, %v1832_v55 }
 0x207   : > { %v1789_v37 = vadd.f32 %v1787_v33, %v1781_v21  ;;  %v1844_v21 = vmul.f32 %v1842_v54, %v1840_v25 }
 0x208   : > { %v1704_v63 = vadd.f32 %v1702_v13, %v1696_v53 }
 0x209   : > { %v1797_v6 = vadd.f32 %v1795_v61, %v1789_v37 }
 0x20a   : > { %v1766_v49 = vadd.f32 %v1764_v41, %v1704_v63 }
 0x20b   : > { %v1805_v28 = vadd.f32 %v1803_v11, %v1797_v6 }
 0x20c   : > { %v1774_v14 = vadd.f32 %v1772_v10, %v1766_v49 }
 0x20d   : > { %v1813_v2 = vadd.f32 %v1811_v60, %v1805_v28 }
 0x20e   : > { %v1782_v12 = vadd.f32 %v1780_v40, %v1774_v14 }
 0x20f   : > { %v1821_v52 = vadd.f32 %v1819_v0, %v1813_v2 }
 0x210   : > { %v1790_v47 = vadd.f32 %v1788_v42, %v1782_v12 }
 0x211   : > { %v1829_v30 = vadd.f32 %v1827_v43, %v1821_v52 }
 0x212   : > { %v1798_v34 = vadd.f32 %v1796_v50, %v1790_v47 }
 0x213   : > { %v1837_v8 = vadd.f32 %v1835_v62, %v1829_v30 }
 0x214   : > { %v1806_v39 = vadd.f32 %v1804_v19, %v1798_v34 }
 0x215   : > { %v4157_v58 = vadd.f32 %v1843_v29, %v1837_v8 }
 0x216   : > { %v1814_v20 = vadd.f32 %v1812_v7, %v1806_v39 }
 0x217   : > { %1849 = vrot.lane.b32.xlu0 %v4157_v58, %s2752_s18 }
 0x218   : > { %v1822_v18 = vadd.f32 %v1820_v26, %v1814_v20 }
 0x21a   : > { %v1830_v17 = vadd.f32 %v1828_v4, %v1822_v18 }
 0x21b   : > { %1855 = vrot.lane.b32.xlu0 %v4157_v58, %s2755_s26 }
 0x21c   : > { %v1838_v32 = vadd.f32 %v1836_v48, %v1830_v17 }
 0x21e   : > { %v4163_v33 = vadd.f32 %v1844_v21, %v1838_v32 }
 0x21f   : > { %1861 = vrot.lane.b32.xlu0 %v4157_v58, %s2758_s6 }
 0x220   : > { %1851 = vrot.lane.b32.xlu1 %v4163_v33, %s2752_s18 }
 0x223   : > { %1867 = vrot.lane.b32.xlu0 %v4157_v58, %s2760_s9 }
 0x224   : > { %1857 = vrot.lane.b32.xlu1 %v4163_v33, %s2755_s26 }
 0x227   : > { %1873 = vrot.lane.b32.xlu0 %v4157_v58, %s2761_s10 }
 0x228   : > { %1863 = vrot.lane.b32.xlu1 %v4163_v33, %s2758_s6  ;;  %s2765_s6 = smov 101  }
 0x22b   : > { %1879 = vrot.lane.b32.xlu0 %v4157_v58, %s2762_s11 }
 0x22c   : > { %1869 = vrot.lane.b32.xlu1 %v4163_v33, %s2760_s9  ;;  %s2592_s9 = sld [smem:[#allocation10 + $0x101]] }
 0x22f   : > { %1885 = vrot.lane.b32.xlu0 %v4157_v58, %s2763_s12 }
 0x230   : > { %1875 = vrot.lane.b32.xlu1 %v4163_v33, %s2761_s10  ;;  %s2595_s10 = sld [smem:[#allocation10 + $0x104]] }
 0x233   : > { %1891 = vrot.lane.b32.xlu0 %v4157_v58, %s2764_s13 }
 0x234   : > { %1881 = vrot.lane.b32.xlu1 %v4163_v33, %s2762_s11  ;;  %s2594_s11 = sld [smem:[#allocation10 + $0x103]] }
 0x237   : > { %1897 = vrot.lane.b32.xlu0 %v4157_v58, %s2765_s6 }
 0x238   : > { %1887 = vrot.lane.b32.xlu1 %v4163_v33, %s2763_s12  ;;  %s2598_s12 = sld [smem:[#allocation10 + $0x182]] }
 0x23b   : > { %1903 = vrot.lane.b32.xlu0 %v4157_v58, %s2766_s22 }
 0x23c   : > { %1893 = vrot.lane.b32.xlu1 %v4163_v33, %s2764_s13  ;;  %s2597_s13 = sld [smem:[#allocation10 + $0x181]] }
 0x23f   : > { %1909 = vrot.lane.b32.xlu0 %v4157_v58, %s2767_s23 }
 0x240   : > { %1899 = vrot.lane.b32.xlu1 %v4163_v33, %s2765_s6  ;;  %s2600_s6 = sld [smem:[#allocation10 + $0x184]] }
 0x243   : > { %1915 = vrot.lane.b32.xlu0 %v4157_v58, %s2768_s24 }
 0x244   : > { %1905 = vrot.lane.b32.xlu1 %v4163_v33, %s2766_s22  ;;  %s2599_s22 = sld [smem:[#allocation10 + $0x183]] }
 0x247   : > { %1921 = vrot.lane.b32.xlu0 %v4157_v58, %s2769_s25 }
 0x248   : > { %1911 = vrot.lane.b32.xlu1 %v4163_v33, %s2767_s23  ;;  %s2603_s23 = sld [smem:[#allocation10 + $0x202]] }
 0x24b   : > { %1927 = vrot.lane.b32.xlu0 %v4157_v58, %s2770_s27 }
 0x24c   : > { %1917 = vrot.lane.b32.xlu1 %v4163_v33, %s2768_s24  ;;  %s2602_s24 = sld [smem:[#allocation10 + $0x201]] }
 0x250   : > { %1923 = vrot.lane.b32.xlu1 %v4163_v33, %s2769_s25  ;;  %s2605_s25 = sld [smem:[#allocation10 + $0x204]] }
 0x254   : > { %1929 = vrot.lane.b32.xlu1 %v4163_v33, %s2770_s27  ;;  %s2604_s27 = sld [smem:[#allocation10 + $0x203]] }
 0x289   : > { %v1850_v3 = vpop.permute.xlu0 %1849 }
 0x28a   : > { %v1934_v10 = vsel %vm1933_vm7, %v4157_v58, %v1850_v3 }
 0x28d   : > { %v1856_v36 = vpop.permute.xlu0 %1855 }
 0x28e   : > { %v1937_v60 = vsel %vm1936_vm8, %v1934_v10, %v1856_v36 }
 0x291   : > { %v1862_v53 = vpop.permute.xlu0 %1861 }
 0x292   : > { %v1852_v22 = vpop.permute.xlu1 %1851  ;;  %v1940_v45 = vsel %vm1939_vm9, %v1937_v60, %v1862_v53 }
 0x293   : > { %v1935_v42 = vsel %vm1933_vm7, %v4163_v33, %v1852_v22 }
 0x295   : > { %v1868_v13 = vpop.permute.xlu0 %1867 }
 0x296   : > { %v1858_v37 = vpop.permute.xlu1 %1857  ;;  %v1943_v15 = vsel %vm1942_vm10, %v1940_v45, %v1868_v13 }
 0x297   : > { %v1938_v51 = vsel %vm1936_vm8, %v1935_v42, %v1858_v37 }
 0x299   : > { %v1874_v61 = vpop.permute.xlu0 %1873 }
 0x29a   : > { %v1864_v23 = vpop.permute.xlu1 %1863  ;;  %v1946_v14 = vsel %vm1945_vm11, %v1943_v15, %v1874_v61 }
 0x29b   : > { %v1941_v54 = vsel %vm1939_vm9, %v1938_v51, %v1864_v23 }
 0x29d   : > { %v1880_v56 = vpop.permute.xlu0 %1879 }
 0x29e   : > { %v1870_v44 = vpop.permute.xlu1 %1869  ;;  %v1949_v2 = vsel %vm1948_vm12, %v1946_v14, %v1880_v56 }
 0x29f   : > { %v1944_v50 = vsel %vm1942_vm10, %v1941_v54, %v1870_v44  ;;  %v2091_v54 = vstv %s2585_s28  ;;  %s2591_s28 = sld [smem:[#allocation10 + $0x100]] }
 0x2a1   : > { %v1886_v63 = vpop.permute.xlu0 %1885 }
 0x2a2   : > { %v1876_v41 = vpop.permute.xlu1 %1875  ;;  %v1952_v35 = vsel %vm1951_vm13, %v1949_v2, %v1886_v63 }
 0x2a3   : > { %v1947_v27 = vsel %vm1945_vm11, %v1944_v50, %v1876_v41 }
 0x2a5   : > { %v1892_v6 = vpop.permute.xlu0 %1891 }
 0x2a6   : > { %v1882_v11 = vpop.permute.xlu1 %1881  ;;  %v1955_v38 = vsel %vm1954_vm14, %v1952_v35, %v1892_v6 }
 0x2a7   : > { %v1950_v8 = vsel %vm1948_vm12, %v1947_v27, %v1882_v11  ;;  %v2112_v27 = vstv %s2588_s30  ;;  %s2607_s30 = sld [smem:[#allocation12 + $0x2]] }
 0x2a9   : > { %v1898_v9 = vpop.permute.xlu0 %1897 }
 0x2aa   : > { %v1888_v5 = vpop.permute.xlu1 %1887  ;;  %v1958_v57 = vsel %vm1957_vm15, %v1955_v38, %v1898_v9 }
 0x2ab   : > { %v1953_v29 = vsel %vm1951_vm13, %v1950_v8, %v1888_v5  ;;  %vm1982_vm13 = vcmask 104448  }
 0x2ad   : > { %v1904_v46 = vpop.permute.xlu0 %1903 }
 0x2ae   : > { %v1894_v49 = vpop.permute.xlu1 %1893  ;;  %v1961_v52 = vsel %vm1960_vm0, %v1958_v57, %v1904_v46 }
 0x2af   : > { %v1956_v59 = vsel %vm1954_vm14, %v1953_v29, %v1894_v49  ;;  %vm2059_vm14 = vcmask 71696   ;;  %v2128_v29 = vstv %s2590_s7  ;;  %s2610_s7 = sld [smem:[#allocation12 + $0x82]] }
 0x2b1   : > { %v1910_v28 = vpop.permute.xlu0 %1909 }
 0x2b2   : > { %v1900_v16 = vpop.permute.xlu1 %1899  ;;  %v1964_v31 = vsel %vm1963_vm6, %v1961_v52, %v1910_v28 }
 0x2b3   : > { %v1959_v39 = vsel %vm1957_vm15, %v1956_v59, %v1900_v16 }
 0x2b5   : > { %v1916_v40 = vpop.permute.xlu0 %1915 }
 0x2b6   : > { %v1906_v0 = vpop.permute.xlu1 %1905  ;;  %v1967_v47 = vsel %vm1966_vm1, %v1964_v31, %v1916_v40 }
 0x2b7   : > { %v1962_v58 = vsel %vm1960_vm0, %v1959_v39, %v1906_v0 }
 0x2b9   : > { %v1922_v12 = vpop.permute.xlu0 %1921 }
 0x2ba   : > { %v1912_v43 = vpop.permute.xlu1 %1911  ;;  %v1970_v30 = vsel %vm1969_vm2, %v1967_v47, %v1922_v12  ;;  %v2083_v47 = vstv %s2584_s29  ;;  %s2771_s29 = smov 1  }
 0x2bb   : > { %v1965_v1 = vsel %vm1963_vm6, %v1962_v58, %v1912_v43  ;;  %vm2053_vm6 = vcmask 83968  }
 0x2bc   : > { %2054 = vst.msk [vmem:[#allocation4 + $0x8] sm:$0x7] %vm2053_vm6, %v4346_v24 }
 0x2bd   : > { %v1928_v62 = vpop.permute.xlu0 %1927 }
 0x2be   : > { %v1918_v34 = vpop.permute.xlu1 %1917  ;;  %v1973_v19 = vsel %vm1972_vm3, %v1970_v30, %v1928_v62 }
 0x2bf   : > { %1976 = vst.msk [vmem:[#allocation3] sm:$0xff] %vm1975_vm4, %v1973_v19  ;;  %v1968_v20 = vsel %vm1966_vm1, %v1965_v1, %v1918_v34  ;;  %v2104_v34 = vstv %s2587_s5  ;;  %v2149_v1 = vstv %s2593_s8  ;;  %s2606_s5 = sld [smem:[#allocation12 + $0x1]] }
 0x2c0   : > { %s2613_s8 = sld [smem:[#allocation12 + $0x102]] }
 0x2c2   : > { %v1924_v7 = vpop.permute.xlu1 %1923 }
 0x2c3   : > { %v1971_v55 = vsel %vm1969_vm2, %v1968_v20, %v1924_v7  ;;  %v2141_v20 = vstv %s2592_s9  ;;  %s2612_s9 = sld [smem:[#allocation12 + $0x101]] }
 0x2c6   : > { %v1979_v26 = vld [vmem:[#allocation3] sm:$0xff]  ;;  %v1930_v18 = vpop.permute.xlu1 %1929 }
 0x2c7   : > { %1981 = vst.msk [vmem:[#allocation7] sm:$0xff] %vm1969_vm2, %v1979_v26  ;;  %v1974_v4 = vsel %vm1972_vm3, %v1971_v55, %v1930_v18  ;;  %1994 = vrot.lane.b32.xlu0 %v1979_v26, %s2750_s16  ;;  %v2165_v18 = vstv %s2595_s10  ;;  %s2300_s10 = sld [smem:[#allocation12]] }
 0x2c8   : > { %1978 = vst.msk [vmem:[#allocation3 + $0x8] sm:$0x7f] %vm1977_vm5, %v1974_v4  ;;  %v2157_v4 = vstv %s2594_s11  ;;  %s2608_s11 = sld [smem:[#allocation12 + $0x80]] }
 0x2cb   : > { %2012 = vrot.lane.b32.xlu0 %v1979_v26, %s2751_s17 }
 0x2cf   : > { %v1980_v25 = vld [vmem:[#allocation3 + $0x8] sm:$0x7f] }
 0x2d0   : > { %v1991_v17 = vld [vmem:[#allocation3 + $0x8] sm:$0x7f]  ;;  %1983 = vst.msk [vmem:[#allocation7 + $0x8] sm:$0x7f] %vm1982_vm13, %v1980_v25 }
 0x2d1   : > { %1996 = vrot.lane.b32.xlu1 %v1991_v17, %s2750_s16  ;;  %v2009_v48 = vld [vmem:[#allocation3 + $0x8] sm:$0x7f] }
 0x2d5   : > { %2014 = vrot.lane.b32.xlu1 %v2009_v48, %s2751_s17 }
 0x2d7   : > { %v1984_v32 = vld [vmem:[#allocation7] ss:$2 sm:$0x7f]  ;;  %v1986_v33 = vld [vmem:[#allocation7 + $0x1] ss:$2 sm:$0x7f] }
 0x2d8   : > { %v1988_v3 = vld [vmem:[#allocation7 + $0x2] ss:$2 sm:$0x7f]  ;;  %v1987_v53 = vadd.f32 %v1986_v33, %v1984_v32  ;;  %v2186_v32 = vstv %s2598_s12  ;;  %s2611_s12 = sld [smem:[#allocation12 + $0x100]] }
 0x2da   : > { %v1989_v22 = vadd.f32 %v1988_v3, %v1987_v53  ;;  %v2194_v53 = vstv %s2599_s22 }
 0x339   : > { %v1995_v21 = vpop.permute.xlu0 %1994 }
 0x33a   : > { %2000 = vst.msk [vmem:[#allocation7] sm:$0xff] %vm1969_vm2, %v1995_v21  ;;  %v2178_v21 = vstv %s2597_s13 }
 0x33d   : > { %v2013_v61 = vpop.permute.xlu0 %2012 }
 0x343   : > { %v1997_v36 = vpop.permute.xlu1 %1996 }
 0x344   : > { %2001 = vst.msk [vmem:[#allocation7 + $0x8] sm:$0x7f] %vm1982_vm13, %v1997_v36  ;;  %v2202_v36 = vstv %s2600_s6 }
 0x347   : > { %v2015_v23 = vpop.permute.xlu1 %2014 }
 0x34b   : > { %v2002_v13 = vld [vmem:[#allocation7] ss:$2 sm:$0x7f]  ;;  %v2004_v37 = vld [vmem:[#allocation7 + $0x1] ss:$2 sm:$0x7f] }
 0x34c   : > { %v2003_v56 = vadd.f32 %v2002_v13, %v1989_v22  ;;  %v2006_v44 = vld [vmem:[#allocation7 + $0x2] ss:$2 sm:$0x7f] }
 0x34d   : > { %2018 = vst.msk [vmem:[#allocation7] sm:$0xff] %vm1969_vm2, %v2013_v61  ;;  %v2223_v61 = vstv %s2603_s23 }
 0x34e   : > { %2019 = vst.msk [vmem:[#allocation7 + $0x8] sm:$0x7f] %vm1982_vm13, %v2015_v23  ;;  %v2005_v63 = vadd.f32 %v2004_v37, %v2003_v56  ;;  %v2215_v23 = vstv %s2602_s24 }
 0x350   : > { %v2007_v41 = vadd.f32 %v2006_v44, %v2005_v63  ;;  %v2239_v63 = vstv %s2605_s25 }
 0x355   : > { %v2020_v6 = vld [vmem:[#allocation7] ss:$2 sm:$0x7f]  ;;  %v2022_v9 = vld [vmem:[#allocation7 + $0x1] ss:$2 sm:$0x7f] }
 0x356   : > { %v2021_v11 = vadd.f32 %v2020_v6, %v2007_v41  ;;  %v2024_v46 = vld [vmem:[#allocation7 + $0x2] ss:$2 sm:$0x7f]  ;;  %v2231_v41 = vstv %s2604_s27 }
 0x358   : > { %v2023_v5 = vadd.f32 %v2022_v9, %v2021_v11 }
 0x35a   : > { %v2025_v49 = vadd.f32 %v2024_v46, %v2023_v5 }
 0x35c   : > { %2030 = vrot.lane.b32.xlu1 %v2025_v49, %s2751_s17  ;;  %2027 = vrot.lane.b32.xlu0 %v2025_v49, %s2750_s16 }
 0x360   : > { %2036 = vrot.lane.b32.xlu1 %v2025_v49, %s2753_s20  ;;  %2033 = vrot.lane.b32.xlu0 %v2025_v49, %s2752_s18 }
 0x364   : > { %2042 = vrot.lane.b32.xlu1 %v2025_v49, %s2755_s26  ;;  %2039 = vrot.lane.b32.xlu0 %v2025_v49, %s2754_s21  ;;  %s2583_s21 = sld [smem:[#allocation10 + $0x2]] }
 0x365   : > { %s2582_s26 = sld [smem:[#allocation10 + $0x1]] }
 0x36a   : > { %v2075_v42 = vstv %s2583_s21  ;;  %s2062_s21 = sld [smem:[#allocation10]] }
 0x36b   : > { %v2067_v52 = vstv %s2582_s26  ;;  %s2586_s26 = sld [smem:[#allocation10 + $0x80]] }
 0x370   : > { %v2063_v9 = vstv %s2062_s21 }
 0x3ce   : > { %v2031_v10 = vpop.permute.xlu1 %2030  ;;  %v2028_v28 = vpop.permute.xlu0 %2027 }
 0x3cf   : > { %v2045_v60 = vsel %vm1933_vm7, %v2025_v49, %v2028_v28 }
 0x3d0   : > { %v2046_v45 = vsel %vm1936_vm8, %v2045_v60, %v2031_v10 }
 0x3d2   : > { %v2037_v16 = vpop.permute.xlu1 %2036  ;;  %v2034_v15 = vpop.permute.xlu0 %2033 }
 0x3d3   : > { %v2047_v14 = vsel %vm1939_vm9, %v2046_v45, %v2034_v15  ;;  %v2100_v45 = vstv %s2586_s26  ;;  %vm2246_vm9 = vcmask 55296  }
 0x3d4   : > { %v2048_v2 = vsel %vm1942_vm10, %v2047_v14, %v2037_v16  ;;  %vm2249_vm10 = vcmask 38912  }
 0x3d6   : > { %v2043_v40 = vpop.permute.xlu1 %2042  ;;  %v2040_v0 = vpop.permute.xlu0 %2039 }
 0x3d7   : > { %v2049_v35 = vsel %vm1945_vm11, %v2048_v2, %v2040_v0  ;;  %vm2291_vm11 = vcmask 36864  }
 0x3d8   : > { %v2050_v38 = vsel %vm1948_vm12, %v2049_v35, %v2043_v40  ;;  %2292 = vst.msk [vmem:[#allocation6] sm:$0x1f] %vm2291_vm11, %v4346_v24  ;;  %vm2297_vm12 = vcmask 26632  }
 0x3d9   : > { %v2051_v57 = vmul.f32 0.11111111, %v2050_v38 }
 0x3db   : > { %2056 = vrot.lane.b32.xlu0 %v2051_v57, %s2749_s14  ;;  %s2589_s14 = sld [smem:[#allocation10 + $0x83]] }
 0x3e1   : > { %v2120_v59 = vstv %s2589_s14  ;;  %s2609_s14 = sld [smem:[#allocation12 + $0x81]] }
 0x44d   : > { %v2057_v12 = vpop.permute.xlu0 %2056 }
 0x44e   : > { %2060 = vst.msk [vmem:[#allocation4 + $0x2] sm:$0x7f] %vm2059_vm14, %v2057_v12 }
 0x455   : > { %v4251_v43 = vld [vmem:[#allocation4] sm:$0x7f] }
 0x456   : > { %v2076_v51 = vmul.f32 %v2075_v42, %v4251_v43  ;;  %v2068_v31 = vmul.f32 %v2067_v52, %v4251_v43  ;;  %v2092_v50 = vmul.f32 %v2091_v54, %v4251_v43  ;;  %v2084_v30 = vmul.f32 %v2083_v47, %v4251_v43  ;;  %v4259_v62 = vld [vmem:[#allocation4 + $0x1] sm:$0x7f] }
 0x457   : > { %v2113_v19 = vmul.f32 %v2112_v27, %v4259_v62  ;;  %v2105_v8 = vmul.f32 %v2104_v34, %v4259_v62  ;;  %v2129_v39 = vmul.f32 %v2128_v29, %v4259_v62  ;;  %v2121_v7 = vmul.f32 %v2120_v59, %v4259_v62  ;;  %v4269_v58 = vld [vmem:[#allocation4 + $0x2] sm:$0x7f] }
 0x458   : > { %2078 = vrot.lane.b32.xlu0 %v2076_v51, %s2751_s17  ;;  %2070 = vrot.lane.b32.xlu1 %v2068_v31, %s2750_s16  ;;  %v2150_v26 = vmul.f32 %v2149_v1, %v4269_v58  ;;  %v2142_v55 = vmul.f32 %v2141_v20, %v4269_v58  ;;  %v2166_v25 = vmul.f32 %v2165_v18, %v4269_v58  ;;  %v4279_v48 = vld [vmem:[#allocation4 + $0x3] sm:$0x7f]  ;;  %v2137_v52 = vstv %s2591_s28 }
 0x459   : > { %v2158_v17 = vmul.f32 %v2157_v4, %v4269_v58  ;;  %v2187_v33 = vmul.f32 %v2186_v32, %v4279_v48  ;;  %v2179_v3 = vmul.f32 %v2178_v21, %v4279_v48  ;;  %v2203_v22 = vmul.f32 %v2202_v36, %v4279_v48  ;;  %v4289_v37 = vld [vmem:[#allocation4 + $0x4] sm:$0x7f] }
 0x45a   : > { %v2195_v13 = vmul.f32 %v2194_v53, %v4279_v48  ;;  %v2224_v56 = vmul.f32 %v2223_v61, %v4289_v37  ;;  %v2216_v44 = vmul.f32 %v2215_v23, %v4289_v37  ;;  %v2240_v6 = vmul.f32 %v2239_v63, %v4289_v37 }
 0x45b   : > { %v2232_v11 = vmul.f32 %v2231_v41, %v4289_v37  ;;  %v2064_v5 = vmul.f32 %v2063_v9, %v4251_v43  ;;  %v2101_v40 = vmul.f32 %v2100_v45, %v4259_v62  ;;  %v2138_v47 = vmul.f32 %v2137_v52, %v4269_v58 }
 0x45c   : > { %2094 = vrot.lane.b32.xlu0 %v2092_v50, %s2753_s20  ;;  %2086 = vrot.lane.b32.xlu1 %v2084_v30, %s2752_s18  ;;  %v2305_v52 = vstv %s2606_s5 }
 0x460   : > { %2115 = vrot.lane.b32.xlu0 %v2113_v19, %s2751_s17  ;;  %2107 = vrot.lane.b32.xlu1 %v2105_v8, %s2750_s16 }
 0x464   : > { %2131 = vrot.lane.b32.xlu0 %v2129_v39, %s2753_s20  ;;  %2123 = vrot.lane.b32.xlu1 %v2121_v7, %s2752_s18 }
 0x468   : > { %2152 = vrot.lane.b32.xlu0 %v2150_v26, %s2751_s17  ;;  %2144 = vrot.lane.b32.xlu1 %v2142_v55, %s2750_s16 }
 0x46c   : > { %2168 = vrot.lane.b32.xlu0 %v2166_v25, %s2753_s20  ;;  %2160 = vrot.lane.b32.xlu1 %v2158_v17, %s2752_s18 }
 0x470   : > { %2189 = vrot.lane.b32.xlu0 %v2187_v33, %s2751_s17  ;;  %2181 = vrot.lane.b32.xlu1 %v2179_v3, %s2750_s16 }
 0x474   : > { %2205 = vrot.lane.b32.xlu0 %v2203_v22, %s2753_s20  ;;  %2197 = vrot.lane.b32.xlu1 %v2195_v13, %s2752_s18 }
 0x478   : > { %2226 = vrot.lane.b32.xlu0 %v2224_v56, %s2751_s17  ;;  %2218 = vrot.lane.b32.xlu1 %v2216_v44, %s2750_s16 }
 0x47c   : > { %2242 = vrot.lane.b32.xlu0 %v2240_v6, %s2753_s20  ;;  %2234 = vrot.lane.b32.xlu1 %v2232_v11, %s2752_s18  ;;  %s2596_s18 = sld [smem:[#allocation10 + $0x180]] }
 0x47d   : > { %s2601_s20 = sld [smem:[#allocation10 + $0x200]] }
 0x482   : > { %v2174_v19 = vstv %s2596_s18 }
 0x483   : > { %v2175_v39 = vmul.f32 %v2174_v19, %v4279_v48  ;;  %v2211_v4 = vstv %s2601_s20  ;;  %v2347_v19 = vstv %s2612_s9 }
 0x484   : > { %v2212_v17 = vmul.f32 %v2211_v4, %v4289_v37 }
 0x4ca   : > { %v2079_v46 = vpop.permute.xlu0 %2078  ;;  %v2071_v49 = vpop.permute.xlu1 %2070 }
 0x4cb   : > { %v2073_v10 = vadd.f32 %v2071_v49, %v2064_v5 }
 0x4cd   : > { %v2081_v28 = vadd.f32 %v2079_v46, %v2073_v10 }
 0x4ce   : > { %v2095_v60 = vpop.permute.xlu0 %2094  ;;  %v2087_v16 = vpop.permute.xlu1 %2086 }
 0x4cf   : > { %v2089_v15 = vadd.f32 %v2087_v16, %v2081_v28 }
 0x4d1   : > { %v2097_v14 = vadd.f32 %v2095_v60, %v2089_v15 }
 0x4d2   : > { %v2116_v2 = vpop.permute.xlu0 %2115  ;;  %v2108_v0 = vpop.permute.xlu1 %2107 }
 0x4d3   : > { %v2102_v35 = vadd.f32 %v2101_v40, %v2097_v14 }
 0x4d5   : > { %v2110_v38 = vadd.f32 %v2108_v0, %v2102_v35 }
 0x4d6   : > { %v2132_v57 = vpop.permute.xlu0 %2131  ;;  %v2124_v12 = vpop.permute.xlu1 %2123 }
 0x4d7   : > { %v2118_v42 = vadd.f32 %v2116_v2, %v2110_v38 }
 0x4d9   : > { %v2126_v43 = vadd.f32 %v2124_v12, %v2118_v42  ;;  %v2313_v42 = vstv %s2607_s30 }
 0x4da   : > { %v2153_v51 = vpop.permute.xlu0 %2152  ;;  %v2145_v31 = vpop.permute.xlu1 %2144 }
 0x4db   : > { %v2134_v54 = vadd.f32 %v2132_v57, %v2126_v43 }
 0x4dd   : > { %v2139_v50 = vadd.f32 %v2138_v47, %v2134_v54  ;;  %v2334_v47 = vstv %s2610_s7 }
 0x4de   : > { %v2161_v30 = vpop.permute.xlu1 %2160  ;;  %v2169_v34 = vpop.permute.xlu0 %2168 }
 0x4df   : > { %v2147_v27 = vadd.f32 %v2145_v31, %v2139_v50  ;;  %v2326_v50 = vstv %s2609_s14 }
 0x4e1   : > { %v2155_v62 = vadd.f32 %v2153_v51, %v2147_v27 }
 0x4e2   : > { %v2182_v29 = vpop.permute.xlu1 %2181  ;;  %v2190_v7 = vpop.permute.xlu0 %2189 }
 0x4e3   : > { %v2163_v8 = vadd.f32 %v2161_v30, %v2155_v62  ;;  %v2355_v62 = vstv %s2613_s8 }
 0x4e5   : > { %v2171_v59 = vadd.f32 %v2169_v34, %v2163_v8 }
 0x4e6   : > { %v2198_v26 = vpop.permute.xlu1 %2197  ;;  %v2206_v18 = vpop.permute.xlu0 %2205 }
 0x4e7   : > { %v2176_v1 = vadd.f32 %v2175_v39, %v2171_v59  ;;  %v2301_v59 = vstv %s2300_s10 }
 0x4e9   : > { %v2184_v20 = vadd.f32 %v2182_v29, %v2176_v1  ;;  %v2322_v1 = vstv %s2608_s11 }
 0x4ea   : > { %v2219_v32 = vpop.permute.xlu1 %2218  ;;  %v2227_v33 = vpop.permute.xlu0 %2226 }
 0x4eb   : > { %v2192_v55 = vadd.f32 %v2190_v7, %v2184_v20 }
 0x4ed   : > { %v2200_v58 = vadd.f32 %v2198_v26, %v2192_v55 }
 0x4ee   : > { %v2235_v53 = vpop.permute.xlu1 %2234  ;;  %v2243_v13 = vpop.permute.xlu0 %2242 }
 0x4ef   : > { %v2208_v25 = vadd.f32 %v2206_v18, %v2200_v58 }
 0x4f1   : > { %v2213_v21 = vadd.f32 %v2212_v17, %v2208_v25  ;;  %v2343_v25 = vstv %s2611_s12 }
 0x4f3   : > { %v2221_v3 = vadd.f32 %v2219_v32, %v2213_v21 }
 0x4f5   : > { %v2229_v36 = vadd.f32 %v2227_v33, %v2221_v3 }
 0x4f7   : > { %v2237_v22 = vadd.f32 %v2235_v53, %v2229_v36 }
 0x4f9   : > { %v2245_v48 = vadd.f32 %v2243_v13, %v2237_v22 }
 0x4fb   : > { %2247 = vst.msk [vmem:[#allocation5] sm:$0x7f] %vm2246_vm9, %v2245_v48 }
 0x502   : > { %v2248_v61 = vld [vmem:[#allocation5] sm:$0x7f] }
 0x503   : > { %v2269_v23 = vld [vmem:[#allocation5] sm:$0x7f]  ;;  %2250 = vst.msk [vmem:[#allocation7] sm:$0x7f] %vm2249_vm10, %v2248_v61 }
 0x504   : > { %v2257_v56 = vld [vmem:[#allocation5] sm:$0x7f]  ;;  %2271 = vrot.lane.b32.xlu0 %v2269_v23, %s2751_s17 }
 0x505   : > { %2259 = vrot.lane.b32.xlu1 %v2257_v56, %s2750_s16 }
 0x50a   : > { %v2251_v37 = vld [vmem:[#allocation7] ss:$2 sm:$0x7]  ;;  %v2253_v63 = vld [vmem:[#allocation7 + $0x1] ss:$2 sm:$0x7] }
 0x50b   : > { %v2255_v41 = vld [vmem:[#allocation7 + $0x2] ss:$2 sm:$0x7]  ;;  %v2254_v6 = vadd.f32 %v2253_v63, %v2251_v37 }
 0x50d   : > { %v2256_v11 = vadd.f32 %v2255_v41, %v2254_v6 }
 0x576   : > { %v2272_v46 = vpop.permute.xlu0 %2271 }
 0x577   : > { %v2260_v44 = vpop.permute.xlu1 %2259 }
 0x578   : > { %2262 = vst.msk [vmem:[#allocation7] sm:$0x7f] %vm2249_vm10, %v2260_v44 }
 0x57f   : > { %v2263_v9 = vld [vmem:[#allocation7] ss:$2 sm:$0x7]  ;;  %v2265_v5 = vld [vmem:[#allocation7 + $0x1] ss:$2 sm:$0x7] }
 0x580   : > { %v2264_v49 = vadd.f32 %v2263_v9, %v2256_v11  ;;  %v2267_v10 = vld [vmem:[#allocation7 + $0x2] ss:$2 sm:$0x7] }
 0x581   : > { %2274 = vst.msk [vmem:[#allocation7] sm:$0x7f] %vm2249_vm10, %v2272_v46 }
 0x582   : > { %v2266_v28 = vadd.f32 %v2265_v5, %v2264_v49 }
 0x584   : > { %v2268_v60 = vadd.f32 %v2267_v10, %v2266_v28 }
 0x588   : > { %v2275_v16 = vld [vmem:[#allocation7] ss:$2 sm:$0x7]  ;;  %v2277_v15 = vld [vmem:[#allocation7 + $0x1] ss:$2 sm:$0x7] }
 0x589   : > { %v2276_v45 = vadd.f32 %v2275_v16, %v2268_v60  ;;  %v2279_v40 = vld [vmem:[#allocation7 + $0x2] ss:$2 sm:$0x7] }
 0x58b   : > { %v2278_v14 = vadd.f32 %v2277_v15, %v2276_v45 }
 0x58d   : > { %v2280_v2 = vadd.f32 %v2279_v40, %v2278_v14 }
 0x58f   : > { %2285 = vrot.lane.b32.xlu0 %v2280_v2, %s2751_s17  ;;  %2282 = vrot.lane.b32.xlu1 %v2280_v2, %s2750_s16 }
 0x601   : > { %v2286_v0 = vpop.permute.xlu0 %2285  ;;  %v2283_v35 = vpop.permute.xlu1 %2282 }
 0x602   : > { %v2288_v38 = vsel %vm1933_vm7, %v2280_v2, %v2283_v35  ;;  %vm2362_vm7 = vcmask 18432  }
 0x603   : > { %v2289_v57 = vsel %vm1936_vm8, %v2288_v38, %v2286_v0 }
 0x604   : > { %v2290_v12 = vmul.f32 0.11111111, %v2289_v57 }
 0x606   : > { %2294 = vrot.lane.b32.xlu1 %v2290_v12, %s2771_s29 }
 0x678   : > { %v2295_v24 = vpop.permute.xlu1 %2294 }
 0x679   : > { %2298 = vst.msk [vmem:[#allocation6 + $0x1] sm:$0x7] %vm2297_vm12, %v2295_v24 }
 0x680   : > { %v2299_v43 = vld [vmem:[#allocation6] sm:$0x7] }
 0x681   : > { %v2314_v51 = vmul.f32 %v2313_v42, %v2299_v43  ;;  %v2306_v31 = vmul.f32 %v2305_v52, %v2299_v43  ;;  %v2320_v54 = vld [vmem:[#allocation6 + $0x1] sm:$0x7]  ;;  %v2302_v39 = vmul.f32 %v2301_v59, %v2299_v43 }
 0x682   : > { %v2335_v30 = vmul.f32 %v2334_v47, %v2320_v54  ;;  %v2327_v27 = vmul.f32 %v2326_v50, %v2320_v54  ;;  %v2341_v34 = vld [vmem:[#allocation6 + $0x2] sm:$0x7]  ;;  %v2323_v18 = vmul.f32 %v2322_v1, %v2320_v54 }
 0x683   : > { %2316 = vrot.lane.b32.xlu1 %v2314_v51, %s2751_s17  ;;  %2308 = vrot.lane.b32.xlu0 %v2306_v31, %s2750_s16  ;;  %v2356_v8 = vmul.f32 %v2355_v62, %v2341_v34  ;;  %v2348_v29 = vmul.f32 %v2347_v19, %v2341_v34  ;;  %v2344_v33 = vmul.f32 %v2343_v25, %v2341_v34 }
 0x687   : > { %2337 = vrot.lane.b32.xlu1 %v2335_v30, %s2751_s17  ;;  %2329 = vrot.lane.b32.xlu0 %v2327_v27, %s2750_s16 }
 0x68b   : > { %2358 = vrot.lane.b32.xlu1 %v2356_v8, %s2751_s17  ;;  %2350 = vrot.lane.b32.xlu0 %v2348_v29, %s2750_s16  ;;  %s2461_s16 = sshll.u32 %s4348_s19, 2 }
 0x68c   : > { %s236_s6 = scalar_lea.vmem %s4333_s4, %s2461_s16 }
 0x6f5   : > { %v2309_v7 = vpop.permute.xlu0 %2308  ;;  %v2317_v26 = vpop.permute.xlu1 %2316 }
 0x6f6   : > { %v2311_v20 = vadd.f32 %v2309_v7, %v2302_v39 }
 0x6f8   : > { %v2319_v55 = vadd.f32 %v2317_v26, %v2311_v20 }
 0x6f9   : > { %v2330_v58 = vpop.permute.xlu0 %2329  ;;  %v2338_v32 = vpop.permute.xlu1 %2337 }
 0x6fa   : > { %v2324_v4 = vadd.f32 %v2323_v18, %v2319_v55 }
 0x6fc   : > { %v2332_v17 = vadd.f32 %v2330_v58, %v2324_v4 }
 0x6fd   : > { %v2351_v36 = vpop.permute.xlu0 %2350  ;;  %v2359_v22 = vpop.permute.xlu1 %2358 }
 0x6fe   : > { %v2340_v21 = vadd.f32 %v2338_v32, %v2332_v17 }
 0x700   : > { %v2345_v3 = vadd.f32 %v2344_v33, %v2340_v21 }
 0x702   : > { %v2353_v53 = vadd.f32 %v2351_v36, %v2345_v3 }
 0x704   : > { %v2361_v13 = vadd.f32 %v2359_v22, %v2353_v53 }
 0x706   : > { %2363 = vst.msk [vmem:[%s236_s6] sm:$0x7] %vm2362_vm7, %v2361_v13 }
 0x707 PF: > { %s16_s15 = sadd.s32 1, %s2741_s15  }
 0x708   : > { %p13_p2 = scmp.ge.s32.totalorder %s16_s15, 4  }
 0x70a   :  { %15 = sbr.rel (!%p13_p2) target bundleno = 2 (0x2), region = 100 }
 0x70f   :  { %2383 = vsyncpa [#allocation9], 1 }
 0x710   :  { %2385 = vsyncpa [#allocation9 + $0x1], 1 }
 0x711   :  { %2386 = vsyncpa [#allocation11], 1 }

</bundles_post_ra>
